<compile_context>
chip_gen: v5e
topology: v5e:2x2
jax: 0.10.0
libtpu: 0.0.40
codegen_flags: <defaults>
</compile_context>

<pallas_src>
import functools

import jax
import jax.numpy as jnp
from jax import lax
from jax.experimental import pallas as pl
from jax.experimental.pallas import tpu as pltpu


def _supcon_kernel(q_ref, k_ref, tq_ref, tk_ref, num_ref, card_ref,
                   m_sc, s_sc, c_sc,
                   *, inv_temp, n_valid, n_pad, blk_q, blk_k):
    r = pl.program_id(0)          # query-row tile
    p = pl.program_id(1)          # 0: stats pass, 1: loss pass
    k = pl.program_id(2)          # key-column tile
    padded = n_valid < n_pad      # static Python bool

    # ---- per-query-tile init (accumulators resident across p/k axes) ------
    @pl.when(jnp.logical_and(p == 0, k == 0))
    def _init():
        m_sc[...] = jnp.full_like(m_sc, -jnp.inf)
        s_sc[...] = jnp.zeros_like(s_sc)
        c_sc[...] = jnp.zeros_like(c_sc)
        num_ref[...] = jnp.zeros_like(num_ref)
        card_ref[...] = jnp.zeros_like(card_ref)

    # ---- similarity tile: pre-normalized rows, temperature folded ---------
    q = q_ref[...].astype(jnp.float32)                       # (TQ, D)
    kv = k_ref[...].astype(jnp.float32)                      # (TK, D)
    q_inv = inv_temp / jnp.maximum(
        jnp.sqrt(jnp.sum(q * q, axis=-1, keepdims=True)), 1e-8)
    k_inv = 1.0 / jnp.maximum(
        jnp.sqrt(jnp.sum(kv * kv, axis=-1, keepdims=True)), 1e-8)
    # contraction on the last dim of both operands -> MXU, no transposes.
    d = lax.dot_general(q * q_inv, kv * k_inv,
                        (((1,), (1,)), ((), ())),
                        preferred_element_type=jnp.float32)  # (TQ, TK)

    same = tq_ref[...] == tk_ref[...]                        # (TQ, TK) bool
    row_ids = r * blk_q + lax.broadcasted_iota(jnp.int32, d.shape, 0)
    col_ids = k * blk_k + lax.broadcasted_iota(jnp.int32, d.shape, 1)
    col_valid = (col_ids < n_valid) if padded else None

    @pl.when(p == 0)
    def _stats():
        if padded:
            d_max = jnp.where(col_valid, d, -jnp.inf)
            neg = jnp.logical_and(jnp.logical_not(same), col_valid)
        else:
            d_max = d
            neg = jnp.logical_not(same)
        # online row-max + rescaled exp-sum over non-similar columns
        m_new = jnp.maximum(m_sc[...], jnp.max(d_max, axis=1, keepdims=True))
        alpha = jnp.exp(m_sc[...] - m_new)
        e_neg = jnp.where(neg, jnp.exp(d - m_new), 0.0)
        s_sc[...] = alpha * s_sc[...] + jnp.sum(e_neg, axis=1, keepdims=True)
        c_sc[...] = c_sc[...] + jnp.sum(jnp.where(neg, 1.0, 0.0),
                                        axis=1, keepdims=True)
        m_sc[...] = m_new

    @pl.when(p == 1)
    def _loss():
        e = jnp.exp(d - m_sc[...]) + 1e-5                    # (TQ, TK)
        # sum over non-similar j of (exp(d_ij - m_i) + 1e-5)
        neg_sum = s_sc[...] + 1e-5 * c_sc[...]               # (TQ, 1)
        # -log(e / (neg_sum + e + 1e-5)) == log(neg_sum + e + 1e-5) - log(e)
        log_prob = jnp.log(neg_sum + e + 1e-5) - jnp.log(e)
        pos = jnp.logical_and(same, row_ids != col_ids)
        if padded:
            pos = jnp.logical_and(
                pos, jnp.logical_and(col_valid, row_ids < n_valid))
        num_ref[...] += jnp.sum(jnp.where(pos, log_prob, 0.0),
                                axis=1, keepdims=True)
        card_ref[...] += jnp.sum(jnp.where(pos, 1.0, 0.0),
                                 axis=1, keepdims=True)


def _round_up(x, m):
    return ((x + m - 1) // m) * m


def supervised_contrastive_loss(projections, targets, temperature=0.1,
                                block_q=128, block_k=512):
    """Forward pass of Supervised_Contrastive_Loss (attribute=None path)."""
    n, dim = projections.shape

    n_pad = _round_up(n, 128)
    blk_q = min(block_q, n_pad)
    blk_k = min(block_k, n_pad)
    n_pad = _round_up(n_pad, blk_k)        # blk_q (mult of 128) and blk_k divide n_pad
    grid = (n_pad // blk_q, 2, n_pad // blk_k)

    t = targets.astype(jnp.int32).reshape(n)
    if n_pad != n:
        proj = jnp.zeros((n_pad, dim), projections.dtype).at[:n, :].set(projections)
        t_pad = jnp.zeros((n_pad,), jnp.int32).at[:n].set(t)
    else:
        proj, t_pad = projections, t
    t_col = t_pad.reshape(n_pad, 1)
    t_row = t_pad.reshape(1, n_pad)

    kernel = functools.partial(
        _supcon_kernel, inv_temp=1.0 / float(temperature),
        n_valid=n, n_pad=n_pad, blk_q=blk_q, blk_k=blk_k)

    num, card = pl.pallas_call(
        kernel,
        out_shape=(jax.ShapeDtypeStruct((n_pad, 1), jnp.float32),
                   jax.ShapeDtypeStruct((n_pad, 1), jnp.float32)),
        grid_spec=pltpu.PrefetchScalarGridSpec(
            num_scalar_prefetch=0,
            grid=grid,
            in_specs=[
                pl.BlockSpec((blk_q, dim), lambda r, p, k: (r, 0)),   # query rows
                pl.BlockSpec((blk_k, dim), lambda r, p, k: (k, 0)),   # key rows
                pl.BlockSpec((blk_q, 1), lambda r, p, k: (r, 0)),     # targets (col)
                pl.BlockSpec((1, blk_k), lambda r, p, k: (0, k)),     # targets (row)
            ],
            out_specs=[
                pl.BlockSpec((blk_q, 1), lambda r, p, k: (r, 0)),     # per-row numerator
                pl.BlockSpec((blk_q, 1), lambda r, p, k: (r, 0)),     # per-row cardinality
            ],
            scratch_shapes=[pltpu.VMEM((blk_q, 1), jnp.float32)] * 3,
        ),
        compiler_params=pltpu.CompilerParams(
            dimension_semantics=("parallel", "arbitrary", "arbitrary")),
    )(proj, proj, t_col, t_row)

    return jnp.sum(num) / (jnp.sum(card) + 1e-5)


def _reference(projections, targets, temperature=0.1):
    p = projections.astype(jnp.float32)
    norms = jnp.sqrt(jnp.sum(p * p, axis=-1, keepdims=True))
    cos = (p @ p.T) / jnp.maximum(norms * norms.T, 1e-8)
    d = cos / temperature
    e = jnp.exp(d - jnp.max(d, axis=1, keepdims=True)) + 1e-5
    same = (targets[:, None] == targets[None, :]).astype(jnp.float32)
    eye = jnp.eye(p.shape[0], dtype=jnp.float32)
    mask_combined = same * (1.0 - eye)
    mask_nonsim = 1.0 - same
    log_prob = -jnp.log(e / (jnp.sum(e * mask_nonsim, axis=1, keepdims=True) + e + 1e-5))
    return jnp.sum(log_prob * mask_combined) / (jnp.sum(mask_combined) + 1e-5)


if __name__ == "__main__":
    key = jax.random.PRNGKey(0)
    kp, kt = jax.random.split(key)

    # Small single-tile case (N=8 rows padded into one 128-row tile).
    N, D = 8, 32
    projections = jax.random.normal(kp, (N, D), dtype=jnp.float32)
    targets = jax.random.randint(kt, (N,), 0, 3, dtype=jnp.int32)

    loss = jax.block_until_ready(
        supervised_contrastive_loss(projections, targets, temperature=0.1))
    ref = _reference(projections, targets, temperature=0.1)
    assert jnp.allclose(loss, ref, rtol=1e-3, atol=1e-3), (loss, ref)

    # Multi-tile case exercising padding, multiple row tiles and the 2-pass
    # online key-axis reduction (grid = (2, 2, 2)).
    kp2, kt2 = jax.random.split(jax.random.PRNGKey(1))
    N2, D2 = 200, 32
    proj2 = jax.random.normal(kp2, (N2, D2), dtype=jnp.float32)
    tgt2 = jax.random.randint(kt2, (N2,), 0, 5, dtype=jnp.int32)
    loss2 = jax.block_until_ready(
        supervised_contrastive_loss(proj2, tgt2, temperature=0.1,
                                    block_q=128, block_k=128))
    ref2 = _reference(proj2, tgt2, temperature=0.1)
    assert jnp.allclose(loss2, ref2, rtol=1e-3, atol=1e-3), (loss2, ref2)

    print("KERNEL_OK")
</pallas_src>

<mosaic_0001>
module attributes {stable_mosaic.version = 11 : i64} {
  func.func @_supcon_kernel(%arg0: i32, %arg1: i32, %arg2: i32, %arg3: memref<128x32xf32, #tpu.memory_space<vmem>>, %arg4: memref<128x32xf32, #tpu.memory_space<vmem>>, %arg5: memref<128x1xi32, #tpu.memory_space<vmem>>, %arg6: memref<1x128xi32, #tpu.memory_space<vmem>>, %arg7: memref<128x1xf32, #tpu.memory_space<vmem>>, %arg8: memref<128x1xf32, #tpu.memory_space<vmem>>, %arg9: memref<128x1xf32, #tpu.memory_space<vmem>>, %arg10: memref<128x1xf32, #tpu.memory_space<vmem>>, %arg11: memref<128x1xf32, #tpu.memory_space<vmem>>) attributes {dimension_semantics = [#tpu.dimension_semantics<parallel>, #tpu.dimension_semantics<arbitrary>, #tpu.dimension_semantics<arbitrary>], iteration_bounds = array<i64: 1, 2, 1>, scalar_prefetch = 0 : i64, scratch_operands = 3 : i64, tpu.core_type = #tpu.core_type<tc>, window_params = [{transform_indices = @transform_0, window_bounds = array<i64: 128, 32>}, {transform_indices = @transform_1, window_bounds = array<i64: 128, 32>}, {transform_indices = @transform_2, window_bounds = array<i64: 128, 1>}, {transform_indices = @transform_3, window_bounds = array<i64: 1, 128>}, {transform_indices = @transform_4, window_bounds = array<i64: 128, 1>}, {transform_indices = @transform_5, window_bounds = array<i64: 128, 1>}]} {
    %c0_i32 = arith.constant 0 : i32
    %0 = arith.cmpi eq, %arg1, %c0_i32 : i32
    %c0_i32_0 = arith.constant 0 : i32
    %1 = arith.cmpi eq, %arg2, %c0_i32_0 : i32
    %2 = arith.andi %0, %1 : i1
    %3 = arith.extui %2 : i1 to i32
    %c0_i32_1 = arith.constant 0 : i32
    %4 = arith.cmpi ne, %3, %c0_i32_1 : i32
    scf.if %4 {
      %cst_19 = arith.constant 0xFF800000 : f32
      %49 = vector.broadcast %cst_19 : f32 to vector<128x1xf32>
      %c0_20 = arith.constant 0 : index
      %c0_21 = arith.constant 0 : index
      %50 = vector.load %arg9[%c0_20, %c0_21] : memref<128x1xf32, #tpu.memory_space<vmem>>, vector<128x1xf32>
      tpu.vector_store %arg9[%c0_20, %c0_21], %49 {strides = array<i32>} : memref<128x1xf32, #tpu.memory_space<vmem>>, vector<128x1xf32>,
      %cst_22 = arith.constant 0.000000e+00 : f32
      %51 = vector.broadcast %cst_22 : f32 to vector<128x1xf32>
      %c0_23 = arith.constant 0 : index
      %c0_24 = arith.constant 0 : index
      %52 = vector.load %arg10[%c0_23, %c0_24] : memref<128x1xf32, #tpu.memory_space<vmem>>, vector<128x1xf32>
      tpu.vector_store %arg10[%c0_23, %c0_24], %51 {strides = array<i32>} : memref<128x1xf32, #tpu.memory_space<vmem>>, vector<128x1xf32>,
      %cst_25 = arith.constant 0.000000e+00 : f32
      %53 = vector.broadcast %cst_25 : f32 to vector<128x1xf32>
      %c0_26 = arith.constant 0 : index
      %c0_27 = arith.constant 0 : index
      %54 = vector.load %arg11[%c0_26, %c0_27] : memref<128x1xf32, #tpu.memory_space<vmem>>, vector<128x1xf32>
      tpu.vector_store %arg11[%c0_26, %c0_27], %53 {strides = array<i32>} : memref<128x1xf32, #tpu.memory_space<vmem>>, vector<128x1xf32>,
      %cst_28 = arith.constant 0.000000e+00 : f32
      %55 = vector.broadcast %cst_28 : f32 to vector<128x1xf32>
      %c0_29 = arith.constant 0 : index
      %c0_30 = arith.constant 0 : index
      %56 = vector.load %arg7[%c0_29, %c0_30] : memref<128x1xf32, #tpu.memory_space<vmem>>, vector<128x1xf32>
      tpu.vector_store %arg7[%c0_29, %c0_30], %55 {strides = array<i32>} : memref<128x1xf32, #tpu.memory_space<vmem>>, vector<128x1xf32>,
      %cst_31 = arith.constant 0.000000e+00 : f32
      %57 = vector.broadcast %cst_31 : f32 to vector<128x1xf32>
      %c0_32 = arith.constant 0 : index
      %c0_33 = arith.constant 0 : index
      %58 = vector.load %arg8[%c0_32, %c0_33] : memref<128x1xf32, #tpu.memory_space<vmem>>, vector<128x1xf32>
      tpu.vector_store %arg8[%c0_32, %c0_33], %57 {strides = array<i32>} : memref<128x1xf32, #tpu.memory_space<vmem>>, vector<128x1xf32>,
    } else {
    }
    %c0 = arith.constant 0 : index
    %c0_2 = arith.constant 0 : index
    %5 = vector.load %arg3[%c0, %c0_2] : memref<128x32xf32, #tpu.memory_space<vmem>>, vector<128x32xf32>
    %c0_3 = arith.constant 0 : index
    %c0_4 = arith.constant 0 : index
    %6 = vector.load %arg4[%c0_3, %c0_4] : memref<128x32xf32, #tpu.memory_space<vmem>>, vector<128x32xf32>
    %7 = arith.mulf %5, %5 : vector<128x32xf32>
    %cst = arith.constant dense<0.000000e+00> : vector<128xf32>
    %8 = vector.multi_reduction <add>, %7, %cst [1] : vector<128x32xf32> to vector<128xf32>
    %9 = vector.shape_cast %8 : vector<128xf32> to vector<128x1xf32>
    %10 = math.sqrt %9 : vector<128x1xf32>
    %cst_5 = arith.constant 9.99999993E-9 : f32
    %11 = vector.broadcast %cst_5 : f32 to vector<128x1xf32>
    %12 = arith.maximumf %10, %11 : vector<128x1xf32>
    %cst_6 = arith.constant 1.000000e+01 : f32
    %13 = vector.broadcast %cst_6 : f32 to vector<128x1xf32>
    %14 = arith.divf %13, %12 : vector<128x1xf32>
    %15 = arith.mulf %6, %6 : vector<128x32xf32>
    %cst_7 = arith.constant dense<0.000000e+00> : vector<128xf32>
    %16 = vector.multi_reduction <add>, %15, %cst_7 [1] : vector<128x32xf32> to vector<128xf32>
    %17 = vector.shape_cast %16 : vector<128xf32> to vector<128x1xf32>
    %18 = math.sqrt %17 : vector<128x1xf32>
    %cst_8 = arith.constant 9.99999993E-9 : f32
    %19 = vector.broadcast %cst_8 : f32 to vector<128x1xf32>
    %20 = arith.maximumf %18, %19 : vector<128x1xf32>
    %cst_9 = arith.constant 1.000000e+00 : f32
    %21 = vector.broadcast %cst_9 : f32 to vector<128x1xf32>
    %22 = arith.divf %21, %20 : vector<128x1xf32>
    %23 = vector.broadcast %14 : vector<128x1xf32> to vector<128x32xf32>
    %24 = arith.mulf %5, %23 : vector<128x32xf32>
    %25 = vector.broadcast %22 : vector<128x1xf32> to vector<128x32xf32>
    %26 = arith.mulf %6, %25 : vector<128x32xf32>
    %cst_10 = arith.constant dense<0.000000e+00> : vector<128x128xf32>
    %27 = tpu.matmul %24, %26, %cst_10 {dimension_numbers = #tpu.dot_dimension_numbers<[1], [1], [0], [0], [0, 0, 1, 0], [], []>} : vector<128x32xf32>, vector<128x32xf32>, vector<128x128xf32> -> vector<128x128xf32>
    %c0_11 = arith.constant 0 : index
    %c0_12 = arith.constant 0 : index
    %28 = vector.load %arg5[%c0_11, %c0_12] : memref<128x1xi32, #tpu.memory_space<vmem>>, vector<128x1xi32>
    %c0_13 = arith.constant 0 : index
    %c0_14 = arith.constant 0 : index
    %29 = vector.load %arg6[%c0_13, %c0_14] : memref<1x128xi32, #tpu.memory_space<vmem>>, vector<1x128xi32>
    %30 = vector.broadcast %28 : vector<128x1xi32> to vector<128x128xi32>
    %31 = vector.broadcast %29 : vector<1x128xi32> to vector<128x128xi32>
    %32 = arith.cmpi eq, %30, %31 : vector<128x128xi32>
    %c128_i32 = arith.constant 128 : i32
    %33 = arith.muli %arg0, %c128_i32 : i32
    %34 = tpu.iota {dimensions = array<i32: 0>} : vector<128x128xi32>
    %35 = vector.broadcast %33 : i32 to vector<128x128xi32>
    %36 = arith.addi %35, %34 : vector<128x128xi32>
    %c128_i32_15 = arith.constant 128 : i32
    %37 = arith.muli %arg2, %c128_i32_15 : i32
    %38 = tpu.iota {dimensions = array<i32: 1>} : vector<128x128xi32>
    %39 = vector.broadcast %37 : i32 to vector<128x128xi32>
    %40 = arith.addi %39, %38 : vector<128x128xi32>
    %c8_i32 = arith.constant 8 : i32
    %41 = vector.broadcast %c8_i32 : i32 to vector<128x128xi32>
    %42 = arith.cmpi slt, %40, %41 : vector<128x128xi32>
    %c0_i32_16 = arith.constant 0 : i32
    %43 = arith.cmpi eq, %arg1, %c0_i32_16 : i32
    %44 = arith.extui %43 : i1 to i32
    %c0_i32_17 = arith.constant 0 : i32
    %45 = arith.cmpi ne, %44, %c0_i32_17 : i32
    scf.if %45 {
      %cst_19 = arith.constant 0xFF800000 : f32
      %49 = vector.broadcast %cst_19 : f32 to vector<128x128xf32>
      %50 = arith.select %42, %27, %49 : vector<128x128xi1>, vector<128x128xf32>
      %cst_20 = arith.constant dense<true> : vector<128x128xi1>
      %51 = arith.xori %32, %cst_20 : vector<128x128xi1>
      %52 = arith.andi %51, %42 : vector<128x128xi1>
      %c0_21 = arith.constant 0 : index
      %c0_22 = arith.constant 0 : index
      %53 = vector.load %arg9[%c0_21, %c0_22] : memref<128x1xf32, #tpu.memory_space<vmem>>, vector<128x1xf32>
      %cst_23 = arith.constant dense<0xFF800000> : vector<128xf32>
      %54 = vector.multi_reduction <maximumf>, %50, %cst_23 [1] : vector<128x128xf32> to vector<128xf32>
      %55 = vector.shape_cast %54 : vector<128xf32> to vector<128x1xf32>
      %56 = arith.maximumf %53, %55 : vector<128x1xf32>
      %c0_24 = arith.constant 0 : index
      %c0_25 = arith.constant 0 : index
      %57 = vector.load %arg9[%c0_24, %c0_25] : memref<128x1xf32, #tpu.memory_space<vmem>>, vector<128x1xf32>
      %58 = arith.subf %57, %56 : vector<128x1xf32>
      %59 = math.exp %58 : vector<128x1xf32>
      %60 = vector.broadcast %56 : vector<128x1xf32> to vector<128x128xf32>
      %61 = arith.subf %27, %60 : vector<128x128xf32>
      %62 = math.exp %61 : vector<128x128xf32>
      %cst_26 = arith.constant 0.000000e+00 : f32
      %63 = vector.broadcast %cst_26 : f32 to vector<128x128xf32>
      %64 = arith.select %52, %62, %63 : vector<128x128xi1>, vector<128x128xf32>
      %c0_27 = arith.constant 0 : index
      %c0_28 = arith.constant 0 : index
      %65 = vector.load %arg10[%c0_27, %c0_28] : memref<128x1xf32, #tpu.memory_space<vmem>>, vector<128x1xf32>
      %66 = arith.mulf %59, %65 : vector<128x1xf32>
      %cst_29 = arith.constant dense<0.000000e+00> : vector<128xf32>
      %67 = vector.multi_reduction <add>, %64, %cst_29 [1] : vector<128x128xf32> to vector<128xf32>
      %68 = vector.shape_cast %67 : vector<128xf32> to vector<128x1xf32>
      %69 = arith.addf %66, %68 : vector<128x1xf32>
      %c0_30 = arith.constant 0 : index
      %c0_31 = arith.constant 0 : index
      %70 = vector.load %arg10[%c0_30, %c0_31] : memref<128x1xf32, #tpu.memory_space<vmem>>, vector<128x1xf32>
      tpu.vector_store %arg10[%c0_30, %c0_31], %69 {strides = array<i32>} : memref<128x1xf32, #tpu.memory_space<vmem>>, vector<128x1xf32>,
      %c0_32 = arith.constant 0 : index
      %c0_33 = arith.constant 0 : index
      %71 = vector.load %arg11[%c0_32, %c0_33] : memref<128x1xf32, #tpu.memory_space<vmem>>, vector<128x1xf32>
      %cst_34 = arith.constant 1.000000e+00 : f32
      %cst_35 = arith.constant 0.000000e+00 : f32
      %72 = vector.broadcast %cst_34 : f32 to vector<128x128xf32>
      %73 = vector.broadcast %cst_35 : f32 to vector<128x128xf32>
      %74 = arith.select %52, %72, %73 : vector<128x128xi1>, vector<128x128xf32>
      %cst_36 = arith.constant dense<0.000000e+00> : vector<128xf32>
      %75 = vector.multi_reduction <add>, %74, %cst_36 [1] : vector<128x128xf32> to vector<128xf32>
      %76 = vector.shape_cast %75 : vector<128xf32> to vector<128x1xf32>
      %77 = arith.addf %71, %76 : vector<128x1xf32>
      %c0_37 = arith.constant 0 : index
      %c0_38 = arith.constant 0 : index
      %78 = vector.load %arg11[%c0_37, %c0_38] : memref<128x1xf32, #tpu.memory_space<vmem>>, vector<128x1xf32>
      tpu.vector_store %arg11[%c0_37, %c0_38], %77 {strides = array<i32>} : memref<128x1xf32, #tpu.memory_space<vmem>>, vector<128x1xf32>,
      %c0_39 = arith.constant 0 : index
      %c0_40 = arith.constant 0 : index
      %79 = vector.load %arg9[%c0_39, %c0_40] : memref<128x1xf32, #tpu.memory_space<vmem>>, vector<128x1xf32>
      tpu.vector_store %arg9[%c0_39, %c0_40], %56 {strides = array<i32>} : memref<128x1xf32, #tpu.memory_space<vmem>>, vector<128x1xf32>,
    } else {
    }
    %c1_i32 = arith.constant 1 : i32
    %46 = arith.cmpi eq, %arg1, %c1_i32 : i32
    %47 = arith.extui %46 : i1 to i32
    %c0_i32_18 = arith.constant 0 : i32
    %48 = arith.cmpi ne, %47, %c0_i32_18 : i32
    scf.if %48 {
      %c0_19 = arith.constant 0 : index
      %c0_20 = arith.constant 0 : index
      %49 = vector.load %arg9[%c0_19, %c0_20] : memref<128x1xf32, #tpu.memory_space<vmem>>, vector<128x1xf32>
      %50 = vector.broadcast %49 : vector<128x1xf32> to vector<128x128xf32>
      %51 = arith.subf %27, %50 : vector<128x128xf32>
      %52 = math.exp %51 : vector<128x128xf32>
      %cst_21 = arith.constant 9.99999974E-6 : f32
      %53 = vector.broadcast %cst_21 : f32 to vector<128x128xf32>
      %54 = arith.addf %52, %53 : vector<128x128xf32>
      %c0_22 = arith.constant 0 : index
      %c0_23 = arith.constant 0 : index
      %55 = vector.load %arg10[%c0_22, %c0_23] : memref<128x1xf32, #tpu.memory_space<vmem>>, vector<128x1xf32>
      %c0_24 = arith.constant 0 : index
      %c0_25 = arith.constant 0 : index
      %56 = vector.load %arg11[%c0_24, %c0_25] : memref<128x1xf32, #tpu.memory_space<vmem>>, vector<128x1xf32>
      %cst_26 = arith.constant 9.99999974E-6 : f32
      %57 = vector.broadcast %cst_26 : f32 to vector<128x1xf32>
      %58 = arith.mulf %57, %56 : vector<128x1xf32>
      %59 = arith.addf %55, %58 : vector<128x1xf32>
      %60 = vector.broadcast %59 : vector<128x1xf32> to vector<128x128xf32>
      %61 = arith.addf %60, %54 : vector<128x128xf32>
      %cst_27 = arith.constant 9.99999974E-6 : f32
      %62 = vector.broadcast %cst_27 : f32 to vector<128x128xf32>
      %63 = arith.addf %61, %62 : vector<128x128xf32>
      %64 = math.log %63 : vector<128x128xf32>
      %65 = math.log %54 : vector<128x128xf32>
      %66 = arith.subf %64, %65 : vector<128x128xf32>
      %67 = arith.cmpi ne, %36, %40 : vector<128x128xi32>
      %68 = arith.andi %32, %67 : vector<128x128xi1>
      %c8_i32_28 = arith.constant 8 : i32
      %69 = vector.broadcast %c8_i32_28 : i32 to vector<128x128xi32>
      %70 = arith.cmpi slt, %36, %69 : vector<128x128xi32>
      %71 = arith.andi %42, %70 : vector<128x128xi1>
      %72 = arith.andi %68, %71 : vector<128x128xi1>
      %c0_29 = arith.constant 0 : index
      %c0_30 = arith.constant 0 : index
      %73 = vector.load %arg7[%c0_29, %c0_30] : memref<128x1xf32, #tpu.memory_space<vmem>>, vector<128x1xf32>
      %cst_31 = arith.constant 0.000000e+00 : f32
      %74 = vector.broadcast %cst_31 : f32 to vector<128x128xf32>
      %75 = arith.select %72, %66, %74 : vector<128x128xi1>, vector<128x128xf32>
      %cst_32 = arith.constant dense<0.000000e+00> : vector<128xf32>
      %76 = vector.multi_reduction <add>, %75, %cst_32 [1] : vector<128x128xf32> to vector<128xf32>
      %77 = vector.shape_cast %76 : vector<128xf32> to vector<128x1xf32>
      %78 = arith.addf %73, %77 : vector<128x1xf32>
      %c0_33 = arith.constant 0 : index
      %c0_34 = arith.constant 0 : index
      %79 = vector.load %arg7[%c0_33, %c0_34] : memref<128x1xf32, #tpu.memory_space<vmem>>, vector<128x1xf32>
      tpu.vector_store %arg7[%c0_33, %c0_34], %78 {strides = array<i32>} : memref<128x1xf32, #tpu.memory_space<vmem>>, vector<128x1xf32>,
      %c0_35 = arith.constant 0 : index
      %c0_36 = arith.constant 0 : index
      %80 = vector.load %arg8[%c0_35, %c0_36] : memref<128x1xf32, #tpu.memory_space<vmem>>, vector<128x1xf32>
      %cst_37 = arith.constant 1.000000e+00 : f32
      %cst_38 = arith.constant 0.000000e+00 : f32
      %81 = vector.broadcast %cst_37 : f32 to vector<128x128xf32>
      %82 = vector.broadcast %cst_38 : f32 to vector<128x128xf32>
      %83 = arith.select %72, %81, %82 : vector<128x128xi1>, vector<128x128xf32>
      %cst_39 = arith.constant dense<0.000000e+00> : vector<128xf32>
      %84 = vector.multi_reduction <add>, %83, %cst_39 [1] : vector<128x128xf32> to vector<128xf32>
      %85 = vector.shape_cast %84 : vector<128xf32> to vector<128x1xf32>
      %86 = arith.addf %80, %85 : vector<128x1xf32>
      %c0_40 = arith.constant 0 : index
      %c0_41 = arith.constant 0 : index
      %87 = vector.load %arg8[%c0_40, %c0_41] : memref<128x1xf32, #tpu.memory_space<vmem>>, vector<128x1xf32>
      tpu.vector_store %arg8[%c0_40, %c0_41], %86 {strides = array<i32>} : memref<128x1xf32, #tpu.memory_space<vmem>>, vector<128x1xf32>,
    } else {
    }
    return
  }
  func.func @transform_0(%arg0: i32, %arg1: i32, %arg2: i32) -> (i32, i32) {
    %c0_i32 = arith.constant 0 : i32
    %c0_i32_0 = arith.constant 0 : i32
    return %arg0, %c0_i32 : i32, i32
  }
  func.func @transform_1(%arg0: i32, %arg1: i32, %arg2: i32) -> (i32, i32) {
    %c0_i32 = arith.constant 0 : i32
    %c0_i32_0 = arith.constant 0 : i32
    return %arg2, %c0_i32 : i32, i32
  }
  func.func @transform_2(%arg0: i32, %arg1: i32, %arg2: i32) -> (i32, i32) {
    %c0_i32 = arith.constant 0 : i32
    %c0_i32_0 = arith.constant 0 : i32
    return %arg0, %c0_i32 : i32, i32
  }
  func.func @transform_3(%arg0: i32, %arg1: i32, %arg2: i32) -> (i32, i32) {
    %c0_i32 = arith.constant 0 : i32
    %c0_i32_0 = arith.constant 0 : i32
    return %c0_i32, %arg2 : i32, i32
  }
  func.func @transform_4(%arg0: i32, %arg1: i32, %arg2: i32) -> (i32, i32) {
    %c0_i32 = arith.constant 0 : i32
    %c0_i32_0 = arith.constant 0 : i32
    return %arg0, %c0_i32 : i32, i32
  }
  func.func @transform_5(%arg0: i32, %arg1: i32, %arg2: i32) -> (i32, i32) {
    %c0_i32 = arith.constant 0 : i32
    %c0_i32_0 = arith.constant 0 : i32
    return %arg0, %c0_i32 : i32, i32
  }
}

</mosaic_0001>

<bundles_post_ra>
// kernel: tpu_custom_call.1
= control target key start
LH: loop header
LB: loop body
LE: loop exit
PB: predicated region body
PF: predicated region fallthrough
CT: control target
= control target key end

     0   :  { %s3556_s18 = smov 0   ;;  %s3558_s19 = smov 0   ;;  %s6161_s0 = inlined_call_operand.vmem [shape: f32[128,32], index: 0, kind: input, shape index: {}]   ;;  %s6162_s1 = inlined_call_operand.vmem [shape: f32[128,32], index: 1, kind: input, shape index: {}]   ;;  %s6163_s2 = inlined_call_operand.vmem [shape: s32[128,1], index: 2, kind: input, shape index: {}]   ;;  %s6164_s3 = inlined_call_operand.vmem [shape: s32[1,128], index: 3, kind: input, shape index: {}]   ;;  %s6165_s4 = inlined_call_operand.vmem [shape: f32[128,1], index: 4, kind: output, shape index: {0}]   ;;  %s6166_s5 = inlined_call_operand.vmem [shape: f32[128,1], index: 5, kind: output, shape index: {1}]  }
   0x1   :  { %s3560_s20 = smov 0  }
   0x2 LB: > { %s31_s21 = sadd.s32 1, %s3512_s19  ;;  %p3135_p0 = scmp.ge.s32.totalorder %s3516_s20, 1  ;;  %s3516_s20 = sphi %s3560_s20, %s16_s20   ;;  %s3512_s19 = sphi %s3558_s19, %s6367_s19   ;;  %s3508_s18 = sphi %s3556_s18, %s6366_s18  }
   0x3   : > { %p33_p1 = scmp.ge.s32.totalorder %s31_s21, 2  ;;  %p240_p2 = scmp.lt.s32.totalorder %s3516_s20, 3 }
   0x5   : > { %s6369_s21 = smov (%p33_p1, %s31_s21), 0  ;;  %p241_p3 = pnand %p3135_p0, %p240_p2 }
   0x7   : > { %244 = sbr.rel (%p241_p3) target bundleno = 1273 (0x4f9), region = 36 }
   0xc   : > { %p319_p4 = scmp.eq.s32.totalorder %s3508_s18, 0 }
   0xd   : > { %vm325_vm0 = vcmask (%p319_p4), 7168   ;;  %v3518_v0 = vmov (%p319_p4), -inf   ;;  %v3519_v1 = vmov (%p319_p4), 0.0  }
   0xe   : > { %324 = sbr.rel (!%p319_p4) target bundleno = 94 (0x5e), region = 40  ;;  %326 = vst.msk [vmem:[#allocation2] sm:$0xff] (%p319_p4), %vm325_vm0, %v3518_v0 }
   0xf   : > { %327 = vst.msk [vmem:[#allocation2 + $0x8] sm:$0xff] (%p319_p4), %vm325_vm0, %v3518_v0 }
  0x10   : > { %328 = vst.msk [vmem:[#allocation2 + $0x10] sm:$0xff] (%p319_p4), %vm325_vm0, %v3518_v0 }
  0x11   : > { %329 = vst.msk [vmem:[#allocation2 + $0x18] sm:$0xff] (%p319_p4), %vm325_vm0, %v3518_v0 }
  0x12   : > { %330 = vst.msk [vmem:[#allocation2 + $0x20] sm:$0xff] (%p319_p4), %vm325_vm0, %v3518_v0 }
  0x13   : > { %331 = vst.msk [vmem:[#allocation2 + $0x28] sm:$0xff] %vm325_vm0, %v3518_v0 }
  0x14   : > { %332 = vst.msk [vmem:[#allocation2 + $0x30] sm:$0xff] %vm325_vm0, %v3518_v0 }
  0x15   : > { %333 = vst.msk [vmem:[#allocation2 + $0x38] sm:$0xff] %vm325_vm0, %v3518_v0 }
  0x16   : > { %334 = vst.msk [vmem:[#allocation2 + $0x40] sm:$0xff] %vm325_vm0, %v3518_v0 }
  0x17   : > { %335 = vst.msk [vmem:[#allocation2 + $0x48] sm:$0xff] %vm325_vm0, %v3518_v0 }
  0x18   : > { %336 = vst.msk [vmem:[#allocation2 + $0x50] sm:$0xff] %vm325_vm0, %v3518_v0 }
  0x19   : > { %337 = vst.msk [vmem:[#allocation2 + $0x58] sm:$0xff] %vm325_vm0, %v3518_v0 }
  0x1a   : > { %338 = vst.msk [vmem:[#allocation2 + $0x60] sm:$0xff] %vm325_vm0, %v3518_v0 }
  0x1b   : > { %339 = vst.msk [vmem:[#allocation2 + $0x68] sm:$0xff] %vm325_vm0, %v3518_v0 }
  0x1c   : > { %340 = vst.msk [vmem:[#allocation2 + $0x70] sm:$0xff] %vm325_vm0, %v3518_v0 }
  0x1d   : > { %341 = vst.msk [vmem:[#allocation2 + $0x78] sm:$0xff] %vm325_vm0, %v3518_v0 }
  0x1e   : > { %342 = vst.msk [vmem:[#allocation3] sm:$0xff] %vm325_vm0, %v3519_v1 }
  0x1f   : > { %343 = vst.msk [vmem:[#allocation3 + $0x8] sm:$0xff] %vm325_vm0, %v3519_v1 }
  0x20   : > { %344 = vst.msk [vmem:[#allocation3 + $0x10] sm:$0xff] %vm325_vm0, %v3519_v1 }
  0x21   : > { %345 = vst.msk [vmem:[#allocation3 + $0x18] sm:$0xff] %vm325_vm0, %v3519_v1 }
  0x22   : > { %346 = vst.msk [vmem:[#allocation3 + $0x20] sm:$0xff] %vm325_vm0, %v3519_v1 }
  0x23   : > { %347 = vst.msk [vmem:[#allocation3 + $0x28] sm:$0xff] %vm325_vm0, %v3519_v1 }
  0x24   : > { %348 = vst.msk [vmem:[#allocation3 + $0x30] sm:$0xff] %vm325_vm0, %v3519_v1 }
  0x25   : > { %349 = vst.msk [vmem:[#allocation3 + $0x38] sm:$0xff] %vm325_vm0, %v3519_v1 }
  0x26   : > { %350 = vst.msk [vmem:[#allocation3 + $0x40] sm:$0xff] %vm325_vm0, %v3519_v1 }
  0x27   : > { %351 = vst.msk [vmem:[#allocation3 + $0x48] sm:$0xff] %vm325_vm0, %v3519_v1 }
  0x28   : > { %352 = vst.msk [vmem:[#allocation3 + $0x50] sm:$0xff] %vm325_vm0, %v3519_v1 }
  0x29   : > { %353 = vst.msk [vmem:[#allocation3 + $0x58] sm:$0xff] %vm325_vm0, %v3519_v1 }
  0x2a   : > { %354 = vst.msk [vmem:[#allocation3 + $0x60] sm:$0xff] %vm325_vm0, %v3519_v1 }
  0x2b   : > { %355 = vst.msk [vmem:[#allocation3 + $0x68] sm:$0xff] %vm325_vm0, %v3519_v1 }
  0x2c   : > { %356 = vst.msk [vmem:[#allocation3 + $0x70] sm:$0xff] %vm325_vm0, %v3519_v1 }
  0x2d   : > { %357 = vst.msk [vmem:[#allocation3 + $0x78] sm:$0xff] %vm325_vm0, %v3519_v1 }
  0x2e   : > { %358 = vst.msk [vmem:[#allocation4] sm:$0xff] %vm325_vm0, %v3519_v1 }
  0x2f   : > { %359 = vst.msk [vmem:[#allocation4 + $0x8] sm:$0xff] %vm325_vm0, %v3519_v1 }
  0x30   : > { %360 = vst.msk [vmem:[#allocation4 + $0x10] sm:$0xff] %vm325_vm0, %v3519_v1 }
  0x31   : > { %361 = vst.msk [vmem:[#allocation4 + $0x18] sm:$0xff] %vm325_vm0, %v3519_v1 }
  0x32   : > { %362 = vst.msk [vmem:[#allocation4 + $0x20] sm:$0xff] %vm325_vm0, %v3519_v1 }
  0x33   : > { %363 = vst.msk [vmem:[#allocation4 + $0x28] sm:$0xff] %vm325_vm0, %v3519_v1 }
  0x34   : > { %364 = vst.msk [vmem:[#allocation4 + $0x30] sm:$0xff] %vm325_vm0, %v3519_v1 }
  0x35   : > { %365 = vst.msk [vmem:[#allocation4 + $0x38] sm:$0xff] %vm325_vm0, %v3519_v1 }
  0x36   : > { %366 = vst.msk [vmem:[#allocation4 + $0x40] sm:$0xff] %vm325_vm0, %v3519_v1 }
  0x37   : > { %367 = vst.msk [vmem:[#allocation4 + $0x48] sm:$0xff] %vm325_vm0, %v3519_v1 }
  0x38   : > { %368 = vst.msk [vmem:[#allocation4 + $0x50] sm:$0xff] %vm325_vm0, %v3519_v1 }
  0x39   : > { %369 = vst.msk [vmem:[#allocation4 + $0x58] sm:$0xff] %vm325_vm0, %v3519_v1 }
  0x3a   : > { %370 = vst.msk [vmem:[#allocation4 + $0x60] sm:$0xff] %vm325_vm0, %v3519_v1 }
  0x3b   : > { %371 = vst.msk [vmem:[#allocation4 + $0x68] sm:$0xff] %vm325_vm0, %v3519_v1 }
  0x3c   : > { %372 = vst.msk [vmem:[#allocation4 + $0x70] sm:$0xff] %vm325_vm0, %v3519_v1 }
  0x3d   : > { %373 = vst.msk [vmem:[#allocation4 + $0x78] sm:$0xff] %vm325_vm0, %v3519_v1 }
  0x3e   : > { %374 = vst.msk [vmem:[%s6165_s4] sm:$0xff] %vm325_vm0, %v3519_v1 }
  0x3f   : > { %375 = vst.msk [vmem:[%s6165_s4 + $0x8] sm:$0xff] %vm325_vm0, %v3519_v1 }
  0x40   : > { %376 = vst.msk [vmem:[%s6165_s4 + $0x10] sm:$0xff] %vm325_vm0, %v3519_v1 }
  0x41   : > { %377 = vst.msk [vmem:[%s6165_s4 + $0x18] sm:$0xff] %vm325_vm0, %v3519_v1 }
  0x42   : > { %378 = vst.msk [vmem:[%s6165_s4 + $0x20] sm:$0xff] %vm325_vm0, %v3519_v1 }
  0x43   : > { %379 = vst.msk [vmem:[%s6165_s4 + $0x28] sm:$0xff] %vm325_vm0, %v3519_v1 }
  0x44   : > { %380 = vst.msk [vmem:[%s6165_s4 + $0x30] sm:$0xff] %vm325_vm0, %v3519_v1 }
  0x45   : > { %381 = vst.msk [vmem:[%s6165_s4 + $0x38] sm:$0xff] %vm325_vm0, %v3519_v1 }
  0x46   : > { %382 = vst.msk [vmem:[%s6165_s4 + $0x40] sm:$0xff] %vm325_vm0, %v3519_v1 }
  0x47   : > { %383 = vst.msk [vmem:[%s6165_s4 + $0x48] sm:$0xff] %vm325_vm0, %v3519_v1 }
  0x48   : > { %384 = vst.msk [vmem:[%s6165_s4 + $0x50] sm:$0xff] %vm325_vm0, %v3519_v1 }
  0x49   : > { %385 = vst.msk [vmem:[%s6165_s4 + $0x58] sm:$0xff] %vm325_vm0, %v3519_v1 }
  0x4a   : > { %386 = vst.msk [vmem:[%s6165_s4 + $0x60] sm:$0xff] %vm325_vm0, %v3519_v1 }
  0x4b   : > { %387 = vst.msk [vmem:[%s6165_s4 + $0x68] sm:$0xff] %vm325_vm0, %v3519_v1 }
  0x4c   : > { %388 = vst.msk [vmem:[%s6165_s4 + $0x70] sm:$0xff] %vm325_vm0, %v3519_v1 }
  0x4d   : > { %389 = vst.msk [vmem:[%s6165_s4 + $0x78] sm:$0xff] %vm325_vm0, %v3519_v1 }
  0x4e   : > { %390 = vst.msk [vmem:[%s6166_s5] sm:$0xff] %vm325_vm0, %v3519_v1 }
  0x4f   : > { %391 = vst.msk [vmem:[%s6166_s5 + $0x8] sm:$0xff] %vm325_vm0, %v3519_v1 }
  0x50   : > { %392 = vst.msk [vmem:[%s6166_s5 + $0x10] sm:$0xff] %vm325_vm0, %v3519_v1 }
  0x51   : > { %393 = vst.msk [vmem:[%s6166_s5 + $0x18] sm:$0xff] %vm325_vm0, %v3519_v1 }
  0x52   : > { %394 = vst.msk [vmem:[%s6166_s5 + $0x20] sm:$0xff] %vm325_vm0, %v3519_v1 }
  0x53   : > { %395 = vst.msk [vmem:[%s6166_s5 + $0x28] sm:$0xff] %vm325_vm0, %v3519_v1 }
  0x54   : > { %396 = vst.msk [vmem:[%s6166_s5 + $0x30] sm:$0xff] %vm325_vm0, %v3519_v1 }
  0x55   : > { %397 = vst.msk [vmem:[%s6166_s5 + $0x38] sm:$0xff] %vm325_vm0, %v3519_v1 }
  0x56   : > { %398 = vst.msk [vmem:[%s6166_s5 + $0x40] sm:$0xff] %vm325_vm0, %v3519_v1 }
  0x57   : > { %399 = vst.msk [vmem:[%s6166_s5 + $0x48] sm:$0xff] %vm325_vm0, %v3519_v1 }
  0x58   : > { %400 = vst.msk [vmem:[%s6166_s5 + $0x50] sm:$0xff] %vm325_vm0, %v3519_v1 }
  0x59   : > { %401 = vst.msk [vmem:[%s6166_s5 + $0x58] sm:$0xff] %vm325_vm0, %v3519_v1 }
  0x5a   : > { %402 = vst.msk [vmem:[%s6166_s5 + $0x60] sm:$0xff] %vm325_vm0, %v3519_v1 }
  0x5b   : > { %403 = vst.msk [vmem:[%s6166_s5 + $0x68] sm:$0xff] %vm325_vm0, %v3519_v1 }
  0x5c   : > { %404 = vst.msk [vmem:[%s6166_s5 + $0x70] sm:$0xff] %vm325_vm0, %v3519_v1 }
  0x5d   : > { %405 = vst.msk [vmem:[%s6166_s5 + $0x78] sm:$0xff] %vm325_vm0, %v3519_v1 }
  0x5e PF: > { %v3820_v2 = vld [vmem:[%s6162_s1 + $0x78] sm:$0xff]  ;;  %vm454_vm1 = vcmask 261120   ;;  %v435_v3 = vld [vmem:[%s6162_s1 + $0x68] sm:$0xff]  ;;  %v3833_v8 = vld [vmem:[%s6162_s1 + $0x70] sm:$0xff]  ;;  %p3169_p5 = scmp.ne.s32.totalorder %s3508_s18, 0 }
  0x5f   : > { %v433_v4 = vld [vmem:[%s6162_s1 + $0x58] sm:$0xff]  ;;  %v966_v5 = vmul.f32 %v3820_v2, %v3820_v2  ;;  %v964_v6 = vmul.f32 %v435_v3, %v435_v3  ;;  %v434_v9 = vld [vmem:[%s6162_s1 + $0x60] sm:$0xff]  ;;  %v432_v13 = vld [vmem:[%s6162_s1 + $0x50] sm:$0xff]  ;;  %v965_v14 = vmul.f32 %v3833_v8, %v3833_v8 }
  0x60   : > { %v962_v7 = vmul.f32 %v433_v4, %v433_v4  ;;  %v963_v15 = vmul.f32 %v434_v9, %v434_v9  ;;  %v961_v16 = vmul.f32 %v432_v13, %v432_v13  ;;  %v431_v20 = vld [vmem:[%s6162_s1 + $0x48] sm:$0xff]  ;;  %v430_v21 = vld [vmem:[%s6162_s1 + $0x40] sm:$0xff]  ;;  %v429_v22 = vld [vmem:[%s6162_s1 + $0x38] sm:$0xff] }
  0x61   : > { %v1012_v10 = vsel %vm454_vm1, %v966_v5, 0.0  ;;  %v1006_v11 = vsel %vm454_vm1, %v964_v6, 0.0  ;;  %v1009_v17 = vsel %vm454_vm1, %v965_v14, 0.0  ;;  %v960_v23 = vmul.f32 %v431_v20, %v431_v20  ;;  %v428_v29 = vld [vmem:[%s6162_s1 + $0x30] sm:$0xff]  ;;  %v427_v30 = vld [vmem:[%s6162_s1 + $0x28] sm:$0xff]  ;;  %v426_v31 = vld [vmem:[%s6162_s1 + $0x20] sm:$0xff] }
  0x62   : > { %v1000_v12 = vsel %vm454_vm1, %v962_v7, 0.0  ;;  %1013 = vadd.xlane.f32.xlu0 %v1012_v10  ;;  %1007 = vadd.xlane.f32.xlu1 %v1006_v11  ;;  %v1003_v18 = vsel %vm454_vm1, %v963_v15, 0.0  ;;  %v997_v19 = vsel %vm454_vm1, %v961_v16, 0.0  ;;  %v959_v24 = vmul.f32 %v430_v21, %v430_v21  ;;  %v425_v38 = vld [vmem:[%s6162_s1 + $0x18] sm:$0xff]  ;;  %v424_v39 = vld [vmem:[%s6162_s1 + $0x10] sm:$0xff]  ;;  %v423_v40 = vld [vmem:[%s6162_s1 + $0x8] sm:$0xff] }
  0x63   : > { %1001 = vadd.xlane.f32.xlu2 %v1000_v12  ;;  %v958_v25 = vmul.f32 %v429_v22, %v429_v22  ;;  %v994_v26 = vsel %vm454_vm1, %v960_v23, 0.0  ;;  %v957_v32 = vmul.f32 %v428_v29, %v428_v29  ;;  %v956_v33 = vmul.f32 %v427_v30, %v427_v30  ;;  %v422_v47 = vld [vmem:[%s6162_s1] sm:$0xff]  ;;  %v415_v58 = vld [vmem:[%s6161_s0 + $0x48] sm:$0xff]  ;;  %v420_v12 = vld [vmem:[%s6161_s0 + $0x70] sm:$0xff] }
  0x64   : > { %v991_v27 = vsel %vm454_vm1, %v959_v24, 0.0  ;;  %v955_v34 = vmul.f32 %v426_v31, %v426_v31  ;;  %v954_v41 = vmul.f32 %v425_v38, %v425_v38  ;;  %v953_v42 = vmul.f32 %v424_v39, %v424_v39  ;;  %v414_v48 = vld [vmem:[%s6161_s0 + $0x40] sm:$0xff]  ;;  %v407_v1 = vld [vmem:[%s6161_s0 + $0x8] sm:$0xff]  ;;  %v416_v13 = vld [vmem:[%s6161_s0 + $0x50] sm:$0xff] }
  0x65   : > { %v988_v28 = vsel %vm454_vm1, %v958_v25, 0.0  ;;  %v985_v35 = vsel %vm454_vm1, %v957_v32, 0.0  ;;  %v982_v36 = vsel %vm454_vm1, %v956_v33, 0.0  ;;  %v952_v43 = vmul.f32 %v423_v40, %v423_v40  ;;  %v418_v49 = vld [vmem:[%s6161_s0 + $0x60] sm:$0xff]  ;;  %v419_v3 = vld [vmem:[%s6161_s0 + $0x68] sm:$0xff]  ;;  %v408_v14 = vld [vmem:[%s6161_s0 + $0x10] sm:$0xff] }
  0x66   : > { %v979_v37 = vsel %vm454_vm1, %v955_v34, 0.0  ;;  %v976_v44 = vsel %vm454_vm1, %v954_v41, 0.0  ;;  %v973_v45 = vsel %vm454_vm1, %v953_v42, 0.0  ;;  %v951_v50 = vmul.f32 %v422_v47, %v422_v47  ;;  %v410_v56 = vld [vmem:[%s6161_s0 + $0x20] sm:$0xff]  ;;  %v411_v4 = vld [vmem:[%s6161_s0 + $0x28] sm:$0xff]  ;;  %v417_v21 = vld [vmem:[%s6161_s0 + $0x58] sm:$0xff] }
  0x67   : > { %v970_v46 = vsel %vm454_vm1, %v952_v43, 0.0  ;;  %v446_v51 = vmul.f32 %v414_v48, %v414_v48  ;;  %v450_v52 = vmul.f32 %v418_v49, %v418_v49  ;;  %v406_v57 = vld [vmem:[%s6161_s0] sm:$0xff]  ;;  %v442_v59 = vmul.f32 %v410_v56, %v410_v56  ;;  %v412_v22 = vld [vmem:[%s6161_s0 + $0x30] sm:$0xff]  ;;  %v421_v23 = vld [vmem:[%s6161_s0 + $0x78] sm:$0xff] }
  0x68   : > { %v967_v53 = vsel %vm454_vm1, %v951_v50, 0.0  ;;  %v438_v60 = vmul.f32 %v406_v57, %v406_v57  ;;  %v447_v61 = vmul.f32 %v415_v58, %v415_v58  ;;  %v439_v5 = vmul.f32 %v407_v1, %v407_v1  ;;  %v413_v30 = vld [vmem:[%s6161_s0 + $0x38] sm:$0xff] }
  0x69   : > { %v479_v54 = vsel %vm454_vm1, %v446_v51, 0.0  ;;  %v491_v55 = vsel %vm454_vm1, %v450_v52, 0.0  ;;  %v467_v62 = vsel %vm454_vm1, %v442_v59, 0.0  ;;  %v451_v6 = vmul.f32 %v419_v3, %v419_v3  ;;  %v409_v31 = vld [vmem:[%s6161_s0 + $0x18] sm:$0xff] }
  0x6a   : > { %1010 = vadd.xlane.f32.xlu0 %v1009_v17  ;;  %1004 = vadd.xlane.f32.xlu1 %v1003_v18  ;;  %v455_v63 = vsel %vm454_vm1, %v438_v60, 0.0  ;;  %v482_v0 = vsel %vm454_vm1, %v447_v61, 0.0  ;;  %v443_v7 = vmul.f32 %v411_v4, %v411_v4  ;;  %v458_v9 = vsel %vm454_vm1, %v439_v5, 0.0 }
  0x6b   : > { %998 = vadd.xlane.f32.xlu2 %v997_v19  ;;  %v494_v10 = vsel %vm454_vm1, %v451_v6, 0.0  ;;  %v452_v15 = vmul.f32 %v420_v12, %v420_v12  ;;  %v448_v16 = vmul.f32 %v416_v13, %v416_v13  ;;  %v440_v17 = vmul.f32 %v408_v14, %v408_v14 }
  0x6c   : > { %v470_v11 = vsel %vm454_vm1, %v443_v7, 0.0  ;;  %v449_v24 = vmul.f32 %v417_v21, %v417_v21  ;;  %v444_v25 = vmul.f32 %v412_v22, %v412_v22  ;;  %v445_v32 = vmul.f32 %v413_v30, %v413_v30 }
  0x6d   : > { %v497_v18 = vsel %vm454_vm1, %v452_v15, 0.0  ;;  %v485_v19 = vsel %vm454_vm1, %v448_v16, 0.0  ;;  %v461_v20 = vsel %vm454_vm1, %v440_v17, 0.0  ;;  %v441_v33 = vmul.f32 %v409_v31, %v409_v31 }
  0x6e   : > { %v476_v34 = vsel %vm454_vm1, %v445_v32, 0.0 }
  0x72   : > { %995 = vadd.xlane.f32.xlu0 %v994_v26  ;;  %992 = vadd.xlane.f32.xlu1 %v991_v27  ;;  %v453_v26 = vmul.f32 %v421_v23, %v421_v23  ;;  %v488_v27 = vsel %vm454_vm1, %v449_v24, 0.0 }
  0x73   : > { %989 = vadd.xlane.f32.xlu2 %v988_v28  ;;  %v473_v28 = vsel %vm454_vm1, %v444_v25, 0.0 }
  0x74   : > { %v500_v29 = vsel %vm454_vm1, %v453_v26, 0.0 }
  0x7a   : > { %986 = vadd.xlane.f32.xlu0 %v985_v35  ;;  %983 = vadd.xlane.f32.xlu1 %v982_v36  ;;  %v464_v35 = vsel %vm454_vm1, %v441_v33, 0.0 }
  0x7b   : > { %980 = vadd.xlane.f32.xlu2 %v979_v37 }
  0x82   : > { %977 = vadd.xlane.f32.xlu0 %v976_v44  ;;  %974 = vadd.xlane.f32.xlu1 %v973_v45 }
  0x83   : > { %971 = vadd.xlane.f32.xlu2 %v970_v46 }
  0x8a   : > { %968 = vadd.xlane.f32.xlu0 %v967_v53  ;;  %480 = vadd.xlane.f32.xlu1 %v479_v54 }
  0x8b   : > { %492 = vadd.xlane.f32.xlu2 %v491_v55 }
  0x92   : > { %468 = vadd.xlane.f32.xlu1 %v467_v62  ;;  %456 = vadd.xlane.f32.xlu0 %v455_v63 }
  0x93   : > { %483 = vadd.xlane.f32.xlu2 %v482_v0 }
  0x9a   : > { %459 = vadd.xlane.f32.xlu1 %v458_v9  ;;  %495 = vadd.xlane.f32.xlu0 %v494_v10 }
  0x9b   : > { %471 = vadd.xlane.f32.xlu2 %v470_v11 }
  0xa2   : > { %498 = vadd.xlane.f32.xlu1 %v497_v18  ;;  %486 = vadd.xlane.f32.xlu0 %v485_v19 }
  0xa3   : > { %462 = vadd.xlane.f32.xlu2 %v461_v20 }
  0xaa   : > { %489 = vadd.xlane.f32.xlu1 %v488_v27  ;;  %474 = vadd.xlane.f32.xlu0 %v473_v28 }
  0xab   : > { %501 = vadd.xlane.f32.xlu2 %v500_v29 }
  0xb2   : > { %477 = vadd.xlane.f32.xlu1 %v476_v34  ;;  %465 = vadd.xlane.f32.xlu0 %v464_v35 }
  0xd5   : > { %v1014_v36 = vpop.xlane.xlu0 %1013  ;;  %v3953_v37 = vpop.xlane.xlu1 %1007 }
  0xd6   : > { %3262 = vrsqrt.f32 %v1014_v36  ;;  %v3955_v38 = vpop.xlane.xlu2 %1001  ;;  %vm1202_vm2 = vcmp.eq.f32.partialorder %v1014_v36, inf  ;;  %v1205_v15 = vand.u32 2147483648, %v1014_v36  ;;  %vm1204_vm3 = vcmp.eq.f32.partialorder %v1014_v36, 0.0 }
  0xd7   : > { %3264 = vrsqrt.f32 %v3953_v37  ;;  %vm1178_vm4 = vcmp.eq.f32.partialorder %v3953_v37, inf  ;;  %vm1180_vm5 = vcmp.eq.f32.partialorder %v3953_v37, 0.0  ;;  %v1181_v29 = vand.u32 2147483648, %v3953_v37 }
  0xd8   : > { %3266 = vrsqrt.f32 %v3955_v38  ;;  %vm1154_vm6 = vcmp.eq.f32.partialorder %v3955_v38, inf  ;;  %vm1156_vm8 = vcmp.eq.f32.partialorder %v3955_v38, 0.0 }
  0xdc   : > { %v3263_v39 = vpop.eup %3262 }
  0xdd   : > { %v3265_v40 = vpop.eup %3264  ;;  %v1196_v41 = vmul.f32 %v3263_v39, %v1014_v36  ;;  %v3959_v42 = vpop.xlane.xlu0 %1010 }
  0xde   : > { %v3961_v43 = vpop.xlane.xlu1 %1004  ;;  %v3267_v44 = vpop.eup %3266  ;;  %v1172_v45 = vmul.f32 %v3265_v40, %v3953_v37  ;;  %3268 = vrsqrt.f32 %v3959_v42  ;;  %vm1190_vm7 = vcmp.eq.f32.partialorder %v3959_v42, inf  ;;  %vm1192_vm9 = vcmp.eq.f32.partialorder %v3959_v42, 0.0 }
  0xdf   : > { %v3965_v46 = vpop.xlane.xlu2 %998  ;;  %v1197_v47 = vmul.f32 %v3263_v39, %v1196_v41  ;;  %v1148_v48 = vmul.f32 %v3267_v44, %v3955_v38  ;;  %3270 = vrsqrt.f32 %v3961_v43  ;;  %vm1166_vm10 = vcmp.eq.f32.partialorder %v3961_v43, inf }
  0xe0   : > { %v1173_v49 = vmul.f32 %v3265_v40, %v1172_v45  ;;  %3272 = vrsqrt.f32 %v3965_v46  ;;  %vm1168_vm11 = vcmp.eq.f32.partialorder %v3961_v43, 0.0  ;;  %vm1142_vm12 = vcmp.eq.f32.partialorder %v3965_v46, inf }
  0xe1   : > { %v1198_v50 = vmul.f32 0.5, %v1197_v47  ;;  %v1149_v51 = vmul.f32 %v3267_v44, %v1148_v48  ;;  %v1157_v47 = vand.u32 2147483648, %v3955_v38  ;;  %v1193_v48 = vand.u32 2147483648, %v3959_v42 }
  0xe2   : > { %v1174_v52 = vmul.f32 0.5, %v1173_v49  ;;  %vm1144_vm13 = vcmp.eq.f32.partialorder %v3965_v46, 0.0 }
  0xe3   : > { %v1199_v53 = vsub.f32 1.5, %v1198_v50  ;;  %v1150_v54 = vmul.f32 0.5, %v1149_v51 }
  0xe4   : > { %v3269_v55 = vpop.eup %3268  ;;  %v1175_v56 = vsub.f32 1.5, %v1174_v52 }
  0xe5   : > { %v3271_v57 = vpop.eup %3270  ;;  %v1200_v58 = vmul.f32 %v3263_v39, %v1199_v53  ;;  %v1151_v59 = vsub.f32 1.5, %v1150_v54  ;;  %v1184_v60 = vmul.f32 %v3269_v55, %v3959_v42  ;;  %v3971_v61 = vpop.xlane.xlu0 %995 }
  0xe6   : > { %v1176_v62 = vmul.f32 %v3265_v40, %v1175_v56  ;;  %v1160_v63 = vmul.f32 %v3271_v57, %v3961_v43  ;;  %3274 = vrsqrt.f32 %v3971_v61  ;;  %v3975_v0 = vpop.xlane.xlu1 %992  ;;  %v3273_v3 = vpop.eup %3272  ;;  %vm1130_vm14 = vcmp.eq.f32.partialorder %v3971_v61, inf }
  0xe7   : > { %v3977_v1 = vpop.xlane.xlu2 %989  ;;  %v1201_v4 = vmul.f32 %v1200_v58, %v1014_v36  ;;  %v1185_v5 = vmul.f32 %v3269_v55, %v1184_v60  ;;  %v1136_v7 = vmul.f32 %v3273_v3, %v3965_v46  ;;  %v1152_v9 = vmul.f32 %v3267_v44, %v1151_v59 }
  0xe8   : > { %v1161_v6 = vmul.f32 %v3271_v57, %v1160_v63  ;;  %3276 = vrsqrt.f32 %v3975_v0  ;;  %v1177_v12 = vmul.f32 %v1176_v62, %v3953_v37  ;;  %vm1132_vm15 = vcmp.eq.f32.partialorder %v3971_v61, 0.0 }
  0xe9   : > { %v1186_v10 = vmul.f32 0.5, %v1185_v5  ;;  %v1203_v11 = vsel %vm1202_vm2, %v1014_v36, %v1201_v4  ;;  %v1137_v14 = vmul.f32 %v3273_v3, %v1136_v7  ;;  %v1153_v25 = vmul.f32 %v1152_v9, %v3955_v38 }
  0xea   : > { %v1162_v13 = vmul.f32 0.5, %v1161_v6  ;;  %v1206_v20 = vsel %vm1204_vm3, %v1205_v15, %v1203_v11  ;;  %v1179_v24 = vsel %vm1178_vm4, %v3953_v37, %v1177_v12  ;;  %3278 = vrsqrt.f32 %v3977_v1 }
  0xeb   : > { %v1187_v16 = vsub.f32 1.5, %v1186_v10  ;;  %v1138_v19 = vmul.f32 0.5, %v1137_v14  ;;  %v3993_v32 = vmax.f32 %v1206_v20, 1e-08  ;;  %v1182_v35 = vsel %vm1180_vm5, %v1181_v29, %v1179_v24 }
  0xec   : > { %v3275_v17 = vpop.eup %3274  ;;  %v1163_v18 = vsub.f32 1.5, %v1162_v13  ;;  %v1155_v40 = vsel %vm1154_vm6, %v3955_v38, %v1153_v25  ;;  %v4010_v50 = vmax.f32 %v1182_v35, 1e-08  ;;  %v1169_v38 = vand.u32 2147483648, %v3961_v43 }
  0xed   : > { %v1188_v21 = vmul.f32 %v3269_v55, %v1187_v16  ;;  %v1124_v22 = vmul.f32 %v3275_v17, %v3971_v61  ;;  %v3984_v23 = vpop.xlane.xlu0 %986  ;;  %v1139_v27 = vsub.f32 1.5, %v1138_v19  ;;  %v1158_v51 = vsel %vm1156_vm8, %v1157_v47, %v1155_v40 }
  0xee   : > { %v1164_v26 = vmul.f32 %v3271_v57, %v1163_v18  ;;  %v3988_v28 = vpop.eup %3276  ;;  %v4002_v37 = vpop.xlane.xlu1 %983  ;;  %3280 = vrcp.f32 %v3993_v32  ;;  %v1133_v7 = vand.u32 2147483648, %v3971_v61  ;;  %vm1118_vm0 = vcmp.eq.f32.partialorder %v3975_v0, inf }
  0xef   : > { %v1189_v30 = vmul.f32 %v1188_v21, %v3959_v42  ;;  %v1125_v31 = vmul.f32 %v3275_v17, %v1124_v22  ;;  %v1112_v33 = vmul.f32 %v3988_v28, %v3975_v0  ;;  %v3999_v34 = vpop.xlane.xlu2 %980  ;;  %v1140_v36 = vmul.f32 %v3273_v3, %v1139_v27 }
  0xf0   : > { %v1165_v44 = vmul.f32 %v1164_v26, %v3961_v43  ;;  %v3279_v58 = vpop.eup %3278  ;;  %3282 = vrsqrt.f32 %v3984_v23  ;;  %v1121_v16 = vand.u32 2147483648, %v3975_v0  ;;  %vm1106_vm2 = vcmp.eq.f32.partialorder %v3977_v1, inf }
  0xf1   : > { %v1126_v39 = vmul.f32 0.5, %v1125_v31  ;;  %v1191_v41 = vsel %vm1190_vm7, %v3959_v42, %v1189_v30  ;;  %v1113_v45 = vmul.f32 %v3988_v28, %v1112_v33  ;;  %v1141_v53 = vmul.f32 %v1140_v36, %v3965_v46 }
  0xf2   : > { %v1194_v52 = vsel %vm1192_vm9, %v1193_v48, %v1191_v41  ;;  %v1167_v56 = vsel %vm1166_vm10, %v3961_v43, %v1165_v44  ;;  %3284 = vrcp.f32 %v4010_v50  ;;  %v4026_v42 = vmax.f32 %v1158_v51, 1e-08 }
  0xf3   : > { %v1127_v49 = vsub.f32 1.5, %v1126_v39  ;;  %v1114_v54 = vmul.f32 0.5, %v1113_v45  ;;  %v4028_v59 = vmax.f32 %v1194_v52, 1e-08  ;;  %v1100_v60 = vmul.f32 %v3279_v58, %v3977_v1 }
  0xf4   : > { %v1170_v62 = vsel %vm1168_vm11, %v1169_v38, %v1167_v56  ;;  %v1143_v63 = vsel %vm1142_vm12, %v3965_v46, %v1141_v53  ;;  %3286 = vrsqrt.f32 %v4002_v37  ;;  %v1145_v43 = vand.u32 2147483648, %v3965_v46  ;;  %v4044_v10 = vpop.eup %3280 }
  0xf5   : > { %v4016_v55 = vpop.xlane.xlu0 %977  ;;  %v1128_v57 = vmul.f32 %v3275_v17, %v1127_v49  ;;  %v1115_v3 = vsub.f32 1.5, %v1114_v54  ;;  %v1101_v5 = vmul.f32 %v3279_v58, %v1100_v60  ;;  %3288 = vrsqrt.f32 %v3999_v34 }
  0xf6   : > { %3290 = vrsqrt.f32 %v4016_v55  ;;  %v4042_v9 = vpop.xlane.xlu1 %974  ;;  %v4047_v11 = vmax.f32 %v1170_v62, 1e-08  ;;  %v1146_v12 = vsel %vm1144_vm13, %v1145_v43, %v1143_v63  ;;  %v3283_v14 = vpop.eup %3282  ;;  %v1109_v24 = vand.u32 2147483648, %v3977_v1 }
  0xf7   : > { %v1129_v4 = vmul.f32 %v1128_v57, %v3971_v61  ;;  %v4036_v6 = vpop.xlane.xlu2 %971  ;;  %3292 = vrcp.f32 %v4026_v42  ;;  %v1102_v13 = vmul.f32 0.5, %v1101_v5  ;;  %v1116_v15 = vmul.f32 %v3988_v28, %v1115_v3 }
  0xf8   : > { %3294 = vrcp.f32 %v4028_v59  ;;  %v4055_v17 = vpop.eup %3284  ;;  %v1088_v46 = vmul.f32 %v3283_v14, %v3984_v23  ;;  %v4064_v22 = vmax.f32 %v1146_v12, 1e-08  ;;  %vm1120_vm3 = vcmp.eq.f32.partialorder %v3975_v0, 0.0 }
  0xf9   : > { %v1131_v18 = vsel %vm1130_vm14, %v3971_v61, %v1129_v4  ;;  %v1103_v19 = vsub.f32 1.5, %v1102_v13  ;;  %3296 = vrsqrt.f32 %v4042_v9  ;;  %v1097_v31 = vand.u32 2147483648, %v3984_v23 }
  0xfa   : > { %v3287_v21 = vpop.eup %3286  ;;  %3298 = vrsqrt.f32 %v4036_v6  ;;  %v1089_v27 = vmul.f32 %v3283_v14, %v1088_v46  ;;  %v1134_v30 = vsel %vm1132_vm15, %v1133_v7, %v1131_v18  ;;  %v1117_v36 = vmul.f32 %v1116_v15, %v3975_v0 }
  0xfb   : > { %v3289_v25 = vpop.eup %3288  ;;  %3300 = vrcp.f32 %v4047_v11  ;;  %v1104_v26 = vmul.f32 %v3279_v58, %v1103_v19  ;;  %v1076_v28 = vmul.f32 %v3287_v21, %v4002_v37  ;;  %vm1094_vm4 = vcmp.eq.f32.partialorder %v3984_v23, inf }
  0xfc   : > { %v3291_v29 = vpop.eup %3290  ;;  %v1064_v33 = vmul.f32 %v3289_v25, %v3999_v34  ;;  %v1090_v39 = vmul.f32 0.5, %v1089_v27  ;;  %vm1108_vm5 = vcmp.eq.f32.partialorder %v3977_v1, 0.0  ;;  %vm1082_vm6 = vcmp.eq.f32.partialorder %v4002_v37, inf }
  0xfd   : > { %v4062_v20 = vpop.xlane.xlu0 %968  ;;  %v4077_v35 = vpop.eup %3292  ;;  %v1077_v40 = vmul.f32 %v3287_v21, %v1076_v28  ;;  %v1052_v41 = vmul.f32 %v3291_v29, %v4016_v55  ;;  %v1085_v44 = vand.u32 2147483648, %v4002_v37  ;;  %vm1070_vm7 = vcmp.eq.f32.partialorder %v3999_v34, inf }
  0xfe   : > { %3302 = vrsqrt.f32 %v4062_v20  ;;  %v4082_v61 = vpop.eup %3294  ;;  %v1065_v45 = vmul.f32 %v3289_v25, %v1064_v33  ;;  %v1105_v48 = vmul.f32 %v1104_v26, %v3977_v1  ;;  %v1091_v49 = vsub.f32 1.5, %v1090_v39 }
  0xff   : > { %3304 = vrcp.f32 %v4064_v22  ;;  %v3297_v47 = vpop.eup %3296  ;;  %v1078_v51 = vmul.f32 0.5, %v1077_v40  ;;  %v1053_v52 = vmul.f32 %v3291_v29, %v1052_v41  ;;  %v4090_v53 = vpop.xlane.xlu2 %492  ;;  %v4092_v56 = vmax.f32 %v1134_v30, 1e-08 }
 0x100   : > { %v3299_v54 = vpop.eup %3298  ;;  %vm1096_vm8 = vcmp.eq.f32.partialorder %v3984_v23, 0.0  ;;  %v1066_v57 = vmul.f32 0.5, %v1065_v45  ;;  %v1073_v58 = vand.u32 2147483648, %v3999_v34  ;;  %v1040_v38 = vmul.f32 %v3297_v47, %v4042_v9 }
 0x101   : > { %v4097_v60 = vpop.eup %3300  ;;  %v1119_v62 = vsel %vm1118_vm0, %v3975_v0, %v1117_v36  ;;  %v1092_v63 = vmul.f32 %v3283_v14, %v1091_v49  ;;  %v1079_v3 = vsub.f32 1.5, %v1078_v51  ;;  %vm1084_vm9 = vcmp.eq.f32.partialorder %v4002_v37, 0.0 }
 0x102   : > { %vm1072_vm10 = vcmp.eq.f32.partialorder %v3999_v34, 0.0  ;;  %v1054_v43 = vmul.f32 0.5, %v1053_v52  ;;  %v1067_v5 = vsub.f32 1.5, %v1066_v57  ;;  %vm1058_vm11 = vcmp.eq.f32.partialorder %v4016_v55, inf  ;;  %v4149_v57 = vpop.xlane.xlu1 %480 }
 0x103   : > { %v1041_v7 = vmul.f32 %v3297_v47, %v1040_v38  ;;  %v1028_v12 = vmul.f32 %v3299_v54, %v4036_v6  ;;  %3306 = vrsqrt.f32 %v4090_v53  ;;  %v1107_v13 = vsel %vm1106_vm2, %v3977_v1, %v1105_v48 }
 0x104   : > { %v4104_v4 = vpop.eup %3302  ;;  %v1093_v14 = vmul.f32 %v1092_v63, %v3984_v23  ;;  %v1080_v15 = vmul.f32 %v3287_v21, %v1079_v3  ;;  %v1055_v18 = vsub.f32 1.5, %v1054_v43  ;;  %v1068_v46 = vmul.f32 %v3289_v25, %v1067_v5 }
 0x105   : > { %v4113_v19 = vpop.eup %3304  ;;  %v1042_v26 = vmul.f32 0.5, %v1041_v7  ;;  %v1029_v27 = vmul.f32 %v3299_v54, %v1028_v12  ;;  %v1016_v28 = vmul.f32 %v4104_v4, %v4062_v20  ;;  %3308 = vrcp.f32 %v4092_v56 }
 0x106   : > { %v1122_v30 = vsel %vm1120_vm3, %v1121_v16, %v1119_v62  ;;  %v1081_v33 = vmul.f32 %v1080_v15, %v4002_v37  ;;  %v1056_v36 = vmul.f32 %v3291_v29, %v1055_v18  ;;  %vm1060_vm12 = vcmp.eq.f32.partialorder %v4016_v55, 0.0 }
 0x107   : > { %v1095_v21 = vsel %vm1094_vm4, %v3984_v23, %v1093_v14  ;;  %v1069_v25 = vmul.f32 %v1068_v46, %v3999_v34  ;;  %v1043_v39 = vsub.f32 1.5, %v1042_v26  ;;  %v1030_v40 = vmul.f32 0.5, %v1029_v27  ;;  %v4189_v26 = vpop.xlane.xlu2 %483 }
 0x108   : > { %v1110_v41 = vsel %vm1108_vm5, %v1109_v24, %v1107_v13  ;;  %v1083_v0 = vsel %vm1082_vm6, %v4002_v37, %v1081_v33  ;;  %v1057_v16 = vmul.f32 %v1056_v36, %v4016_v55  ;;  %v1017_v29 = vmul.f32 %v4104_v4, %v1016_v28 }
 0x109   : > { %v3307_v45 = vpop.eup %3306  ;;  %v4137_v48 = vmax.f32 %v1122_v30, 1e-08  ;;  %v1071_v49 = vsel %vm1070_vm7, %v3999_v34, %v1069_v25  ;;  %v1044_v51 = vmul.f32 %v3297_v47, %v1043_v39  ;;  %v1031_v52 = vsub.f32 1.5, %v1030_v40 }
 0x10a   : > { %v1098_v1 = vsel %vm1096_vm8, %v1097_v31, %v1095_v21  ;;  %v1061_v24 = vand.u32 2147483648, %v4016_v55  ;;  %vm1046_vm13 = vcmp.eq.f32.partialorder %v4042_v9, inf  ;;  %vm1048_vm14 = vcmp.eq.f32.partialorder %v4042_v9, 0.0  ;;  %v4204_v40 = vpop.xlane.xlu1 %468 }
 0x10b   : > { %v4151_v38 = vmax.f32 %v1110_v41, 1e-08  ;;  %v1086_v62 = vsel %vm1084_vm9, %v1085_v44, %v1083_v0  ;;  %v1074_v47 = vsel %vm1072_vm10, %v1073_v58, %v1071_v49  ;;  %v1049_v63 = vand.u32 2147483648, %v4042_v9  ;;  %v4158_v23 = vpop.eup %3308 }
 0x10c   : > { %v1059_v31 = vsel %vm1058_vm11, %v4016_v55, %v1057_v16  ;;  %v1045_v3 = vmul.f32 %v1044_v51, %v4042_v9  ;;  %v1018_v43 = vmul.f32 0.5, %v1017_v29  ;;  %v648_v5 = vmul.f32 %v3307_v45, %v4090_v53 }
 0x10d   : > { %3310 = vrcp.f32 %v4137_v48  ;;  %v4166_v37 = vmax.f32 %v1098_v1, 1e-08  ;;  %v1032_v44 = vmul.f32 %v3299_v54, %v1031_v52  ;;  %vm1034_vm15 = vcmp.eq.f32.partialorder %v4036_v6, inf  ;;  %v4222_v52 = vpop.xlane.xlu0 %456 }
 0x10e   : > { %v4169_v34 = vmax.f32 %v1086_v62, 1e-08  ;;  %v1037_v58 = vand.u32 2147483648, %v4036_v6  ;;  %v1019_v7 = vsub.f32 1.5, %v1018_v43  ;;  %v649_v12 = vmul.f32 %v3307_v45, %v648_v5 }
 0x10f   : > { %v4172_v13 = vmax.f32 %v1074_v47, 1e-08  ;;  %v1062_v14 = vsel %vm1060_vm12, %v1061_v24, %v1059_v31  ;;  %vm1036_vm0 = vcmp.eq.f32.partialorder %v4036_v6, 0.0  ;;  %vm1022_vm2 = vcmp.eq.f32.partialorder %v4062_v20, inf }
 0x110   : > { %3312 = vrsqrt.f32 %v4149_v57  ;;  %v1047_v54 = vsel %vm1046_vm13, %v4042_v9, %v1045_v3  ;;  %v1020_v15 = vmul.f32 %v4104_v4, %v1019_v7  ;;  %v650_v18 = vmul.f32 0.5, %v649_v12 }
 0x111   : > { %3314 = vrcp.f32 %v4151_v38  ;;  %v1033_v55 = vmul.f32 %v1032_v44, %v4036_v6  ;;  %vm1024_vm3 = vcmp.eq.f32.partialorder %v4062_v20, 0.0  ;;  %v1449_v46 = vmul.f32 %v4044_v10, %v3993_v32 }
 0x112   : > { %3316 = vrcp.f32 %v4166_v37  ;;  %v4192_v27 = vmax.f32 %v1062_v14, 1e-08  ;;  %v1021_v28 = vmul.f32 %v1020_v15, %v4062_v20  ;;  %v651_v30 = vsub.f32 1.5, %v650_v18 }
 0x113   : > { %3318 = vrcp.f32 %v4169_v34  ;;  %v4195_v4 = vpop.eup %3310  ;;  %v1050_v33 = vsel %vm1048_vm14, %v1049_v63, %v1047_v54  ;;  %v1025_v36 = vand.u32 2147483648, %v4062_v20  ;;  %v1450_v21 = vsub.f32 1.0, %v1449_v46 }
 0x114   : > { %3320 = vrcp.f32 %v4172_v13  ;;  %v652_v25 = vmul.f32 %v3307_v45, %v651_v30  ;;  %vm654_vm4 = vcmp.eq.f32.partialorder %v4090_v53, inf  ;;  %v1459_v39 = vand.u32 2147483648, %v3993_v32 }
 0x115   : > { %3322 = vrsqrt.f32 %v4189_v26  ;;  %v1035_v0 = vsel %vm1034_vm15, %v4036_v6, %v1033_v55  ;;  %v1451_v9 = vmul.f32 %v4044_v10, %v1450_v21  ;;  %vm1454_vm5 = vweird.f32 %v4044_v10 }
 0x116   : > { %v3313_v41 = vpop.eup %3312  ;;  %v1457_v16 = vand.u32 2147483647, %v3993_v32  ;;  %3324 = vrcp.f32 %v4192_v27  ;;  %v4215_v45 = vmax.f32 %v1050_v33, 1e-08  ;;  %v1023_v49 = vsel %vm1022_vm2, %v4062_v20, %v1021_v28 }
 0x117   : > { %v4212_v29 = vpop.eup %3314  ;;  %vm656_vm6 = vcmp.eq.f32.partialorder %v4090_v53, 0.0  ;;  %v600_v51 = vmul.f32 %v3313_v41, %v4149_v57  ;;  %v657_v24 = vand.u32 2147483648, %v4090_v53  ;;  %v1452_v62 = vadd.f32 %v4044_v10, %v1451_v9 }
 0x118   : > { %v4224_v1 = vpop.eup %3316  ;;  %vm1453_vm7 = vweird.f32 %v3993_v32  ;;  %3326 = vrsqrt.f32 %v4204_v40  ;;  %v1038_v63 = vsel %vm1036_vm0, %v1037_v58, %v1035_v0  ;;  %v653_v31 = vmul.f32 %v652_v25, %v4090_v53 }
 0x119   : > { %v4230_v47 = vpop.eup %3318  ;;  %v601_v3 = vmul.f32 %v3313_v41, %v600_v51  ;;  %vm1455_vm8 = vmor %vm1453_vm7, %vm1454_vm5  ;;  %v1460_v43 = vor.u32 1.1754944e-38, %v1459_v39  ;;  %v1026_v44 = vsel %vm1024_vm3, %v1025_v36, %v1023_v49  ;;  %vm1458_vm9 = vcmp.eq.f32.partialorder %v1457_v16, 8.507059e+37 }
 0x11a   : > { %v4237_v5 = vpop.eup %3320  ;;  %v1456_v32 = vsel %vm1455_vm8, %v4044_v10, %v1452_v62  ;;  %3328 = vrsqrt.f32 %v4222_v52  ;;  %vm606_vm10 = vcmp.eq.f32.partialorder %v4149_v57, inf  ;;  %v4245_v12 = vmax.f32 %v1038_v63, 1e-08 }
 0x11b   : > { %v3323_v7 = vpop.eup %3322  ;;  %3330 = vrcp.f32 %v4215_v45  ;;  %v602_v6 = vmul.f32 0.5, %v601_v3  ;;  %v1461_v58 = vsel %vm1458_vm9, %v1460_v43, %v1456_v32  ;;  %v609_v14 = vand.u32 2147483648, %v4149_v57 }
 0x11c   : > { %v1494_v54 = vmul.f32 %v1461_v58, %v3820_v2  ;;  %v612_v20 = vmul.f32 %v3323_v7, %v4189_v26  ;;  %v4250_v15 = vpop.eup %3324  ;;  %v4252_v10 = vmax.f32 %v1026_v44, 1e-08  ;;  %v655_v18 = vsel %vm654_vm4, %v4090_v53, %v653_v31 }
 0x11d   : > { %v603_v55 = vsub.f32 1.5, %v602_v6  ;;  %vm618_vm11 = vcmp.eq.f32.partialorder %v4189_v26, inf  ;;  %v1434_v46 = vmul.f32 %v4082_v61, %v4028_v59  ;;  %vm608_vm12 = vcmp.eq.f32.partialorder %v4149_v57, 0.0 }
 0x11e   : > { %v3327_v28 = vpop.eup %3326  ;;  %3137 = vmatpush.xpose.msk.msra.mxu0 %vm454_vm1, %v1494_v54  ;;  %3178 = vmatpush.xpose.msk.msra.mxu1 %vm454_vm1, %v1494_v54  ;;  %v613_v2 = vmul.f32 %v3323_v7, %v612_v20  ;;  %v621_v30 = vand.u32 2147483648, %v4189_v26  ;;  %v1442_v33 = vand.u32 2147483647, %v4028_v59  ;;  %v1444_v36 = vand.u32 2147483648, %v4028_v59 }
 0x11f   : > { %v604_v21 = vmul.f32 %v3313_v41, %v603_v55  ;;  %3179 = vmatpush.xpose.msk.msra.mxu2 %vm454_vm1, %v1494_v54  ;;  %3180 = vmatpush.xpose.msk.msra.mxu3 %vm454_vm1, %v1494_v54  ;;  %v552_v25 = vmul.f32 %v3327_v28, %v4204_v40  ;;  %v1435_v39 = vsub.f32 1.0, %v1434_v46  ;;  %v1419_v0 = vmul.f32 %v4055_v17, %v4010_v50 }
 0x120   : > { %v3329_v9 = vpop.eup %3328  ;;  %v658_v16 = vsel %vm656_vm6, %v657_v24, %v655_v18  ;;  %v614_v49 = vmul.f32 0.5, %v613_v2  ;;  %vm620_vm13 = vcmp.eq.f32.partialorder %v4189_v26, 0.0  ;;  %vm1438_vm14 = vweird.f32 %v4028_v59 }
 0x121   : > { %vm1439_vm15 = vweird.f32 %v4082_v61  ;;  %v4276_v41 = vpop.eup %3330  ;;  %v605_v51 = vmul.f32 %v604_v21, %v4149_v57  ;;  %v553_v62 = vmul.f32 %v3327_v28, %v552_v25  ;;  %v504_v63 = vmul.f32 %v3329_v9, %v4222_v52 }
 0x122   : > { %v1436_v31 = vmul.f32 %v4082_v61, %v1435_v39  ;;  %v615_v3 = vsub.f32 1.5, %v614_v49  ;;  %vm4281_vm0 = vcmp.eq.f32.partialorder %v1442_v33, 8.507059e+37  ;;  %v1445_v24 = vor.u32 1.1754944e-38, %v1444_v36  ;;  %vm1440_vm3 = vmor %vm1438_vm14, %vm1439_vm15  ;;  %v4298_v33 = vpop.xlane.xlu2 %471 }
 0x123   : > { %v1420_v43 = vsub.f32 1.0, %v1419_v0  ;;  %v554_v44 = vmul.f32 0.5, %v553_v62  ;;  %v505_v32 = vmul.f32 %v3329_v9, %v504_v63  ;;  %vm1423_vm2 = vweird.f32 %v4010_v50 }
 0x124   : > { %v1437_v6 = vadd.f32 %v4082_v61, %v1436_v31  ;;  %v607_v58 = vsel %vm606_vm10, %v4149_v57, %v605_v51  ;;  %v616_v54 = vmul.f32 %v3323_v7, %v615_v3  ;;  %vm1424_vm4 = vweird.f32 %v4055_v17  ;;  %v4333_v31 = vpop.xlane.xlu0 %495 }
 0x125   : > { %v1421_v20 = vmul.f32 %v4055_v17, %v1420_v43  ;;  %v555_v18 = vsub.f32 1.5, %v554_v44  ;;  %v506_v55 = vmul.f32 0.5, %v505_v32  ;;  %v1427_v2 = vand.u32 2147483647, %v4010_v50  ;;  %vm4310_vm5 = vmor %vm1423_vm2, %vm1424_vm4 }
 0x126   : > { %v1441_v46 = vsel %vm1440_vm3, %v4082_v61, %v1437_v6  ;;  %v617_v36 = vmul.f32 %v616_v54, %v4189_v26  ;;  %v1429_v21 = vand.u32 2147483648, %v4010_v50  ;;  %v610_v25 = vsel %vm608_vm12, %v609_v14, %v607_v58  ;;  %v4321_v14 = vpop.xlane.xlu1 %459 }
 0x127   : > { %v1446_v7 = vsel %vm4281_vm0, %v1445_v24, %v1441_v46  ;;  %v1422_v59 = vadd.f32 %v4055_v17, %v1421_v20  ;;  %v556_v39 = vmul.f32 %v3327_v28, %v555_v18  ;;  %v507_v0 = vsub.f32 1.5, %v506_v55 }
 0x128   : > { %v1493_v61 = vmul.f32 %v1446_v7, %v3833_v8  ;;  %v619_v51 = vsel %vm618_vm11, %v4189_v26, %v617_v36  ;;  %v1430_v57 = vor.u32 1.1754944e-38, %v1429_v21  ;;  %3332 = vrsqrt.f32 %v4298_v33 }
 0x129   : > { %v1426_v62 = vsel %vm4310_vm5, %v4055_v17, %v1422_v59  ;;  %v622_v8 = vsel %vm620_vm13, %v621_v30, %v619_v51  ;;  %v557_v50 = vmul.f32 %v556_v39, %v4204_v40  ;;  %v508_v28 = vmul.f32 %v3329_v9, %v507_v0  ;;  %v3390_v9 = vld [vmem:[%s6162_s1 + $0x68] sm:$0xff] }
 0x12a   : > { %3138 = vmatpush.xpose.msk.msra.mxu0 %vm454_vm1, %v1493_v61  ;;  %3181 = vmatpush.xpose.msk.msra.mxu1 %vm454_vm1, %v1493_v61  ;;  %vm1428_vm6 = vcmp.eq.f32.partialorder %v1427_v2, 8.507059e+37  ;;  %3334 = vrcp.f32 %v4245_v12  ;;  %v4329_v63 = vmax.f32 %v658_v16, 1e-08  ;;  %v4335_v26 = vmax.f32 %v610_v25, 1e-08  ;;  %v4379_v25 = vpop.xlane.xlu2 %462 }
 0x12b   : > { %3182 = vmatpush.xpose.msk.msra.mxu2 %vm454_vm1, %v1493_v61  ;;  %3183 = vmatpush.xpose.msk.msra.mxu3 %vm454_vm1, %v1493_v61  ;;  %v1431_v17 = vsel %vm1428_vm6, %v1430_v57, %v1426_v62  ;;  %v509_v30 = vmul.f32 %v508_v28, %v4222_v52  ;;  %3336 = vrsqrt.f32 %v4321_v14  ;;  %v4343_v16 = vmax.f32 %v622_v8, 1e-08 }
 0x12c   : > { %v1492_v3 = vmul.f32 %v3390_v9, %v1431_v17  ;;  %3338 = vrcp.f32 %v4252_v10  ;;  %vm558_vm7 = vcmp.eq.f32.partialorder %v4204_v40, inf  ;;  %vm510_vm8 = vcmp.eq.f32.partialorder %v4222_v52, inf }
 0x12d   : > { %v559_v53 = vsel %vm558_vm7, %v4204_v40, %v557_v50  ;;  %v511_v24 = vsel %vm510_vm8, %v4222_v52, %v509_v30  ;;  %3340 = vrsqrt.f32 %v4333_v31  ;;  %vm560_vm9 = vcmp.eq.f32.partialorder %v4204_v40, 0.0 }
 0x12e   : > { %3139 = vmatpush.xpose.msk.msra.mxu0 %vm454_vm1, %v1492_v3  ;;  %3184 = vmatpush.xpose.msk.msra.mxu1 %vm454_vm1, %v1492_v3  ;;  %v3333_v43 = vpop.eup %3332  ;;  %3342 = vrcp.f32 %v4329_v63  ;;  %v561_v44 = vand.u32 2147483648, %v4204_v40  ;;  %v513_v32 = vand.u32 2147483648, %v4222_v52  ;;  %vm512_vm10 = vcmp.eq.f32.partialorder %v4222_v52, 0.0 }
 0x12f   : > { %3185 = vmatpush.xpose.msk.msra.mxu2 %vm454_vm1, %v1492_v3  ;;  %3186 = vmatpush.xpose.msk.msra.mxu3 %vm454_vm1, %v1492_v3  ;;  %3344 = vrcp.f32 %v4335_v26  ;;  %v564_v6 = vmul.f32 %v3333_v43, %v4298_v33  ;;  %v1404_v58 = vmul.f32 %v4097_v60, %v4047_v11  ;;  %vm570_vm11 = vcmp.eq.f32.partialorder %v4298_v33, inf }
 0x130   : > { %v4363_v54 = vpop.eup %3334  ;;  %3346 = vrcp.f32 %v4343_v16  ;;  %v562_v40 = vsel %vm560_vm9, %v561_v44, %v559_v53  ;;  %v4366_v20 = vsel %vm512_vm10, %v513_v32, %v511_v24  ;;  %v573_v18 = vand.u32 2147483648, %v4298_v33 }
 0x131   : > { %v3337_v55 = vpop.eup %3336  ;;  %v565_v46 = vmul.f32 %v3333_v43, %v564_v6  ;;  %v1405_v2 = vsub.f32 1.0, %v1404_v58  ;;  %vm1408_vm12 = vweird.f32 %v4047_v11  ;;  %v1389_v52 = vmul.f32 %v4077_v35, %v4026_v42 }
 0x132   : > { %v4373_v36 = vpop.eup %3338  ;;  %v516_v7 = vmul.f32 %v3337_v55, %v4321_v14  ;;  %vm1409_vm13 = vweird.f32 %v4097_v60  ;;  %v1412_v59 = vand.u32 2147483647, %v4047_v11  ;;  %v1414_v21 = vand.u32 2147483648, %v4047_v11 }
 0x133   : > { %v3341_v39 = vpop.eup %3340  ;;  %v566_v0 = vmul.f32 0.5, %v565_v46  ;;  %v1406_v61 = vmul.f32 %v4097_v60, %v1405_v2  ;;  %v1390_v49 = vsub.f32 1.0, %v1389_v52  ;;  %vm1394_vm14 = vweird.f32 %v4077_v35  ;;  %vm1410_vm2 = vmor %vm1408_vm12, %vm1409_vm13  ;;  %v4404_v46 = vpop.xlane.xlu1 %498 }
 0x134   : > { %v4383_v51 = vpop.eup %3342  ;;  %vm572_vm15 = vcmp.eq.f32.partialorder %v4298_v33, 0.0  ;;  %v517_v62 = vmul.f32 %v3337_v55, %v516_v7  ;;  %v660_v57 = vmul.f32 %v3341_v39, %v4333_v31  ;;  %v1397_v8 = vand.u32 2147483647, %v4026_v42 }
 0x135   : > { %v1399_v50 = vand.u32 2147483648, %v4026_v42  ;;  %v4389_v28 = vpop.eup %3344  ;;  %v567_v17 = vsub.f32 1.5, %v566_v0  ;;  %vm522_vm0 = vcmp.eq.f32.partialorder %v4321_v14, inf  ;;  %v1407_v30 = vadd.f32 %v4097_v60, %v1406_v61 }
 0x136   : > { %v1391_v9 = vmul.f32 %v4077_v35, %v1390_v49  ;;  %3348 = vrsqrt.f32 %v4379_v25  ;;  %v4395_v3 = vpop.eup %3346  ;;  %v518_v53 = vmul.f32 0.5, %v517_v62  ;;  %v661_v24 = vmul.f32 %v3341_v39, %v660_v57  ;;  %v4414_v49 = vpop.xlane.xlu0 %486 }
 0x137   : > { %vm1413_vm3 = vcmp.eq.f32.partialorder %v1412_v59, 8.507059e+37  ;;  %v1415_v44 = vor.u32 1.1754944e-38, %v1414_v21  ;;  %v568_v32 = vmul.f32 %v3333_v43, %v567_v17  ;;  %v1411_v6 = vsel %vm1410_vm2, %v4097_v60, %v1407_v30  ;;  %v3391_v43 = vld [vmem:[%s6162_s1 + $0x60] sm:$0xff]  ;;  %v3392_v30 = vld [vmem:[%s6162_s1 + $0x58] sm:$0xff] }
 0x138   : > { %v1392_v58 = vadd.f32 %v4077_v35, %v1391_v9  ;;  %vm1393_vm4 = vweird.f32 %v4026_v42  ;;  %v519_v2 = vsub.f32 1.5, %v518_v53  ;;  %v662_v52 = vmul.f32 0.5, %v661_v24 }
 0x139   : > { %v1416_v7 = vsel %vm1413_vm3, %v1415_v44, %v1411_v6  ;;  %vm1395_vm5 = vmor %vm1393_vm4, %vm1394_vm14  ;;  %v1400_v0 = vor.u32 1.1754944e-38, %v1399_v50  ;;  %v569_v11 = vmul.f32 %v568_v32, %v4298_v33  ;;  %vm1398_vm6 = vcmp.eq.f32.partialorder %v1397_v8, 8.507059e+37 }
 0x13a   : > { %v1491_v60 = vmul.f32 %v3391_v43, %v1416_v7  ;;  %v1396_v59 = vsel %vm1395_vm5, %v4077_v35, %v1392_v58  ;;  %v520_v42 = vmul.f32 %v3337_v55, %v519_v2  ;;  %v663_v21 = vsub.f32 1.5, %v662_v52 }
 0x13b   : > { %v1401_v61 = vsel %vm1398_vm6, %v1400_v0, %v1396_v59  ;;  %3350 = vrsqrt.f32 %v4404_v46  ;;  %v4416_v57 = vmax.f32 %v562_v40, 1e-08  ;;  %v571_v50 = vsel %vm570_vm11, %v4298_v33, %v569_v11 }
 0x13c   : > { %v3349_v62 = vpop.eup %3348  ;;  %vm524_vm7 = vcmp.eq.f32.partialorder %v4321_v14, 0.0  ;;  %v525_v17 = vand.u32 2147483648, %v4321_v14  ;;  %3140 = vmatpush.xpose.msk.msra.mxu0 %vm454_vm1, %v1491_v60  ;;  %3187 = vmatpush.xpose.msk.msra.mxu1 %vm454_vm1, %v1491_v60  ;;  %v4426_v35 = vmax.f32 %v4366_v20, 1e-08  ;;  %v521_v55 = vmul.f32 %v520_v42, %v4321_v14 }
 0x13d   : > { %v664_v8 = vmul.f32 %v3341_v39, %v663_v21  ;;  %vm666_vm8 = vcmp.eq.f32.partialorder %v4333_v31, inf  ;;  %3188 = vmatpush.xpose.msk.msra.mxu2 %vm454_vm1, %v1491_v60  ;;  %3189 = vmatpush.xpose.msk.msra.mxu3 %vm454_vm1, %v1491_v60  ;;  %v574_v40 = vsel %vm572_vm15, %v573_v18, %v571_v50  ;;  %v1490_v20 = vmul.f32 %v3392_v30, %v1401_v61 }
 0x13e   : > { %v528_v9 = vmul.f32 %v3349_v62, %v4379_v25  ;;  %3352 = vrsqrt.f32 %v4414_v49  ;;  %v523_v39 = vsel %vm522_vm0, %v4321_v14, %v521_v55  ;;  %vm668_vm9 = vcmp.eq.f32.partialorder %v4333_v31, 0.0 }
 0x13f   : > { %v665_v53 = vmul.f32 %v664_v8, %v4333_v31  ;;  %v669_v33 = vand.u32 2147483648, %v4333_v31  ;;  %3354 = vrcp.f32 %v4416_v57  ;;  %v526_v18 = vsel %vm524_vm7, %v525_v17, %v523_v39 }
 0x140   : > { %3141 = vmatpush.xpose.msk.msra.mxu0 %vm454_vm1, %v1490_v20  ;;  %3190 = vmatpush.xpose.msk.msra.mxu1 %vm454_vm1, %v1490_v20  ;;  %v529_v24 = vmul.f32 %v3349_v62, %v528_v9  ;;  %v1374_v44 = vmul.f32 %v4113_v19, %v4064_v22  ;;  %3356 = vrcp.f32 %v4426_v35  ;;  %v4455_v6 = vmax.f32 %v574_v40, 1e-08 }
 0x141   : > { %v3351_v32 = vpop.eup %3350  ;;  %3191 = vmatpush.xpose.msk.msra.mxu2 %vm454_vm1, %v1490_v20  ;;  %3192 = vmatpush.xpose.msk.msra.mxu3 %vm454_vm1, %v1490_v20  ;;  %vm534_vm10 = vcmp.eq.f32.partialorder %v4379_v25, inf  ;;  %v537_v14 = vand.u32 2147483648, %v4379_v25  ;;  %v667_v58 = vsel %vm666_vm8, %v4333_v31, %v665_v53  ;;  %vm536_vm11 = vcmp.eq.f32.partialorder %v4379_v25, 0.0 }
 0x142   : > { %v530_v2 = vmul.f32 0.5, %v529_v24  ;;  %v672_v52 = vmul.f32 %v3351_v32, %v4404_v46  ;;  %v1375_v7 = vsub.f32 1.0, %v1374_v44  ;;  %v4466_v0 = vmax.f32 %v526_v18, 1e-08  ;;  %v4496_v44 = vpop.xlane.xlu2 %501 }
 0x143   : > { %vm1379_vm12 = vweird.f32 %v4113_v19  ;;  %v1382_v11 = vand.u32 2147483647, %v4064_v22  ;;  %v1384_v43 = vand.u32 2147483648, %v4064_v22  ;;  %v1359_v61 = vmul.f32 %v4158_v23, %v4092_v56 }
 0x144   : > { %v3353_v60 = vpop.eup %3352  ;;  %v531_v59 = vsub.f32 1.5, %v530_v2  ;;  %v673_v42 = vmul.f32 %v3351_v32, %v672_v52  ;;  %v1376_v21 = vmul.f32 %v4113_v19, %v1375_v7  ;;  %v670_v50 = vsel %vm668_vm9, %v669_v33, %v667_v58 }
 0x145   : > { %vm678_vm13 = vcmp.eq.f32.partialorder %v4404_v46, inf  ;;  %v624_v17 = vmul.f32 %v3353_v60, %v4414_v49  ;;  %vm1378_vm14 = vweird.f32 %v4064_v22  ;;  %vm4479_vm15 = vcmp.eq.f32.partialorder %v1382_v11, 8.507059e+37  ;;  %v4483_v8 = vpop.eup %3354 }
 0x146   : > { %v532_v40 = vmul.f32 %v3349_v62, %v531_v59  ;;  %v674_v30 = vmul.f32 0.5, %v673_v42  ;;  %vm680_vm0 = vcmp.eq.f32.partialorder %v4404_v46, 0.0  ;;  %v1377_v20 = vadd.f32 %v4113_v19, %v1376_v21  ;;  %v4487_v9 = vpop.eup %3356  ;;  %vm1380_vm2 = vmor %vm1378_vm14, %vm1379_vm12 }
 0x147   : > { %v1360_v31 = vsub.f32 1.0, %v1359_v61  ;;  %v625_v39 = vmul.f32 %v3353_v60, %v624_v17  ;;  %v1385_v22 = vor.u32 1.1754944e-38, %v1384_v43  ;;  %vm1364_vm3 = vweird.f32 %v4158_v23 }
 0x148   : > { %v1367_v53 = vand.u32 2147483647, %v4092_v56  ;;  %v533_v33 = vmul.f32 %v532_v40, %v4379_v25  ;;  %v675_v62 = vsub.f32 1.5, %v674_v30  ;;  %v1381_v18 = vsel %vm1380_vm2, %v4113_v19, %v1377_v20  ;;  %v3393_v19 = vld [vmem:[%s6162_s1 + $0x50] sm:$0xff]  ;;  %v4532_v20 = vpop.xlane.xlu0 %474 }
 0x149   : > { %v1361_v24 = vmul.f32 %v4158_v23, %v1360_v31  ;;  %v626_v58 = vmul.f32 0.5, %v625_v39  ;;  %v1386_v2 = vsel %vm4479_vm15, %v1385_v22, %v1381_v18  ;;  %vm1363_vm4 = vweird.f32 %v4092_v56 }
 0x14a   : > { %v1369_v52 = vand.u32 2147483648, %v4092_v56  ;;  %v535_v7 = vsel %vm534_vm10, %v4379_v25, %v533_v33  ;;  %v676_v11 = vmul.f32 %v3351_v32, %v675_v62  ;;  %v1489_v43 = vmul.f32 %v3393_v19, %v1386_v2  ;;  %vm4513_vm5 = vmor %vm1363_vm4, %vm1364_vm3  ;;  %v1658_v56 = vld [vmem:[%s6163_s2 + $0x10] sm:$0xff] }
 0x14b   : > { %v1362_v59 = vadd.f32 %v4158_v23, %v1361_v24  ;;  %v538_v42 = vsel %vm536_vm11, %v537_v14, %v535_v7  ;;  %v627_v21 = vsub.f32 1.5, %v626_v58  ;;  %3358 = vrsqrt.f32 %v4496_v44  ;;  %v4525_v14 = vpop.xlane.xlu1 %489 }
 0x14c   : > { %v1370_v61 = vor.u32 1.1754944e-38, %v1369_v52  ;;  %v677_v32 = vmul.f32 %v676_v11, %v4404_v46  ;;  %v681_v17 = vand.u32 2147483648, %v4404_v46  ;;  %3142 = vmatpush.xpose.msk.msra.mxu0 %vm454_vm1, %v1489_v43  ;;  %3193 = vmatpush.xpose.msk.msra.mxu1 %vm454_vm1, %v1489_v43  ;;  %vm1368_vm6 = vcmp.eq.f32.partialorder %v1367_v53, 8.507059e+37 }
 0x14d   : > { %v1366_v25 = vsel %vm4513_vm5, %v4158_v23, %v1362_v59  ;;  %3360 = vrcp.f32 %v4455_v6  ;;  %v4528_v55 = vmax.f32 %v670_v50, 1e-08  ;;  %v628_v40 = vmul.f32 %v3353_v60, %v627_v21  ;;  %3194 = vmatpush.xpose.msk.msra.mxu2 %vm454_vm1, %v1489_v43  ;;  %3195 = vmatpush.xpose.msk.msra.mxu3 %vm454_vm1, %v1489_v43  ;;  %v3394_v50 = vld [vmem:[%s6162_s1 + $0x48] sm:$0xff]  ;;  %v1656_v43 = vld [vmem:[%s6163_s2] sm:$0xff] }
 0x14e   : > { %v1371_v30 = vsel %vm1368_vm6, %v1370_v61, %v1366_v25  ;;  %3362 = vrcp.f32 %v4466_v0  ;;  %v4535_v31 = vmax.f32 %v538_v42, 1e-08  ;;  %v679_v23 = vsel %vm678_vm13, %v4404_v46, %v677_v32 }
 0x14f   : > { %v1488_v60 = vmul.f32 %v3394_v50, %v1371_v30  ;;  %v682_v39 = vsel %vm680_vm0, %v681_v17, %v679_v23  ;;  %v629_v22 = vmul.f32 %v628_v40, %v4414_v49  ;;  %3364 = vrsqrt.f32 %v4525_v14 }
 0x150   : > { %vm630_vm7 = vcmp.eq.f32.partialorder %v4414_v49, inf  ;;  %vm632_vm8 = vcmp.eq.f32.partialorder %v4414_v49, 0.0  ;;  %3366 = vrsqrt.f32 %v4532_v20  ;;  %v633_v33 = vand.u32 2147483648, %v4414_v49 }
 0x151   : > { %3143 = vmatpush.xpose.msk.msra.mxu0 %vm454_vm1, %v1488_v60  ;;  %3196 = vmatpush.xpose.msk.msra.mxu1 %vm454_vm1, %v1488_v60  ;;  %v3359_v53 = vpop.eup %3358  ;;  %3368 = vrcp.f32 %v4528_v55  ;;  %v631_v46 = vsel %vm630_vm7, %v4414_v49, %v629_v22  ;;  %v1344_v62 = vmul.f32 %v4195_v4, %v4137_v48  ;;  %v4560_v18 = vmax.f32 %v682_v39, 1e-08 }
 0x152   : > { %3197 = vmatpush.xpose.msk.msra.mxu2 %vm454_vm1, %v1488_v60  ;;  %3198 = vmatpush.xpose.msk.msra.mxu3 %vm454_vm1, %v1488_v60  ;;  %3370 = vrcp.f32 %v4535_v31  ;;  %v684_v24 = vmul.f32 %v3359_v53, %v4496_v44  ;;  %v693_v58 = vand.u32 2147483648, %v4496_v44  ;;  %v634_v52 = vsel %vm632_vm8, %v633_v33, %v631_v46 }
 0x153   : > { %v4564_v2 = vpop.eup %3360  ;;  %vm690_vm9 = vcmp.eq.f32.partialorder %v4496_v44, inf  ;;  %v645_v7 = vand.u32 2147483648, %v4525_v14  ;;  %v1345_v11 = vsub.f32 1.0, %v1344_v62  ;;  %v1352_v19 = vand.u32 2147483647, %v4137_v48  ;;  %v4591_v39 = vpop.xlane.xlu1 %477 }
 0x154   : > { %v4574_v59 = vpop.eup %3362  ;;  %v685_v42 = vmul.f32 %v3359_v53, %v684_v24  ;;  %v1354_v21 = vand.u32 2147483648, %v4137_v48  ;;  %v1329_v49 = vmul.f32 %v4212_v29, %v4151_v38  ;;  %vm1348_vm10 = vweird.f32 %v4137_v48 }
 0x155   : > { %v3365_v61 = vpop.eup %3364  ;;  %v1346_v32 = vmul.f32 %v4195_v4, %v1345_v11  ;;  %vm1349_vm11 = vweird.f32 %v4195_v4  ;;  %vm4585_vm12 = vcmp.eq.f32.partialorder %v1352_v19, 8.507059e+37  ;;  %v3520_v25 = vmov 0  }
 0x156   : > { %3258 = vset.pattern.permute.xlu2 %v3520_v25  ;;  %3260 = vset.pattern.permute.xlu1 %v3520_v25  ;;  %v3367_v40 = vpop.eup %3366  ;;  %v686_v30 = vmul.f32 0.5, %v685_v42  ;;  %vm692_vm13 = vcmp.eq.f32.partialorder %v4496_v44, 0.0  ;;  %v636_v23 = vmul.f32 %v3365_v61, %v4525_v14  ;;  %v1355_v50 = vor.u32 1.1754944e-38, %v1354_v21  ;;  %vm1350_vm15 = vmor %vm1348_vm10, %vm1349_vm11 }
 0x157   : > { %1674 = vperm.xlu2 %3258, %v1656_v43   ;;  %v1330_v60 = vsub.f32 1.0, %v1329_v49  ;;  %1680 = vperm.xlu1 %3260, %v1658_v56   ;;  %v4593_v22 = vpop.eup %3368  ;;  %v576_v46 = vmul.f32 %v3367_v40, %v4532_v20  ;;  %v1347_v33 = vadd.f32 %v4195_v4, %v1346_v32  ;;  %vm1334_vm14 = vweird.f32 %v4212_v29 }
 0x158   : > { %v1337_v62 = vand.u32 2147483647, %v4151_v38  ;;  %3259 = vset.pattern.permute.xlu0 %v3520_v25  ;;  %v4599_v24 = vpop.eup %3370  ;;  %v687_v11 = vsub.f32 1.5, %v686_v30  ;;  %v637_v19 = vmul.f32 %v3365_v61, %v636_v23  ;;  %v1339_v42 = vand.u32 2147483648, %v4151_v38  ;;  %v4616_v30 = vpop.xlane.xlu0 %465 }
 0x159   : > { %v1331_v43 = vmul.f32 %v4212_v29, %v1330_v60  ;;  %vm642_vm0 = vcmp.eq.f32.partialorder %v4525_v14, inf  ;;  %v577_v21 = vmul.f32 %v3367_v40, %v576_v46  ;;  %v1351_v49 = vsel %vm1350_vm15, %v4195_v4, %v1347_v33  ;;  %v1661_v33 = vld [vmem:[%s6163_s2 + $0x28] sm:$0xff] }
 0x15a   : > { %vm1333_vm2 = vweird.f32 %v4151_v38  ;;  %3372 = vrsqrt.f32 %v4591_v39  ;;  %v688_v56 = vmul.f32 %v3359_v53, %v687_v11  ;;  %v638_v32 = vmul.f32 0.5, %v637_v19  ;;  %v3395_v38 = vld [vmem:[%s6162_s1 + $0x40] sm:$0xff] }
 0x15b   : > { %vm644_vm3 = vcmp.eq.f32.partialorder %v4525_v14, 0.0  ;;  %vm582_vm4 = vcmp.eq.f32.partialorder %v4532_v20, inf  ;;  %v1356_v48 = vsel %vm4585_vm12, %v1355_v50, %v1351_v49  ;;  %v1332_v25 = vadd.f32 %v4212_v29, %v1331_v43  ;;  %vm1335_vm5 = vmor %vm1333_vm2, %vm1334_vm14 }
 0x15c   : > { %v4618_v23 = vmax.f32 %v634_v52, 1e-08  ;;  %v578_v4 = vmul.f32 0.5, %v577_v21  ;;  %v1487_v53 = vmul.f32 %v3395_v38, %v1356_v48  ;;  %v1340_v60 = vor.u32 1.1754944e-38, %v1339_v42  ;;  %v1659_v52 = vld [vmem:[%s6163_s2 + $0x18] sm:$0xff] }
 0x15d   : > { %v689_v46 = vmul.f32 %v688_v56, %v4496_v44  ;;  %v639_v17 = vsub.f32 1.5, %v638_v32  ;;  %v1336_v50 = vsel %vm1335_vm5, %v4212_v29, %v1332_v25  ;;  %vm1338_vm6 = vcmp.eq.f32.partialorder %v1337_v62, 8.507059e+37  ;;  %v3396_v56 = vld [vmem:[%s6162_s1 + $0x38] sm:$0xff] }
 0x15e   : > { %v579_v11 = vsub.f32 1.5, %v578_v4  ;;  %vm584_vm7 = vcmp.eq.f32.partialorder %v4532_v20, 0.0  ;;  %3144 = vmatpush.xpose.msk.msra.mxu0 %vm454_vm1, %v1487_v53  ;;  %3199 = vmatpush.xpose.msk.msra.mxu1 %vm454_vm1, %v1487_v53  ;;  %v1341_v19 = vsel %vm1338_vm6, %v1340_v60, %v1336_v50  ;;  %3374 = vrsqrt.f32 %v4616_v30 }
 0x15f   : > { %3376 = vrcp.f32 %v4560_v18  ;;  %v691_v29 = vsel %vm690_vm9, %v4496_v44, %v689_v46  ;;  %v640_v62 = vmul.f32 %v3365_v61, %v639_v17  ;;  %v585_v43 = vand.u32 2147483648, %v4532_v20  ;;  %3200 = vmatpush.xpose.msk.msra.mxu2 %vm454_vm1, %v1487_v53  ;;  %3201 = vmatpush.xpose.msk.msra.mxu3 %vm454_vm1, %v1487_v53  ;;  %v1657_v44 = vld [vmem:[%s6163_s2 + $0x8] sm:$0xff] }
 0x160   : > { %v3373_v42 = vpop.eup %3372  ;;  %3378 = vrcp.f32 %v4618_v23  ;;  %v694_v21 = vsel %vm692_vm13, %v693_v58, %v691_v29  ;;  %v580_v49 = vmul.f32 %v3367_v40, %v579_v11  ;;  %v1486_v61 = vmul.f32 %v3396_v56, %v1341_v19  ;;  %1683 = vperm.xlu2 %3258, %v1659_v52   ;;  %1689 = vperm.xlu1 %3260, %v1661_v33  }
 0x161   : > { %v641_v32 = vmul.f32 %v640_v62, %v4525_v14  ;;  %v588_v48 = vmul.f32 %v3373_v42, %v4591_v39  ;;  %v597_v25 = vand.u32 2147483648, %v4591_v39  ;;  %v1314_v4 = vmul.f32 %v4224_v1, %v4166_v37  ;;  %1677 = vperm.xlu0 %3259, %v1657_v44  }
 0x162   : > { %v4660_v58 = vmax.f32 %v694_v21, 1e-08  ;;  %v581_v40 = vmul.f32 %v580_v49, %v4532_v20  ;;  %3145 = vmatpush.xpose.msk.msra.mxu0 %vm454_vm1, %v1486_v61  ;;  %3202 = vmatpush.xpose.msk.msra.mxu1 %vm454_vm1, %v1486_v61  ;;  %v549_v38 = vand.u32 2147483648, %v4616_v30  ;;  %v1322_v53 = vand.u32 2147483647, %v4166_v37  ;;  %v1660_v21 = vld [vmem:[%s6163_s2 + $0x20] sm:$0xff] }
 0x163   : > { %v643_v60 = vsel %vm642_vm0, %v4525_v14, %v641_v32  ;;  %3203 = vmatpush.xpose.msk.msra.mxu2 %vm454_vm1, %v1486_v61  ;;  %3204 = vmatpush.xpose.msk.msra.mxu3 %vm454_vm1, %v1486_v61  ;;  %v589_v46 = vmul.f32 %v3373_v42, %v588_v48  ;;  %v1315_v17 = vsub.f32 1.0, %v1314_v4  ;;  %vm1318_vm8 = vweird.f32 %v4166_v37  ;;  %v1663_v49 = vld [vmem:[%s6163_s2 + $0x38] sm:$0xff] }
 0x164   : > { %v3375_v50 = vpop.eup %3374  ;;  %v646_v52 = vsel %vm644_vm3, %v645_v7, %v643_v60  ;;  %v583_v33 = vsel %vm582_vm4, %v4532_v20, %v581_v40  ;;  %vm594_vm9 = vcmp.eq.f32.partialorder %v4591_v39, inf  ;;  %vm1319_vm10 = vweird.f32 %v4224_v1 }
 0x165   : > { %v1324_v11 = vand.u32 2147483648, %v4166_v37  ;;  %v4683_v19 = vpop.eup %3376  ;;  %v4685_v29 = vmax.f32 %v646_v52, 1e-08  ;;  %v586_v62 = vsel %vm584_vm7, %v585_v43, %v583_v33  ;;  %v590_v14 = vmul.f32 0.5, %v589_v46  ;;  %vm1320_vm0 = vmor %vm1318_vm8, %vm1319_vm10 }
 0x166   : > { %vm596_vm11 = vcmp.eq.f32.partialorder %v4591_v39, 0.0  ;;  %v540_v7 = vmul.f32 %v3375_v50, %v4616_v30  ;;  %v4697_v56 = vpop.eup %3378  ;;  %3380 = vrcp.f32 %v4660_v58  ;;  %v1316_v20 = vmul.f32 %v4224_v1, %v1315_v17 }
 0x167   : > { %vm4701_vm12 = vcmp.eq.f32.partialorder %v1322_v53, 8.507059e+37  ;;  %v1299_v61 = vmul.f32 %v4230_v47, %v4169_v34  ;;  %v4707_v32 = vmax.f32 %v586_v62, 1e-08  ;;  %v591_v48 = vsub.f32 1.5, %v590_v14 }
 0x168   : > { %v541_v4 = vmul.f32 %v3375_v50, %v540_v7  ;;  %v1325_v44 = vor.u32 1.1754944e-38, %v1324_v11  ;;  %3382 = vrcp.f32 %v4685_v29  ;;  %vm546_vm13 = vcmp.eq.f32.partialorder %v4616_v30, inf  ;;  %1686 = vperm.xlu2 %3258, %v1660_v21   ;;  %1695 = vperm.xlu1 %3260, %v1663_v49  }
 0x169   : > { %v1317_v40 = vadd.f32 %v4224_v1, %v1316_v20  ;;  %v1300_v60 = vsub.f32 1.0, %v1299_v61  ;;  %vm1303_vm14 = vweird.f32 %v4169_v34  ;;  %v592_v53 = vmul.f32 %v3373_v42, %v591_v48 }
 0x16a   : > { %v542_v46 = vmul.f32 0.5, %v541_v4  ;;  %vm548_vm15 = vcmp.eq.f32.partialorder %v4616_v30, 0.0  ;;  %v1307_v17 = vand.u32 2147483647, %v4169_v34  ;;  %v1309_v52 = vand.u32 2147483648, %v4169_v34 }
 0x16b   : > { %v1321_v33 = vsel %vm1320_vm0, %v4224_v1, %v1317_v40  ;;  %v1301_v11 = vmul.f32 %v4230_v47, %v1300_v60  ;;  %vm1304_vm2 = vweird.f32 %v4230_v47  ;;  %v1284_v42 = vmul.f32 %v4237_v5, %v4172_v13  ;;  %v3397_v1 = vld [vmem:[%s6162_s1 + $0x30] sm:$0xff] }
 0x16c   : > { %v593_v62 = vmul.f32 %v592_v53, %v4591_v39  ;;  %v543_v14 = vsub.f32 1.5, %v542_v46  ;;  %v1326_v37 = vsel %vm4701_vm12, %v1325_v44, %v1321_v33  ;;  %vm4728_vm3 = vcmp.eq.f32.partialorder %v1307_v17, 8.507059e+37  ;;  %v4732_v21 = vpop.eup %3380  ;;  %vm4743_vm4 = vmor %vm1303_vm14, %vm1304_vm2  ;;  %v1662_v60 = vld [vmem:[%s6163_s2 + $0x30] sm:$0xff] }
 0x16d   : > { %v1485_v49 = vmul.f32 %v3397_v1, %v1326_v37  ;;  %v1302_v20 = vadd.f32 %v4230_v47, %v1301_v11  ;;  %v1310_v61 = vor.u32 1.1754944e-38, %v1309_v52  ;;  %v1285_v48 = vsub.f32 1.0, %v1284_v42  ;;  %v1666_v37 = vld [vmem:[%s6163_s2 + $0x50] sm:$0xff] }
 0x16e   : > { %v595_v43 = vsel %vm594_vm9, %v4591_v39, %v593_v62  ;;  %v544_v4 = vmul.f32 %v3375_v50, %v543_v14  ;;  %vm1289_vm5 = vweird.f32 %v4237_v5  ;;  %v1292_v40 = vand.u32 2147483647, %v4172_v13  ;;  %v4752_v53 = vpop.eup %3382 }
 0x16f   : > { %v598_v50 = vsel %vm596_vm11, %v597_v25, %v595_v43  ;;  %3146 = vmatpush.xpose.msk.msra.mxu0 %vm454_vm1, %v1485_v49  ;;  %3205 = vmatpush.xpose.msk.msra.mxu1 %vm454_vm1, %v1485_v49  ;;  %v1306_v34 = vsel %vm4743_vm4, %v4230_v47, %v1302_v20  ;;  %v1286_v46 = vmul.f32 %v4237_v5, %v1285_v48  ;;  %v1294_v17 = vand.u32 2147483648, %v4172_v13  ;;  %v3398_v47 = vld [vmem:[%s6162_s1 + $0x28] sm:$0xff] }
 0x170   : > { %3384 = vrcp.f32 %v4707_v32  ;;  %v4766_v52 = vmax.f32 %v598_v50, 1e-08  ;;  %v545_v33 = vmul.f32 %v544_v4, %v4616_v30  ;;  %3206 = vmatpush.xpose.msk.msra.mxu2 %vm454_vm1, %v1485_v49  ;;  %3207 = vmatpush.xpose.msk.msra.mxu3 %vm454_vm1, %v1485_v49  ;;  %v1311_v39 = vsel %vm4728_vm3, %v1310_v61, %v1306_v34  ;;  %v1665_v50 = vld [vmem:[%s6163_s2 + $0x48] sm:$0xff] }
 0x171   : > { %v1484_v25 = vmul.f32 %v3398_v47, %v1311_v39  ;;  %v1287_v11 = vadd.f32 %v4237_v5, %v1286_v46  ;;  %vm1288_vm6 = vweird.f32 %v4172_v13  ;;  %v1269_v42 = vmul.f32 %v4250_v15, %v4192_v27  ;;  %1692 = vperm.xlu2 %3258, %v1662_v60   ;;  %v1664_v13 = vld [vmem:[%s6163_s2 + $0x40] sm:$0xff]  ;;  %1704 = vperm.xlu1 %3260, %v1666_v37  }
 0x172   : > { %3386 = vrcp.f32 %v4766_v52  ;;  %v547_v62 = vsel %vm546_vm13, %v4616_v30, %v545_v33  ;;  %vm1290_vm7 = vmor %vm1288_vm6, %vm1289_vm5  ;;  %vm1293_vm8 = vcmp.eq.f32.partialorder %v1292_v40, 8.507059e+37  ;;  %v1295_v14 = vor.u32 1.1754944e-38, %v1294_v17  ;;  %1698 = vperm.xlu0 %3259, %v1664_v13   ;;  %v3400_v13 = vld [vmem:[%s6162_s1 + $0x18] sm:$0xff]  ;;  %v3401_v40 = vld [vmem:[%s6162_s1 + $0x10] sm:$0xff] }
 0x173   : > { %v550_v7 = vsel %vm548_vm15, %v549_v38, %v547_v62  ;;  %3147 = vmatpush.xpose.msk.msra.mxu0 %vm454_vm1, %v1484_v25  ;;  %3208 = vmatpush.xpose.msk.msra.mxu1 %vm454_vm1, %v1484_v25  ;;  %v1291_v1 = vsel %vm1290_vm7, %v4237_v5, %v1287_v11  ;;  %v1270_v49 = vsub.f32 1.0, %v1269_v42  ;;  %v1277_v20 = vand.u32 2147483647, %v4192_v27  ;;  %v3399_v38 = vld [vmem:[%s6162_s1 + $0x20] sm:$0xff] }
 0x174   : > { %v4800_v61 = vmax.f32 %v550_v7, 1e-08  ;;  %3209 = vmatpush.xpose.msk.msra.mxu2 %vm454_vm1, %v1484_v25  ;;  %3210 = vmatpush.xpose.msk.msra.mxu3 %vm454_vm1, %v1484_v25  ;;  %v1296_v48 = vsel %vm1293_vm8, %v1295_v14, %v1291_v1  ;;  %v1279_v43 = vand.u32 2147483648, %v4192_v27  ;;  %v1254_v30 = vmul.f32 %v4276_v41, %v4215_v45 }
 0x175   : > { %v1483_v5 = vmul.f32 %v3399_v38, %v1296_v48  ;;  %v1271_v4 = vmul.f32 %v4250_v15, %v1270_v49  ;;  %vm1273_vm9 = vweird.f32 %v4192_v27  ;;  %vm1274_vm10 = vweird.f32 %v4250_v15 }
 0x176   : > { %v4813_v44 = vpop.eup %3384  ;;  %3388 = vrcp.f32 %v4800_v61  ;;  %vm4816_vm11 = vcmp.eq.f32.partialorder %v1277_v20, 8.507059e+37  ;;  %v1255_v60 = vsub.f32 1.0, %v1254_v30  ;;  %vm1258_vm12 = vweird.f32 %v4215_v45  ;;  %vm1275_vm13 = vmor %vm1273_vm9, %vm1274_vm10 }
 0x177   : > { %3148 = vmatpush.xpose.msk.msra.mxu0 %vm454_vm1, %v1483_v5  ;;  %3211 = vmatpush.xpose.msk.msra.mxu1 %vm454_vm1, %v1483_v5  ;;  %v1272_v34 = vadd.f32 %v4250_v15, %v1271_v4  ;;  %v1262_v46 = vand.u32 2147483647, %v4215_v45  ;;  %v1264_v17 = vand.u32 2147483648, %v4215_v45  ;;  %v1239_v33 = vmul.f32 %v4363_v54, %v4245_v12 }
 0x178   : > { %v4831_v39 = vpop.eup %3386  ;;  %3212 = vmatpush.xpose.msk.msra.mxu2 %vm454_vm1, %v1483_v5  ;;  %3213 = vmatpush.xpose.msk.msra.mxu3 %vm454_vm1, %v1483_v5  ;;  %v1280_v47 = vor.u32 1.1754944e-38, %v1279_v43  ;;  %v1256_v25 = vmul.f32 %v4276_v41, %v1255_v60  ;;  %vm1259_vm14 = vweird.f32 %v4276_v41  ;;  %v1247_v11 = vand.u32 2147483647, %v4245_v12 }
 0x179   : > { %v1276_v42 = vsel %vm1275_vm13, %v4250_v15, %v1272_v34  ;;  %v1240_v62 = vsub.f32 1.0, %v1239_v33  ;;  %vm1243_vm15 = vweird.f32 %v4245_v12  ;;  %vm1244_vm0 = vweird.f32 %v4363_v54  ;;  %1701 = vperm.xlu2 %3258, %v1665_v50   ;;  %vm1260_vm3 = vmor %vm1258_vm12, %vm1259_vm14 }
 0x17a   : > { %v1281_v14 = vsel %vm4816_vm11, %v1280_v47, %v1276_v42  ;;  %v1257_v27 = vadd.f32 %v4276_v41, %v1256_v25  ;;  %vm1263_vm2 = vcmp.eq.f32.partialorder %v1262_v46, 8.507059e+37  ;;  %v1249_v37 = vand.u32 2147483648, %v4245_v12  ;;  %vm1245_vm6 = vmor %vm1243_vm15, %vm1244_vm0  ;;  %v1667_v46 = vld [vmem:[%s6163_s2 + $0x58] sm:$0xff] }
 0x17b   : > { %v1482_v7 = vmul.f32 %v3400_v13, %v1281_v14  ;;  %v1265_v15 = vor.u32 1.1754944e-38, %v1264_v17  ;;  %v1241_v1 = vmul.f32 %v4363_v54, %v1240_v62  ;;  %v1224_v49 = vmul.f32 %v4373_v36, %v4252_v10  ;;  %1707 = vperm.xlu0 %3259, %v1667_v46  }
 0x17c   : > { %v4857_v20 = vpop.eup %3388  ;;  %v1261_v48 = vsel %vm1260_vm3, %v4276_v41, %v1257_v27  ;;  %vm4860_vm4 = vcmp.eq.f32.partialorder %v1247_v11, 8.507059e+37  ;;  %vm1228_vm5 = vweird.f32 %v4252_v10  ;;  %v1232_v30 = vand.u32 2147483647, %v4252_v10  ;;  %v1669_v41 = vld [vmem:[%s6163_s2 + $0x68] sm:$0xff] }
 0x17d   : > { %3149 = vmatpush.xpose.msk.msra.mxu0 %vm454_vm1, %v1482_v7  ;;  %3214 = vmatpush.xpose.msk.msra.mxu1 %vm454_vm1, %v1482_v7  ;;  %v1266_v45 = vsel %vm1263_vm2, %v1265_v15, %v1261_v48  ;;  %v1242_v38 = vadd.f32 %v4363_v54, %v1241_v1  ;;  %v1225_v5 = vsub.f32 1.0, %v1224_v49  ;;  %v1234_v4 = vand.u32 2147483648, %v4252_v10 }
 0x17e   : > { %3215 = vmatpush.xpose.msk.msra.mxu2 %vm454_vm1, %v1482_v7  ;;  %3216 = vmatpush.xpose.msk.msra.mxu3 %vm454_vm1, %v1482_v7  ;;  %v1481_v60 = vmul.f32 %v3401_v40, %v1266_v45  ;;  %v1250_v50 = vor.u32 1.1754944e-38, %v1249_v37  ;;  %vm1229_vm7 = vweird.f32 %v4373_v36  ;;  %v772_v34 = vmul.f32 %v4483_v8, %v4416_v57  ;;  %v3402_v37 = vld [vmem:[%s6162_s1 + $0x8] sm:$0xff] }
 0x17f   : > { %v1246_v17 = vsel %vm1245_vm6, %v4363_v54, %v1242_v38  ;;  %v1226_v33 = vmul.f32 %v4373_v36, %v1225_v5  ;;  %vm4890_vm8 = vcmp.eq.f32.partialorder %v1232_v30, 8.507059e+37  ;;  %vm776_vm9 = vweird.f32 %v4416_v57  ;;  %1713 = vperm.xlu1 %3260, %v1669_v41   ;;  %v1668_v54 = vld [vmem:[%s6163_s2 + $0x60] sm:$0xff]  ;;  %vm1230_vm11 = vmor %vm1228_vm5, %vm1229_vm7  ;;  %v1670_v5 = vld [vmem:[%s6163_s2 + $0x70] sm:$0xff] }
 0x180   : > { %v1251_v12 = vsel %vm4860_vm4, %v1250_v50, %v1246_v17  ;;  %v773_v25 = vsub.f32 1.0, %v772_v34  ;;  %v780_v11 = vand.u32 2147483647, %v4416_v57  ;;  %v782_v42 = vand.u32 2147483648, %v4416_v57 }
 0x181   : > { %3150 = vmatpush.xpose.msk.msra.mxu0 %vm454_vm1, %v1481_v60  ;;  %3217 = vmatpush.xpose.msk.msra.mxu1 %vm454_vm1, %v1481_v60  ;;  %v1227_v62 = vadd.f32 %v4373_v36, %v1226_v33  ;;  %v1235_v14 = vor.u32 1.1754944e-38, %v1234_v4  ;;  %vm777_vm10 = vweird.f32 %v4483_v8  ;;  %v832_v27 = vmul.f32 %v4389_v28, %v4335_v26 }
 0x182   : > { %3218 = vmatpush.xpose.msk.msra.mxu2 %vm454_vm1, %v1481_v60  ;;  %3219 = vmatpush.xpose.msk.msra.mxu3 %vm454_vm1, %v1481_v60  ;;  %v1480_v13 = vmul.f32 %v3402_v37, %v1251_v12  ;;  %v774_v7 = vmul.f32 %v4483_v8, %v773_v25  ;;  %vm4918_vm12 = vcmp.eq.f32.partialorder %v780_v11, 8.507059e+37  ;;  %vm836_vm13 = vweird.f32 %v4335_v26  ;;  %vm778_vm14 = vmor %vm776_vm9, %vm777_vm10  ;;  %v1671_v11 = vld [vmem:[%s6163_s2 + $0x78] sm:$0xff] }
 0x183   : > { %v1231_v1 = vsel %vm1230_vm11, %v4373_v36, %v1227_v62  ;;  %v833_v49 = vsub.f32 1.0, %v832_v27  ;;  %v840_v48 = vand.u32 2147483647, %v4335_v26  ;;  %v842_v43 = vand.u32 2147483648, %v4335_v26  ;;  %1710 = vperm.xlu2 %3258, %v1668_v54   ;;  %v3403_v36 = vld [vmem:[%s6162_s1] sm:$0xff]  ;;  %1716 = vperm.xlu0 %3259, %v1670_v5  }
 0x184   : > { %v1236_v10 = vsel %vm4890_vm8, %v1235_v14, %v1231_v1  ;;  %v775_v30 = vadd.f32 %v4483_v8, %v774_v7  ;;  %v783_v45 = vor.u32 1.1754944e-38, %v782_v42  ;;  %v892_v38 = vmul.f32 %v4383_v51, %v4329_v63  ;;  %v3404_v62 = vld [vmem:[%s6161_s0 + $0x20] sm:$0xff] }
 0x185   : > { %3151 = vmatpush.xpose.msk.msra.mxu0 %vm454_vm1, %v1480_v13  ;;  %3220 = vmatpush.xpose.msk.msra.mxu1 %vm454_vm1, %v1480_v13  ;;  %v1479_v4 = vmul.f32 %v3403_v36, %v1236_v10  ;;  %v834_v41 = vmul.f32 %v4389_v28, %v833_v49  ;;  %vm837_vm15 = vweird.f32 %v4389_v28  ;;  %vm896_vm0 = vweird.f32 %v4329_v63 }
 0x186   : > { %3221 = vmatpush.xpose.msk.msra.mxu2 %vm454_vm1, %v1480_v13  ;;  %3222 = vmatpush.xpose.msk.msra.mxu3 %vm454_vm1, %v1480_v13  ;;  %v779_v40 = vsel %vm778_vm14, %v4483_v8, %v775_v30  ;;  %vm4949_vm2 = vcmp.eq.f32.partialorder %v840_v48, 8.507059e+37  ;;  %v843_v50 = vor.u32 1.1754944e-38, %v842_v43  ;;  %v893_v34 = vsub.f32 1.0, %v892_v38  ;;  %vm4961_vm3 = vmor %vm836_vm13, %vm837_vm15 }
 0x187   : > { %v784_v57 = vsel %vm4918_vm12, %v783_v45, %v779_v40  ;;  %v835_v46 = vadd.f32 %v4389_v28, %v834_v41  ;;  %v902_v17 = vand.u32 2147483648, %v4329_v63  ;;  %v712_v33 = vmul.f32 %v4487_v9, %v4426_v35  ;;  %v3406_v41 = vld [vmem:[%s6161_s0 + $0x60] sm:$0xff] }
 0x188   : > { %v785_v47 = vmul.f32 10.0, %v784_v57  ;;  %v894_v12 = vmul.f32 %v4383_v51, %v893_v34  ;;  %vm897_vm4 = vweird.f32 %v4383_v51  ;;  %v900_v25 = vand.u32 2147483647, %v4329_v63  ;;  %v3405_v63 = vld [vmem:[%s6161_s0 + $0x40] sm:$0xff] }
 0x189   : > { %3152 = vmatpush.xpose.msk.msra.mxu0 %vm454_vm1, %v1479_v4  ;;  %3223 = vmatpush.xpose.msk.msra.mxu1 %vm454_vm1, %v1479_v4  ;;  %v839_v26 = vsel %vm4961_vm3, %v4389_v28, %v835_v46  ;;  %v903_v42 = vor.u32 1.1754944e-38, %v902_v17  ;;  %v713_v54 = vsub.f32 1.0, %v712_v33  ;;  %vm717_vm5 = vweird.f32 %v4487_v9  ;;  %vm898_vm6 = vmor %vm896_vm0, %vm897_vm4 }
 0x18a   : > { %3224 = vmatpush.xpose.msk.msra.mxu2 %vm454_vm1, %v1479_v4  ;;  %3225 = vmatpush.xpose.msk.msra.mxu3 %vm454_vm1, %v1479_v4  ;;  %v1467_v14 = vmul.f32 %v3404_v62, %v785_v47  ;;  %v844_v27 = vsel %vm4949_vm2, %v843_v50, %v839_v26  ;;  %v895_v37 = vadd.f32 %v4383_v51, %v894_v12  ;;  %v720_v28 = vand.u32 2147483647, %v4426_v35  ;;  %v3407_v47 = vld [vmem:[%s6161_s0] sm:$0xff] }
 0x18b   : > { %v845_v13 = vmul.f32 10.0, %v844_v27  ;;  %v714_v7 = vmul.f32 %v4487_v9, %v713_v54  ;;  %v722_v15 = vand.u32 2147483648, %v4426_v35  ;;  %v787_v1 = vmul.f32 %v4564_v2, %v4455_v6  ;;  %1719 = vperm.xlu2 %3258, %v1671_v11  }
 0x18c   : > { %3157 = vmatmul.msk.f32.vlgmr.msra.gmra.mxu1 %vm454_vm1, %v1467_v14  ;;  %v899_v49 = vsel %vm898_vm6, %v4383_v51, %v895_v37  ;;  %vm901_vm7 = vcmp.eq.f32.partialorder %v900_v25, 8.507059e+37  ;;  %vm716_vm8 = vweird.f32 %v4426_v35  ;;  %vm4997_vm9 = vcmp.eq.f32.partialorder %v720_v28, 8.507059e+37 }
 0x18d   : > { %v1471_v43 = vmul.f32 %v3405_v63, %v845_v13  ;;  %v904_v10 = vsel %vm901_vm7, %v903_v42, %v899_v49  ;;  %v715_v30 = vadd.f32 %v4487_v9, %v714_v7  ;;  %vm791_vm10 = vweird.f32 %v4455_v6  ;;  %vm718_vm11 = vmor %vm716_vm8, %vm717_vm5 }
 0x18e   : > { %v905_v45 = vmul.f32 10.0, %v904_v10  ;;  %v723_v51 = vor.u32 1.1754944e-38, %v722_v15  ;;  %v788_v35 = vsub.f32 1.0, %v787_v1  ;;  %v795_v38 = vand.u32 2147483647, %v4455_v6  ;;  %v3408_v1 = vld [vmem:[%s6161_s0 + $0x28] sm:$0xff] }
 0x18f   : > { %3161 = vmatmul.msk.f32.vlgmr.msra.gmra.mxu2 %vm454_vm1, %v1471_v43  ;;  %v719_v5 = vsel %vm718_vm11, %v4487_v9, %v715_v30  ;;  %vm792_vm12 = vweird.f32 %v4564_v2  ;;  %v797_v36 = vand.u32 2147483648, %v4455_v6  ;;  %v847_v4 = vmul.f32 %v4395_v3, %v4343_v16 }
 0x190   : > { %v1475_v40 = vmul.f32 %v3406_v41, %v905_v45  ;;  %v724_v60 = vsel %vm4997_vm9, %v723_v51, %v719_v5  ;;  %v789_v50 = vmul.f32 %v4564_v2, %v788_v35  ;;  %vm851_vm13 = vweird.f32 %v4343_v16  ;;  %vm793_vm0 = vmor %vm791_vm10, %vm792_vm12 }
 0x191   : > { %v725_v9 = vmul.f32 10.0, %v724_v60  ;;  %v848_v34 = vsub.f32 1.0, %v847_v4  ;;  %vm852_vm14 = vweird.f32 %v4395_v3  ;;  %v855_v57 = vand.u32 2147483647, %v4343_v16 }
 0x192   : > { %3165 = vmatmul.msk.f32.vlgmr.msra.gmra.mxu3 %vm454_vm1, %v1475_v40  ;;  %v790_v46 = vadd.f32 %v4564_v2, %v789_v50  ;;  %vm796_vm15 = vcmp.eq.f32.partialorder %v795_v38, 8.507059e+37  ;;  %v857_v17 = vand.u32 2147483648, %v4343_v16  ;;  %v727_v33 = vmul.f32 %v4574_v59, %v4466_v0  ;;  %vm853_vm5 = vmor %vm851_vm13, %vm852_vm14  ;;  %v3410_v50 = vld [vmem:[%s6161_s0 + $0x8] sm:$0xff] }
 0x193   : > { %v1463_v8 = vmul.f32 %v3407_v47, %v725_v9  ;;  %v798_v12 = vor.u32 1.1754944e-38, %v797_v36  ;;  %v849_v25 = vmul.f32 %v4395_v3, %v848_v34  ;;  %vm731_vm2 = vweird.f32 %v4466_v0 }
 0x194   : > { %v794_v11 = vsel %vm793_vm0, %v4564_v2, %v790_v46  ;;  %vm5039_vm3 = vcmp.eq.f32.partialorder %v855_v57, 8.507059e+37  ;;  %v728_v42 = vsub.f32 1.0, %v727_v33  ;;  %vm732_vm4 = vweird.f32 %v4574_v59 }
 0x195   : > { %3153 = vmatmul.msk.f32.vlgmr.msra.gmra.mxu0 %vm454_vm1, %v1463_v8  ;;  %v799_v54 = vsel %vm796_vm15, %v798_v12, %v794_v11  ;;  %v850_v6 = vadd.f32 %v4395_v3, %v849_v25  ;;  %v737_v62 = vand.u32 2147483648, %v4466_v0  ;;  %v907_v14 = vmul.f32 %v4593_v22, %v4528_v55  ;;  %vm733_vm7 = vmor %vm731_vm2, %vm732_vm4  ;;  %v3411_v12 = vld [vmem:[%s6161_s0 + $0x68] sm:$0xff] }
 0x196   : > { %v800_v27 = vmul.f32 10.0, %v799_v54  ;;  %v858_v2 = vor.u32 1.1754944e-38, %v857_v17  ;;  %v729_v37 = vmul.f32 %v4574_v59, %v728_v42  ;;  %v735_v28 = vand.u32 2147483647, %v4466_v0  ;;  %v3409_v0 = vld [vmem:[%s6161_s0 + $0x48] sm:$0xff] }
 0x197   : > { %v854_v13 = vsel %vm853_vm5, %v4395_v3, %v850_v6  ;;  %v738_v7 = vor.u32 1.1754944e-38, %v737_v62  ;;  %v908_v15 = vsub.f32 1.0, %v907_v14  ;;  %vm912_vm6 = vweird.f32 %v4593_v22 }
 0x198   : > { %v1468_v49 = vmul.f32 %v3408_v1, %v800_v27  ;;  %v859_v16 = vsel %vm5039_vm3, %v858_v2, %v854_v13  ;;  %v730_v48 = vadd.f32 %v4574_v59, %v729_v37  ;;  %v915_v63 = vand.u32 2147483647, %v4528_v55  ;;  %v3412_v1 = vld [vmem:[%s6161_s0 + $0x10] sm:$0xff] }
 0x199   : > { %v860_v43 = vmul.f32 10.0, %v859_v16  ;;  %v909_v3 = vmul.f32 %v4593_v22, %v908_v15  ;;  %v917_v10 = vand.u32 2147483648, %v4528_v55  ;;  %v742_v30 = vmul.f32 %v4599_v24, %v4535_v31 }
 0x19a   : > { %3158 = vmatmul.msk.f32.gmra.mxu1 %vm454_vm1, %v1468_v49  ;;  %v734_v45 = vsel %vm733_vm7, %v4574_v59, %v730_v48  ;;  %vm736_vm8 = vcmp.eq.f32.partialorder %v735_v28, 8.507059e+37  ;;  %vm911_vm9 = vweird.f32 %v4528_v55  ;;  %vm5075_vm10 = vcmp.eq.f32.partialorder %v915_v63, 8.507059e+37 }
 0x19b   : > { %v1472_v35 = vmul.f32 %v3409_v0, %v860_v43  ;;  %v739_v38 = vsel %vm736_vm8, %v738_v7, %v734_v45  ;;  %v910_v5 = vadd.f32 %v4593_v22, %v909_v3  ;;  %vm746_vm11 = vweird.f32 %v4535_v31  ;;  %vm913_vm12 = vmor %vm911_vm9, %vm912_vm6 }
 0x19c   : > { %v740_v36 = vmul.f32 10.0, %v739_v38  ;;  %v918_v59 = vor.u32 1.1754944e-38, %v917_v10  ;;  %v743_v55 = vsub.f32 1.0, %v742_v30  ;;  %v750_v4 = vand.u32 2147483647, %v4535_v31 }
 0x19d   : > { %3162 = vmatmul.msk.f32.gmra.mxu2 %vm454_vm1, %v1472_v35  ;;  %v914_v41 = vsel %vm913_vm12, %v4593_v22, %v910_v5  ;;  %vm747_vm13 = vweird.f32 %v4599_v24  ;;  %v752_v40 = vand.u32 2147483648, %v4535_v31  ;;  %v802_v60 = vmul.f32 %v4813_v44, %v4707_v32 }
 0x19e   : > { %v1464_v9 = vmul.f32 %v3410_v50, %v740_v36  ;;  %v919_v34 = vsel %vm5075_vm10, %v918_v59, %v914_v41  ;;  %v744_v57 = vmul.f32 %v4599_v24, %v743_v55  ;;  %vm806_vm14 = vweird.f32 %v4707_v32  ;;  %vm748_vm2 = vmor %vm746_vm11, %vm747_vm13  ;;  %v3414_v55 = vld [vmem:[%s6161_s0 + $0x50] sm:$0xff] }
 0x19f   : > { %v920_v22 = vmul.f32 10.0, %v919_v34  ;;  %v803_v46 = vsub.f32 1.0, %v802_v60  ;;  %vm807_vm15 = vweird.f32 %v4813_v44  ;;  %v810_v17 = vand.u32 2147483647, %v4707_v32 }
 0x1a0   : > { %3154 = vmatmul.msk.f32.gmra.mxu0 %vm454_vm1, %v1464_v9  ;;  %v745_v33 = vadd.f32 %v4599_v24, %v744_v57  ;;  %vm751_vm0 = vcmp.eq.f32.partialorder %v750_v4, 8.507059e+37  ;;  %v812_v47 = vand.u32 2147483648, %v4707_v32  ;;  %v862_v8 = vmul.f32 %v4697_v56, %v4618_v23  ;;  %vm808_vm6 = vmor %vm806_vm14, %vm807_vm15 }
 0x1a1   : > { %v1476_v25 = vmul.f32 %v3411_v12, %v920_v22  ;;  %v753_v11 = vor.u32 1.1754944e-38, %v752_v40  ;;  %v804_v26 = vmul.f32 %v4813_v44, %v803_v46  ;;  %vm866_vm3 = vweird.f32 %v4618_v23  ;;  %v3415_v22 = vld [vmem:[%s6161_s0 + $0x70] sm:$0xff] }
 0x1a2   : > { %v749_v42 = vsel %vm748_vm2, %v4599_v24, %v745_v33  ;;  %vm5117_vm4 = vcmp.eq.f32.partialorder %v810_v17, 8.507059e+37  ;;  %v863_v6 = vsub.f32 1.0, %v862_v8  ;;  %vm867_vm5 = vweird.f32 %v4697_v56 }
 0x1a3   : > { %3166 = vmatmul.msk.f32.gmra.mxu3 %vm454_vm1, %v1476_v25  ;;  %v754_v62 = vsel %vm751_vm0, %v753_v11, %v749_v42  ;;  %v805_v31 = vadd.f32 %v4813_v44, %v804_v26  ;;  %v872_v14 = vand.u32 2147483648, %v4618_v23  ;;  %v922_v27 = vmul.f32 %v4683_v19, %v4560_v18  ;;  %vm868_vm8 = vmor %vm866_vm3, %vm867_vm5 }
 0x1a4   : > { %v755_v2 = vmul.f32 10.0, %v754_v62  ;;  %v813_v24 = vor.u32 1.1754944e-38, %v812_v47  ;;  %v864_v37 = vmul.f32 %v4697_v56, %v863_v6  ;;  %v870_v28 = vand.u32 2147483647, %v4618_v23  ;;  %v3413_v23 = vld [vmem:[%s6161_s0 + $0x30] sm:$0xff] }
 0x1a5   : > { %v809_v13 = vsel %vm808_vm6, %v4813_v44, %v805_v31  ;;  %v873_v7 = vor.u32 1.1754944e-38, %v872_v14  ;;  %v923_v15 = vsub.f32 1.0, %v922_v27  ;;  %vm927_vm7 = vweird.f32 %v4683_v19 }
 0x1a6   : > { %v1465_v49 = vmul.f32 %v3412_v1, %v755_v2  ;;  %v814_v32 = vsel %vm5117_vm4, %v813_v24, %v809_v13  ;;  %v865_v16 = vadd.f32 %v4697_v56, %v864_v37  ;;  %v930_v48 = vand.u32 2147483647, %v4560_v18  ;;  %v3416_v24 = vld [vmem:[%s6161_s0 + $0x18] sm:$0xff] }
 0x1a7   : > { %v815_v63 = vmul.f32 10.0, %v814_v32  ;;  %v924_v44 = vmul.f32 %v4683_v19, %v923_v15  ;;  %v932_v43 = vand.u32 2147483648, %v4560_v18  ;;  %v757_v3 = vmul.f32 %v4857_v20, %v4800_v61 }
 0x1a8   : > { %3155 = vmatmul.msk.f32.gmra.mxu0 %vm454_vm1, %v1465_v49  ;;  %v869_v10 = vsel %vm868_vm8, %v4697_v56, %v865_v16  ;;  %vm871_vm9 = vcmp.eq.f32.partialorder %v870_v28, 8.507059e+37  ;;  %vm926_vm10 = vweird.f32 %v4560_v18  ;;  %vm5153_vm11 = vcmp.eq.f32.partialorder %v930_v48, 8.507059e+37  ;;  %v3417_v49 = vld [vmem:[%s6161_s0 + $0x38] sm:$0xff] }
 0x1a9   : > { %v1469_v45 = vmul.f32 %v3413_v23, %v815_v63  ;;  %v874_v51 = vsel %vm871_vm9, %v873_v7, %v869_v10  ;;  %v925_v0 = vadd.f32 %v4683_v19, %v924_v44  ;;  %vm761_vm12 = vweird.f32 %v4800_v61  ;;  %vm928_vm13 = vmor %vm926_vm10, %vm927_vm7  ;;  %v3418_v44 = vld [vmem:[%s6161_s0 + $0x58] sm:$0xff] }
 0x1aa   : > { %v875_v35 = vmul.f32 10.0, %v874_v51  ;;  %v933_v56 = vor.u32 1.1754944e-38, %v932_v43  ;;  %v758_v18 = vsub.f32 1.0, %v757_v3  ;;  %v765_v38 = vand.u32 2147483647, %v4800_v61 }
 0x1ab   : > { %3159 = vmatmul.msk.f32.gmra.mxu1 %vm454_vm1, %v1469_v45  ;;  %v929_v5 = vsel %vm928_vm13, %v4683_v19, %v925_v0  ;;  %vm762_vm14 = vweird.f32 %v4857_v20  ;;  %v767_v36 = vand.u32 2147483648, %v4800_v61  ;;  %v817_v59 = vmul.f32 %v4831_v39, %v4766_v52 }
 0x1ac   : > { %v1473_v4 = vmul.f32 %v3414_v55, %v875_v35  ;;  %v934_v41 = vsel %vm5153_vm11, %v933_v56, %v929_v5  ;;  %v759_v40 = vmul.f32 %v4857_v20, %v758_v18  ;;  %vm821_vm15 = vweird.f32 %v4766_v52  ;;  %vm763_vm3 = vmor %vm761_vm12, %vm762_vm14 }
 0x1ad   : > { %v935_v19 = vmul.f32 10.0, %v934_v41  ;;  %v818_v60 = vsub.f32 1.0, %v817_v59  ;;  %vm822_vm0 = vweird.f32 %v4831_v39  ;;  %v825_v50 = vand.u32 2147483647, %v4766_v52 }
 0x1ae   : > { %3163 = vmatmul.msk.f32.gmra.mxu2 %vm454_vm1, %v1473_v4  ;;  %v760_v9 = vadd.f32 %v4857_v20, %v759_v40  ;;  %vm766_vm2 = vcmp.eq.f32.partialorder %v765_v38, 8.507059e+37  ;;  %v827_v34 = vand.u32 2147483648, %v4766_v52  ;;  %v877_v57 = vmul.f32 %v4752_v53, %v4685_v29  ;;  %vm823_vm7 = vmor %vm821_vm15, %vm822_vm0 }
 0x1af   : > { %v1477_v46 = vmul.f32 %v3415_v22, %v935_v19  ;;  %v768_v17 = vor.u32 1.1754944e-38, %v767_v36  ;;  %v819_v33 = vmul.f32 %v4831_v39, %v818_v60  ;;  %vm881_vm4 = vweird.f32 %v4685_v29 }
 0x1b0   : > { %v764_v47 = vsel %vm763_vm3, %v4857_v20, %v760_v9  ;;  %vm5195_vm5 = vcmp.eq.f32.partialorder %v825_v50, 8.507059e+37  ;;  %v878_v12 = vsub.f32 1.0, %v877_v57  ;;  %vm882_vm6 = vweird.f32 %v4752_v53  ;;  %v5208_v20 = vld [vmem:[%s6164_s3] ss:$0 sm:$0xff] }
 0x1b1   : > { %3167 = vmatmul.msk.f32.gmra.mxu3 %vm454_vm1, %v1477_v46  ;;  %v769_v25 = vsel %vm766_vm2, %v768_v17, %v764_v47  ;;  %v820_v61 = vadd.f32 %v4831_v39, %v819_v33  ;;  %v887_v11 = vand.u32 2147483648, %v4685_v29  ;;  %v937_v26 = vmul.f32 %v4732_v21, %v4660_v58  ;;  %v5216_v31 = vpop.permute.xlu2 %1674  ;;  %vm883_vm9 = vmor %vm881_vm4, %vm882_vm6 }
 0x1b2   : > { %v770_v42 = vmul.f32 10.0, %v769_v25  ;;  %v828_v54 = vor.u32 1.1754944e-38, %v827_v34  ;;  %v879_v6 = vmul.f32 %v4752_v53, %v878_v12  ;;  %v885_v62 = vand.u32 2147483647, %v4685_v29  ;;  %6235 = vst [vmem:[#allocation5_spill] sm:$0xff] %v5216_v31 }
 0x1b3   : > { %v824_v14 = vsel %vm823_vm7, %v4831_v39, %v820_v61  ;;  %v888_v27 = vor.u32 1.1754944e-38, %v887_v11  ;;  %v938_v2 = vsub.f32 1.0, %v937_v26  ;;  %vm942_vm8 = vweird.f32 %v4732_v21 }
 0x1b4   : > { %v1466_v37 = vmul.f32 %v3416_v24, %v770_v42  ;;  %v829_v52 = vsel %vm5195_vm5, %v828_v54, %v824_v14  ;;  %v880_v28 = vadd.f32 %v4752_v53, %v879_v6  ;;  %v945_v13 = vand.u32 2147483647, %v4660_v58 }
 0x1b5   : > { %v830_v7 = vmul.f32 10.0, %v829_v52  ;;  %v939_v39 = vmul.f32 %v4732_v21, %v938_v2  ;;  %v947_v15 = vand.u32 2147483648, %v4660_v58  ;;  %vm6167_vm10 = vcmp.eq.s32.totalorder %v5216_v31, %v5208_v20 }
 0x1b6   : > { %3156 = vmatmul.msk.f32.gmra.mxu0 %vm454_vm1, %v1466_v37  ;;  %v884_v1 = vsel %vm883_vm9, %v4752_v53, %v880_v28  ;;  %vm886_vm11 = vcmp.eq.f32.partialorder %v885_v62, 8.507059e+37  ;;  %vm941_vm12 = vweird.f32 %v4660_v58  ;;  %vm946_vm14 = vcmp.eq.f32.partialorder %v945_v13, 8.507059e+37  ;;  %v3419_v58 = vld [vmem:[%s6161_s0 + $0x78] sm:$0xff] }
 0x1b7   : > { %v1470_v32 = vmul.f32 %v3417_v49, %v830_v7  ;;  %v889_v16 = vsel %vm886_vm11, %v888_v27, %v884_v1  ;;  %v940_v29 = vadd.f32 %v4732_v21, %v939_v39  ;;  %vm943_vm13 = vmor %vm941_vm12, %vm942_vm8  ;;  %v948_v63 = vor.u32 1.1754944e-38, %v947_v15 }
 0x1b8   : > { %v890_v48 = vmul.f32 10.0, %v889_v16  ;;  %v1739_v22 = vlaneseq }
 0x1b9   : > { %3160 = vmatmul.msk.f32.gmra.mxu1 %vm454_vm1, %v1470_v32  ;;  %v944_v53 = vsel %vm943_vm13, %v4732_v21, %v940_v29 }
 0x1ba   : > { %v1474_v43 = vmul.f32 %v3418_v44, %v890_v48  ;;  %v949_v3 = vsel %vm946_vm14, %v948_v63, %v944_v53  ;;  %v5249_v30 = vpop.permute.xlu2 %1683  ;;  %v5328_v46 = vshrl.u32 %v1739_v22, 7  ;;  %v5330_v17 = vand.u32 127, %v1739_v22 }
 0x1bb   : > { %v950_v10 = vmul.f32 10.0, %v949_v3  ;;  %vm1725_vm15 = vcmp.eq.s32.totalorder %v5249_v30, %v5208_v20 }
 0x1bc   : > { %3164 = vmatmul.msk.f32.gmra.mxu2 %vm454_vm1, %v1474_v43  ;;  %6236 = vst [vmem:[#allocation6_spill] sm:$0xff] %v5328_v46  ;;  %vm6185_vm8 = vcmp.lt.s32.totalorder %v5330_v17, 8 }
 0x1bd   : > { %v1478_v21 = vmul.f32 %v3419_v58, %v950_v10 }
 0x1bf   : > { %3168 = vmatmul.msk.f32.gmra.mxu3 %vm454_vm1, %v1478_v21 }
 0x1c2   : > { %v5258_v23 = vpop.permute.xlu2 %1686 }
 0x1c3   : > { %vm1726_vm0 = vcmp.eq.s32.totalorder %v5258_v23, %v5208_v20 }
 0x1c9   : > { %v5262_v45 = vpop.permute.xlu1 %1680 }
 0x1ca   : > { %vm1724_vm2 = vcmp.eq.s32.totalorder %v5262_v45, %v5208_v20 }
 0x1cb   : > { %v5264_v51 = vpop.permute.xlu2 %1692 }
 0x1cc   : > { %vm1728_vm3 = vcmp.eq.s32.totalorder %v5264_v51, %v5208_v20 }
 0x1d2   : > { %v5272_v35 = vpop.permute.xlu1 %1689 }
 0x1d3   : > { %v5270_v0 = vpop.permute.xlu2 %1701  ;;  %vm1727_vm4 = vcmp.eq.s32.totalorder %v5272_v35, %v5208_v20  ;;  %v5278_v56 = vpop.permute.xlu0 %1677 }
 0x1d4   : > { %vm1731_vm1 = vcmp.eq.s32.totalorder %v5270_v0, %v5208_v20  ;;  %vm1723_vm5 = vcmp.eq.s32.totalorder %v5278_v56, %v5208_v20 }
 0x1da   : > { %v5282_v18 = vpop.permute.xlu1 %1695 }
 0x1db   : > { %vm1729_vm6 = vcmp.eq.s32.totalorder %v5282_v18, %v5208_v20 }
 0x1dd   : > { %v5286_v38 = vpop.permute.xlu2 %1710 }
 0x1e3   : > { %v5294_v36 = vpop.permute.xlu1 %1704 }
 0x1e4   : > { %v5296_v59 = vpop.permute.xlu0 %1698 }
 0x1e5   : > { %v5290_v5 = vpop.permute.xlu2 %1719 }
 0x1ed   : > { %v5304_v4 = vpop.permute.xlu0 %1707 }
 0x1f1   : > { %v5302_v55 = vpop.permute.xlu1 %1713 }
 0x1f5   : > { %v5310_v41 = vpop.permute.xlu0 %1716 }
 0x209   : > { %v5314_v40 = vpop.f32.mrf.mxu1 }
 0x212   : > { %v5316_v19 = vpop.f32.mrf.mxu0  ;;  %v5318_v60 = vpop.f32.mrf.mxu2 }
 0x215   : > { %v5320_v50 = vpop.f32.mrf.mxu3 }
 0x217   : > { %v5322_v9 = vpop.f32.mrf.mxu1 }
 0x21d   : > { %v5324_v34 = vpop.f32.mrf.mxu0 }
 0x220   : > { %v5326_v57 = vpop.f32.mrf.mxu2 }
 0x225   : > { %v5332_v33 = vpop.f32.mrf.mxu0 }
 0x226   : > { %v5334_v47 = vpop.f32.mrf.mxu3 }
 0x228   : > { %v5337_v8 = vpop.f32.mrf.mxu1 }
 0x231   : > { %v5339_v12 = vpop.f32.mrf.mxu2 }
 0x233   : > { %v5341_v25 = vpop.f32.mrf.mxu0 }
 0x234   : > { %v5343_v61 = vpop.f32.mrf.mxu3 }
 0x236   : > { %v5345_v11 = vpop.f32.mrf.mxu1 }
 0x23e   : > { %1781 = sbr.rel (%p3169_p5) target bundleno = 993 (0x3e1), region = 44 }
 0x23f   : > { %v5347_v26 = vpop.f32.mrf.mxu2 }
 0x242   : > { %v5349_v42 = vpop.f32.mrf.mxu3 }
 0x243   : > { %v1784_v54 = vsel %vm6185_vm8, %v5332_v33, -inf  ;;  %v1782_v6 = vsel %vm6185_vm8, %v5316_v19, -inf  ;;  %v1786_v62 = vsel %vm6185_vm8, %v5314_v40, -inf  ;;  %v1783_v14 = vsel %vm6185_vm8, %v5324_v34, -inf  ;;  %v5465_v21 = vld [vmem:[#allocation2 + $0x10] sm:$0xff]  ;;  %v5467_v23 = vld [vmem:[#allocation2] sm:$0xff] }
 0x244   : > { %1850 = vmax.xlane.f32.xlu1 %v1784_v54  ;;  %1846 = vmax.xlane.f32.xlu0 %v1782_v6  ;;  %v1785_v27 = vsel %vm6185_vm8, %v5341_v25, -inf  ;;  %v1787_v2 = vsel %vm6185_vm8, %v5322_v9, -inf  ;;  %v1788_v24 = vsel %vm6185_vm8, %v5337_v8, -inf  ;;  %v1789_v37 = vsel %vm6185_vm8, %v5345_v11, -inf  ;;  %v5469_v45 = vld [vmem:[#allocation2 + $0x20] sm:$0xff]  ;;  %v5586_v31 = vld [vmem:[#allocation2 + $0x70] sm:$0xff] }
 0x245   : > { %1854 = vmax.xlane.f32.xlu2 %v1786_v62  ;;  %v1790_v52 = vsel %vm6185_vm8, %v5318_v60, -inf  ;;  %v1791_v28 = vsel %vm6185_vm8, %v5326_v57, -inf  ;;  %v1792_v13 = vsel %vm6185_vm8, %v5339_v12, -inf  ;;  %v1793_v7 = vsel %vm6185_vm8, %v5347_v26, -inf  ;;  %6258 = vst [vmem:[#allocation18_spill] sm:$0xff] %v5586_v31 }
 0x246   : > { %v1794_v39 = vsel %vm6185_vm8, %v5320_v50, -inf  ;;  %v1795_v15 = vsel %vm6185_vm8, %v5334_v47, -inf  ;;  %v1796_v1 = vsel %vm6185_vm8, %v5343_v61, -inf  ;;  %vm3521_vm14 = vmmov 1  }
 0x247   : > { %vm1798_vm12 = vmxor %vm6167_vm10, %vm3521_vm14  ;;  %v1797_v16 = vsel %vm6185_vm8, %v5349_v42, -inf  ;;  %v6168_v29 = vmov 0.0   ;;  %v3523_v58 = vmov 0   ;;  %v6268_v51 = vmov 0.0  }
 0x248   : > { %vm1799_vm13 = vmxor %vm1723_vm5, %vm3521_vm14  ;;  %3422 = vset.pattern.permute.xlu0 %v3523_v58  ;;  %3420 = vset.pattern.permute.xlu1 %v3523_v58  ;;  %v6270_v35 = vmov 0  ;;  %v6272_v18 = vmov 0  ;;  %v6274_v0 = vmov 0 }
 0x249   : > { %vm5407_vm7 = vmand %vm1798_vm12, %vm6185_vm8  ;;  %3421 = vset.pattern.permute.xlu2 %v3523_v58  ;;  %v5527_v58 = vld [vmem:[#allocation2 + $0x40] sm:$0xff] }
 0x24a   : > { %vm5413_vm9 = vmand %vm1799_vm13, %vm6185_vm8  ;;  %v2199_v48 = vsel %vm5407_vm7, 1.0, %v6168_v29  ;;  %6247 = vst [vmem:[#allocation7_spill] sm:$0xff] %v5527_v58 }
 0x24b   : > { %v2200_v63 = vsel %vm5413_vm9, 1.0, %v6168_v29  ;;  %vm1801_vm5 = vmxor %vm1725_vm15, %vm3521_vm14 }
 0x24c   : > { %1848 = vmax.xlane.f32.xlu0 %v1783_v14  ;;  %1852 = vmax.xlane.f32.xlu1 %v1785_v27  ;;  %vm1800_vm12 = vmxor %vm1724_vm2, %vm3521_vm14 }
 0x24d   : > { %1856 = vmax.xlane.f32.xlu2 %v1787_v2  ;;  %vm1802_vm13 = vmxor %vm1726_vm0, %vm3521_vm14  ;;  %vm6184_vm0 = vcmask 7168  }
 0x24e   : > { %vm5440_vm10 = vmand %vm1801_vm5, %vm6185_vm8 }
 0x24f   : > { %vm5446_vm15 = vmand %vm1800_vm12, %vm6185_vm8  ;;  %v2202_v3 = vsel %vm5440_vm10, 1.0, %v6168_v29 }
 0x250   : > { %vm5452_vm2 = vmand %vm1802_vm13, %vm6185_vm8  ;;  %v2201_v10 = vsel %vm5446_vm15, 1.0, %v6168_v29 }
 0x251   : > { %v2203_v30 = vsel %vm5452_vm2, 1.0, %v6168_v29  ;;  %v5584_v29 = vld [vmem:[#allocation2 + $0x68] sm:$0xff]  ;;  %vm1804_vm5 = vmxor %vm1728_vm3, %vm3521_vm14 }
 0x252   : > { %6257 = vst [vmem:[#allocation17_spill] sm:$0xff] %v5584_v29  ;;  %vm1803_vm12 = vmxor %vm1727_vm4, %vm3521_vm14 }
 0x253   : > { %vm5640_vm13 = vmand %vm1804_vm5, %vm6185_vm8  ;;  %vm6269_vm5 = vcmp.eq.s32.totalorder %v5296_v59, %v5208_v20 }
 0x254   : > { %1858 = vmax.xlane.f32.xlu0 %v1788_v24  ;;  %1860 = vmax.xlane.f32.xlu1 %v1789_v37  ;;  %v5494_v37 = vld [vmem:[#allocation2 + $0x8] sm:$0xff]  ;;  %vm5646_vm11 = vmand %vm1803_vm12, %vm6185_vm8 }
 0x255   : > { %1862 = vmax.xlane.f32.xlu2 %v1790_v52  ;;  %v5496_v52 = vld [vmem:[#allocation2 + $0x18] sm:$0xff]  ;;  %vm1805_vm3 = vmxor %vm1729_vm6, %vm3521_vm14 }
 0x256   : > { %vm1807_vm4 = vmxor %vm1731_vm1, %vm3521_vm14 }
 0x257   : > { %vm1806_vm12 = vmxor %vm6269_vm5, %vm3521_vm14  ;;  %vm6277_vm5 = vcmp.eq.s32.totalorder %v5286_v38, %v5208_v20 }
 0x258   : > { %vm5676_vm6 = vmand %vm1807_vm4, %vm6185_vm8 }
 0x259   : > { %v6273_v18 = vsel %vm5676_vm6, 4294967295, %v6272_v18  ;;  %vm5682_vm1 = vmand %vm1806_vm12, %vm6185_vm8 }
 0x25a   : > { %v6275_v0 = vsel %vm5682_vm1, 4294967295, %v6274_v0  ;;  %vm1810_vm12 = vmxor %vm6277_vm5, %vm3521_vm14 }
 0x25c   : > { %1864 = vmax.xlane.f32.xlu0 %v1791_v28  ;;  %1866 = vmax.xlane.f32.xlu1 %v1792_v13  ;;  %v5498_v28 = vld [vmem:[#allocation2 + $0x28] sm:$0xff] }
 0x25d   : > { %1868 = vmax.xlane.f32.xlu2 %v1793_v7 }
 0x264   : > { %1870 = vmax.xlane.f32.xlu0 %v1794_v39  ;;  %1872 = vmax.xlane.f32.xlu1 %v1795_v15 }
 0x265   : > { %1874 = vmax.xlane.f32.xlu2 %v1796_v1 }
 0x26c   : > { %1876 = vmax.xlane.f32.xlu0 %v1797_v16  ;;  %2215 = vadd.xlane.f32.xlu1 %v2199_v48 }
 0x26d   : > { %2217 = vadd.xlane.f32.xlu2 %v2200_v63  ;;  %v5556_v63 = vld [vmem:[#allocation2 + $0x58] sm:$0xff] }
 0x26e   : > { %6252 = vst [vmem:[#allocation12_spill] sm:$0xff] %v5556_v63 }
 0x274   : > { %2221 = vadd.xlane.f32.xlu1 %v2202_v3  ;;  %2219 = vadd.xlane.f32.xlu0 %v2201_v10  ;;  %v5523_v10 = vld [vmem:[#allocation2 + $0x30] sm:$0xff] }
 0x275   : > { %2223 = vadd.xlane.f32.xlu2 %v2203_v30  ;;  %v5525_v30 = vld [vmem:[#allocation2 + $0x38] sm:$0xff]  ;;  %v5554_v3 = vld [vmem:[#allocation2 + $0x50] sm:$0xff] }
 0x276   : > { %6251 = vst [vmem:[#allocation11_spill] sm:$0xff] %v5554_v3 }
 0x2b7   : > { %v1851_v56 = vpop.xlane.xlu1 %1850  ;;  %v1847_v22 = vpop.xlane.xlu0 %1846 }
 0x2b8   : > { %v5472_v54 = vmax.f32 %v5465_v21, %v1851_v56  ;;  %v5475_v6 = vmax.f32 %v5467_v23, %v1847_v22  ;;  %v1855_v62 = vpop.xlane.xlu2 %1854 }
 0x2b9   : > { %v5478_v14 = vmax.f32 %v5469_v45, %v1855_v62 }
 0x2ba   : > { %2281 = vst.msk [vmem:[#allocation2 + $0x10] sm:$0xff] %vm6184_vm0, %v5472_v54  ;;  %1954 = vperm.xlu0 %3422, %v5472_v54   ;;  %1944 = vperm.xlu1 %3420, %v5475_v6  }
 0x2bb   : > { %2279 = vst.msk [vmem:[#allocation2] sm:$0xff] %vm6184_vm0, %v5475_v6 }
 0x2bc   : > { %2283 = vst.msk [vmem:[#allocation2 + $0x20] sm:$0xff] %vm6184_vm0, %v5478_v14 }
 0x2bf   : > { %v1849_v13 = vpop.xlane.xlu0 %1848  ;;  %v1853_v7 = vpop.xlane.xlu1 %1852 }
 0x2c0   : > { %v5501_v39 = vmax.f32 %v5494_v37, %v1849_v13  ;;  %v1857_v15 = vpop.xlane.xlu2 %1856  ;;  %v5504_v1 = vmax.f32 %v5496_v52, %v1853_v7 }
 0x2c1   : > { %v5507_v16 = vmax.f32 %v5498_v28, %v1857_v15 }
 0x2c2   : > { %2280 = vst.msk [vmem:[#allocation2 + $0x8] sm:$0xff] %vm6184_vm0, %v5501_v39  ;;  %1964 = vperm.xlu1 %3420, %v5478_v14   ;;  %1949 = vperm.xlu2 %3421, %v5501_v39  }
 0x2c3   : > { %2284 = vst.msk [vmem:[#allocation2 + $0x28] sm:$0xff] %vm6184_vm0, %v5507_v16 }
 0x2c4   : > { %2282 = vst.msk [vmem:[#allocation2 + $0x18] sm:$0xff] %vm6184_vm0, %v5504_v1 }
 0x2c7   : > { %v1859_v56 = vpop.xlane.xlu0 %1858  ;;  %v1861_v22 = vpop.xlane.xlu1 %1860 }
 0x2c8   : > { %v5530_v62 = vmax.f32 %v5523_v10, %v1859_v56  ;;  %v1863_v13 = vpop.xlane.xlu2 %1862  ;;  %v5533_v7 = vmax.f32 %v5525_v30, %v1861_v22 }
 0x2c9   : > { %v5536_v15 = vmax.f32 %v5527_v58, %v1863_v13  ;;  %v5552_v13 = vld [vmem:[#allocation2 + $0x48] sm:$0xff] }
 0x2ca   : > { %6248 = vst [vmem:[#allocation8_spill] sm:$0xff] %v5530_v62  ;;  %1959 = vperm.xlu2 %3421, %v5504_v1   ;;  %1974 = vperm.xlu1 %3420, %v5530_v62  }
 0x2cb   : > { %6249 = vst [vmem:[#allocation9_spill] sm:$0xff] %v5536_v15 }
 0x2cc   : > { %2285 = vst.msk [vmem:[#allocation2 + $0x30] sm:$0xff] %vm6184_vm0, %v5530_v62 }
 0x2cd   : > { %2287 = vst.msk [vmem:[#allocation2 + $0x40] sm:$0xff] %vm6184_vm0, %v5536_v15 }
 0x2ce   : > { %2286 = vst.msk [vmem:[#allocation2 + $0x38] sm:$0xff] %vm6184_vm0, %v5533_v7 }
 0x2cf   : > { %6250 = vst [vmem:[#allocation10_spill] sm:$0xff] %v5552_v13  ;;  %v1865_v24 = vpop.xlane.xlu0 %1864  ;;  %v1867_v27 = vpop.xlane.xlu1 %1866 }
 0x2d0   : > { %v5559_v2 = vmax.f32 %v5552_v13, %v1865_v24  ;;  %v1869_v56 = vpop.xlane.xlu2 %1868  ;;  %v5562_v22 = vmax.f32 %v5554_v3, %v1867_v27 }
 0x2d1   : > { %v5565_v48 = vmax.f32 %v5556_v63, %v1869_v56  ;;  %v5582_v56 = vld [vmem:[#allocation2 + $0x60] sm:$0xff] }
 0x2d2   : > { %6253 = vst [vmem:[#allocation13_spill] sm:$0xff] %v5559_v2  ;;  %1969 = vperm.xlu2 %3421, %v5507_v16   ;;  %1984 = vperm.xlu1 %3420, %v5536_v15   ;;  %v2183_v15 = vld [vmem:[#allocation4] sm:$0xff] }
 0x2d3   : > { %6254 = vst [vmem:[#allocation14_spill] sm:$0xff] %v5562_v22  ;;  %1989 = vperm.xlu0 %3422, %v5559_v2  }
 0x2d4   : > { %6255 = vst [vmem:[#allocation15_spill] sm:$0xff] %v5565_v48 }
 0x2d5   : > { %2288 = vst.msk [vmem:[#allocation2 + $0x48] sm:$0xff] %vm6184_vm0, %v5559_v2 }
 0x2d6   : > { %2290 = vst.msk [vmem:[#allocation2 + $0x58] sm:$0xff] %vm6184_vm0, %v5565_v48 }
 0x2d7   : > { %2289 = vst.msk [vmem:[#allocation2 + $0x50] sm:$0xff] %vm6184_vm0, %v5562_v22  ;;  %v1871_v46 = vpop.xlane.xlu0 %1870  ;;  %v1873_v13 = vpop.xlane.xlu1 %1872 }
 0x2d8   : > { %6256 = vst [vmem:[#allocation16_spill] sm:$0xff] %v5582_v56  ;;  %v5589_v24 = vmax.f32 %v5582_v56, %v1871_v46  ;;  %v1875_v2 = vpop.xlane.xlu2 %1874  ;;  %v5592_v27 = vmax.f32 %v5584_v29, %v1873_v13  ;;  %v2184_v56 = vld [vmem:[#allocation4 + $0x8] sm:$0xff] }
 0x2d9   : > { %v5595_v63 = vmax.f32 %v5586_v31, %v1875_v2  ;;  %v5612_v2 = vld [vmem:[#allocation2 + $0x78] sm:$0xff] }
 0x2da   : > { %6259 = vst [vmem:[#allocation19_spill] sm:$0xff] %v5589_v24  ;;  %1979 = vperm.xlu2 %3421, %v5533_v7   ;;  %1999 = vperm.xlu1 %3420, %v5565_v48  }
 0x2db   : > { %6260 = vst [vmem:[#allocation20_spill] sm:$0xff] %v5592_v27  ;;  %2004 = vperm.xlu0 %3422, %v5589_v24  }
 0x2dc   : > { %6261 = vst [vmem:[#allocation21_spill] sm:$0xff] %v5595_v63 }
 0x2dd   : > { %2291 = vst.msk [vmem:[#allocation2 + $0x60] sm:$0xff] %vm6184_vm0, %v5589_v24 }
 0x2de   : > { %2293 = vst.msk [vmem:[#allocation2 + $0x70] sm:$0xff] %vm6184_vm0, %v5595_v63 }
 0x2df   : > { %2292 = vst.msk [vmem:[#allocation2 + $0x68] sm:$0xff] %vm6184_vm0, %v5592_v27  ;;  %v1877_v58 = vpop.xlane.xlu0 %1876  ;;  %v2216_v48 = vpop.xlane.xlu1 %2215 }
 0x2e0   : > { %6262 = vst [vmem:[#allocation22_spill] sm:$0xff] %v5612_v2  ;;  %v5615_v3 = vmax.f32 %v5612_v2, %v1877_v58  ;;  %v2218_v46 = vpop.xlane.xlu2 %2217  ;;  %v2247_v24 = vadd.f32 %v2216_v48, %v2183_v15  ;;  %v2187_v48 = vld [vmem:[#allocation4 + $0x20] sm:$0xff]  ;;  %v2186_v15 = vld [vmem:[#allocation4 + $0x18] sm:$0xff]  ;;  %v2185_v2 = vld [vmem:[#allocation4 + $0x10] sm:$0xff] }
 0x2e1   : > { %v2248_v29 = vadd.f32 %v2218_v46, %v2184_v56 }
 0x2e2   : > { %6263 = vst [vmem:[#allocation23_spill] sm:$0xff] %v5615_v3  ;;  %1994 = vperm.xlu2 %3421, %v5562_v22   ;;  %2014 = vperm.xlu1 %3420, %v5595_v63  }
 0x2e3   : > { %2294 = vst.msk [vmem:[#allocation2 + $0x78] sm:$0xff] %vm6184_vm0, %v5615_v3  ;;  %2019 = vperm.xlu0 %3422, %v5615_v3  }
 0x2e4   : > { %2264 = vst.msk [vmem:[#allocation4 + $0x8] sm:$0xff] %vm6184_vm0, %v2248_v29  ;;  %v6264_v29 = vmov 0 }
 0x2e5   : > { %2263 = vst.msk [vmem:[#allocation4] sm:$0xff] %vm6184_vm0, %v2247_v24  ;;  %v6265_v29 = vsel %vm5640_vm13, 4294967295, %v6264_v29  ;;  %v2205_v24 = vsel %vm5640_vm13, 1.0, %v6268_v51 }
 0x2e7   : > { %v2222_v56 = vpop.xlane.xlu1 %2221  ;;  %v2220_v63 = vpop.xlane.xlu0 %2219 }
 0x2e8   : > { %v2224_v58 = vpop.xlane.xlu2 %2223  ;;  %v2250_v13 = vadd.f32 %v2222_v56, %v2186_v15  ;;  %v2249_v31 = vadd.f32 %v2220_v63, %v2185_v2  ;;  %v6266_v63 = vmov 0  ;;  %v2207_v2 = vsel %vm5682_vm1, 1.0, %v6268_v51 }
 0x2e9   : > { %v2251_v46 = vadd.f32 %v2224_v58, %v2187_v48  ;;  %v6267_v63 = vsel %vm5646_vm11, 4294967295, %v6266_v63  ;;  %vm6279_vm1 = vcmp.lt.s32.totalorder %v5330_v17, 8 }
 0x2ea   : > { %2009 = vperm.xlu2 %3421, %v5592_v27   ;;  %2266 = vst.msk [vmem:[#allocation4 + $0x18] sm:$0xff] %vm6184_vm0, %v2250_v13  ;;  %v2208_v13 = vsel %vm5676_vm6, 1.0, %v6268_v51  ;;  %vm6285_vm5 = vmmov %vm6279_vm1 }
 0x2eb   : > { %2267 = vst.msk [vmem:[#allocation4 + $0x20] sm:$0xff] %vm6184_vm0, %v2251_v46 }
 0x2ec   : > { %2265 = vst.msk [vmem:[#allocation4 + $0x10] sm:$0xff] %vm6184_vm0, %v2249_v31  ;;  %v2204_v31 = vsel %vm5646_vm11, 1.0, %v6268_v51  ;;  %vm5670_vm0 = vmand %vm1805_vm3, %vm6185_vm8  ;;  %vm6276_vm3 = vcmp.eq.s32.totalorder %v5294_v36, %v5208_v20  ;;  %vm6278_vm8 = vcmp.eq.s32.totalorder %v5304_v4, %v5208_v20 }
 0x2ed   : > { %v6271_v35 = vsel %vm5670_vm0, 4294967295, %v6270_v35  ;;  %v2206_v59 = vsel %vm5670_vm0, 1.0, %v6268_v51  ;;  %vm1808_vm4 = vmxor %vm6276_vm3, %vm3521_vm14 }
 0x2ee   : > { %vm1809_vm6 = vmxor %vm6278_vm8, %vm3521_vm14  ;;  %vm6290_vm8 = vnez %v6265_v29 }
 0x2ef   : > { %vm5709_vm13 = vmand %vm1808_vm4, %vm6279_vm1  ;;  %vm6297_vm4 = vcmp.eq.s32.totalorder %v5310_v41, %v5208_v20 }
 0x2f0   : > { %vm6282_vm3 = vmmov %vm6279_vm1  ;;  %v2209_v4 = vsel %vm5709_vm13, 1.0, %v6268_v51 }
 0x2f1   : > { %vm5715_vm0 = vmand %vm1810_vm12, %vm6282_vm3  ;;  %vm6298_vm3 = vcmp.eq.s32.totalorder %v5290_v5, %v5208_v20 }
 0x2f2   : > { %vm5721_vm11 = vmand %vm1809_vm6, %vm6285_vm5  ;;  %v2211_v58 = vsel %vm5715_vm0, 1.0, %v6268_v51 }
 0x2f3   : > { %v2210_v15 = vsel %vm5721_vm11, 1.0, %v6268_v51  ;;  %vm1812_vm12 = vmxor %vm6297_vm4, %vm3521_vm14 }
 0x2f4   : > { %vm1813_vm5 = vmxor %vm6298_vm3, %vm3521_vm14 }
 0x30c   : > { %2227 = vadd.xlane.f32.xlu1 %v2205_v24 }
 0x30d   : > { %2225 = vadd.xlane.f32.xlu0 %v2204_v31 }
 0x313   : > { %2229 = vadd.xlane.f32.xlu2 %v2206_v59 }
 0x314   : > { %2233 = vadd.xlane.f32.xlu1 %v2208_v13 }
 0x315   : > { %2231 = vadd.xlane.f32.xlu0 %v2207_v2 }
 0x31b   : > { %2235 = vadd.xlane.f32.xlu2 %v2209_v4 }
 0x31c   : > { %v1950_v56 = vpop.permute.xlu2 %1949  ;;  %2239 = vadd.xlane.f32.xlu1 %v2211_v58 }
 0x31d   : > { %v2023_v46 = vsub.f32 %v5324_v34, %v1950_v56  ;;  %2237 = vadd.xlane.f32.xlu0 %v2210_v15 }
 0x31f   : > { %v2040_v24 = vmul.f32 1.442695, %v2023_v46 }
 0x321   : > { %3423 = vpow2.f32 %v2040_v24 }
 0x324   : > { %v1960_v31 = vpop.permute.xlu2 %1959 }
 0x325   : > { %v2025_v58 = vsub.f32 %v5341_v25, %v1960_v31 }
 0x327   : > { %v3424_v59 = vpop.eup %3423  ;;  %v2044_v15 = vmul.f32 1.442695, %v2025_v58 }
 0x328   : > { %v2071_v13 = vsel %vm5413_vm9, %v3424_v59, 0.0  ;;  %vm6291_vm9 = vnez %v6275_v0 }
 0x329   : > { %2120 = vadd.xlane.f32.xlu1 %v2071_v13 }
 0x32c   : > { %v1945_v2 = vpop.permute.xlu1 %1944  ;;  %v1970_v3 = vpop.permute.xlu2 %1969 }
 0x32d   : > { %v2022_v27 = vsub.f32 %v5316_v19, %v1945_v2  ;;  %v1955_v22 = vpop.permute.xlu0 %1954  ;;  %v2027_v24 = vsub.f32 %v5322_v9, %v1970_v3 }
 0x32e   : > { %v2024_v4 = vsub.f32 %v5332_v33, %v1955_v22 }
 0x32f   : > { %v2038_v62 = vmul.f32 1.442695, %v2022_v27 }
 0x330   : > { %v2042_v34 = vmul.f32 1.442695, %v2024_v4 }
 0x331   : > { %3425 = vpow2.f32 %v2038_v62  ;;  %v2048_v62 = vmul.f32 1.442695, %v2027_v24 }
 0x332   : > { %3427 = vpow2.f32 %v2042_v34 }
 0x333   : > { %3429 = vpow2.f32 %v2044_v15 }
 0x334   : > { %v1965_v56 = vpop.permute.xlu1 %1964  ;;  %v1980_v46 = vpop.permute.xlu2 %1979 }
 0x335   : > { %v2026_v32 = vsub.f32 %v5314_v40, %v1965_v56  ;;  %v2029_v2 = vsub.f32 %v5345_v11, %v1980_v46 }
 0x337   : > { %v3426_v59 = vpop.eup %3425  ;;  %v2046_v13 = vmul.f32 1.442695, %v2026_v32  ;;  %v2052_v27 = vmul.f32 1.442695, %v2029_v2 }
 0x338   : > { %v2070_v33 = vsel %vm5407_vm7, %v3426_v59, 0.0  ;;  %v3428_v25 = vpop.eup %3427  ;;  %vm6289_vm7 = vnez %v6271_v35 }
 0x339   : > { %3431 = vpow2.f32 %v2046_v13  ;;  %2118 = vadd.xlane.f32.xlu2 %v2070_v33  ;;  %v2072_v22 = vsel %vm5446_vm15, %v3428_v25, 0.0  ;;  %v3430_v9 = vpop.eup %3429  ;;  %vm6292_vm15 = vnez %v6273_v18 }
 0x33a   : > { %2122 = vadd.xlane.f32.xlu0 %v2072_v22  ;;  %3433 = vpow2.f32 %v2048_v62  ;;  %v2073_v58 = vsel %vm5440_vm10, %v3430_v9, 0.0  ;;  %vm6288_vm10 = vnez %v6267_v63 }
 0x33b   : > { %3435 = vpow2.f32 %v2052_v27 }
 0x33c   : > { %v1995_v40 = vpop.permute.xlu2 %1994  ;;  %v1975_v31 = vpop.permute.xlu1 %1974 }
 0x33d   : > { %v2028_v3 = vsub.f32 %v5337_v8, %v1975_v31  ;;  %v2032_v11 = vsub.f32 %v5339_v12, %v1995_v40 }
 0x33f   : > { %v3432_v4 = vpop.eup %3431  ;;  %v2050_v49 = vmul.f32 1.442695, %v2028_v3  ;;  %v2058_v34 = vmul.f32 1.442695, %v2032_v11 }
 0x340   : > { %v2074_v44 = vsel %vm5452_vm2, %v3432_v4, 0.0  ;;  %v3434_v15 = vpop.eup %3433  ;;  %vm6293_vm2 = vcmp.eq.s32.totalorder %v5302_v55, %v5208_v20 }
 0x341   : > { %2124 = vadd.xlane.f32.xlu2 %v2073_v58  ;;  %2126 = vadd.xlane.f32.xlu1 %v2074_v44  ;;  %3437 = vpow2.f32 %v2050_v49  ;;  %v3436_v8 = vpop.eup %3435  ;;  %v2075_v2 = vsel %vm6288_vm10, %v3434_v15, 0.0  ;;  %vm1811_vm6 = vmxor %vm6293_vm2, %vm3521_vm14  ;;  %vm6301_vm14 = vcmask 7168  }
 0x342   : > { %3439 = vpow2.f32 %v2058_v34  ;;  %v2077_v33 = vsel %vm6289_vm7, %v3436_v8, 0.0  ;;  %v2188_v8 = vld [vmem:[#allocation4 + $0x28] sm:$0xff] }
 0x344   : > { %v2010_v56 = vpop.permute.xlu2 %2009  ;;  %v1985_v46 = vpop.permute.xlu1 %1984 }
 0x345   : > { %v2030_v32 = vsub.f32 %v5318_v60, %v1985_v46  ;;  %v1990_v24 = vpop.permute.xlu0 %1989  ;;  %v2035_v53 = vsub.f32 %v5334_v47, %v2010_v56  ;;  %v2189_v46 = vld [vmem:[#allocation4 + $0x30] sm:$0xff] }
 0x346   : > { %v2031_v12 = vsub.f32 %v5326_v57, %v1990_v24 }
 0x347   : > { %v2054_v59 = vmul.f32 1.442695, %v2030_v32  ;;  %v3438_v13 = vpop.eup %3437  ;;  %v2064_v57 = vmul.f32 1.442695, %v2035_v53 }
 0x348   : > { %v2056_v43 = vmul.f32 1.442695, %v2031_v12  ;;  %v2076_v60 = vsel %vm6290_vm8, %v3438_v13, 0.0  ;;  %v3440_v47 = vpop.eup %3439  ;;  %v2192_v13 = vld [vmem:[#allocation4 + $0x48] sm:$0xff] }
 0x349   : > { %2128 = vadd.xlane.f32.xlu2 %v2075_v2  ;;  %2132 = vadd.xlane.f32.xlu1 %v2077_v33  ;;  %3441 = vpow2.f32 %v2054_v59  ;;  %v2080_v31 = vsel %vm5709_vm13, %v3440_v47, 0.0  ;;  %vm6294_vm13 = vmmov %vm6279_vm1  ;;  %v2190_v59 = vld [vmem:[#allocation4 + $0x38] sm:$0xff]  ;;  %v2191_v2 = vld [vmem:[#allocation4 + $0x40] sm:$0xff] }
 0x34a   : > { %2130 = vadd.xlane.f32.xlu0 %v2076_v60  ;;  %3443 = vpow2.f32 %v2056_v43  ;;  %vm5777_vm1 = vmand %vm1811_vm6, %vm6294_vm13  ;;  %v2193_v47 = vld [vmem:[#allocation4 + $0x50] sm:$0xff] }
 0x34b   : > { %3445 = vpow2.f32 %v2064_v57  ;;  %v2212_v5 = vsel %vm5777_vm1, 1.0, %v6268_v51 }
 0x34c   : > { %v2000_v25 = vpop.permute.xlu1 %1999 }
 0x34d   : > { %v2033_v62 = vsub.f32 %v5347_v26, %v2000_v25  ;;  %v2005_v22 = vpop.permute.xlu0 %2004 }
 0x34e   : > { %v2034_v63 = vsub.f32 %v5320_v50, %v2005_v22  ;;  %v6306_v22 = vsub.f32 %v5494_v37, %v5501_v39  ;;  %v6310_v39 = vsub.f32 %v5467_v23, %v5475_v6  ;;  %v2088_v6 = vld [vmem:[#allocation3 + $0x10] sm:$0xff] }
 0x34f   : > { %v2060_v27 = vmul.f32 1.442695, %v2033_v62  ;;  %v3442_v35 = vpop.eup %3441  ;;  %v2195_v62 = vld [vmem:[#allocation4 + $0x60] sm:$0xff] }
 0x350   : > { %v2062_v40 = vmul.f32 1.442695, %v2034_v63  ;;  %v3444_v29 = vpop.eup %3443  ;;  %v2078_v9 = vsel %vm6291_vm9, %v3442_v35, 0.0  ;;  %v1912_v63 = vmul.f32 1.442695, %v6306_v22  ;;  %v2194_v35 = vld [vmem:[#allocation4 + $0x58] sm:$0xff] }
 0x351   : > { %3447 = vpow2.f32 %v2060_v27  ;;  %2138 = vadd.xlane.f32.xlu1 %v2080_v31  ;;  %2134 = vadd.xlane.f32.xlu2 %v2078_v9  ;;  %v2079_v26 = vsel %vm6292_vm15, %v3444_v29, 0.0  ;;  %v3446_v48 = vpop.eup %3445  ;;  %v1910_v0 = vmul.f32 1.442695, %v6310_v39  ;;  %v6332_v39 = vld [vmem:[#allocation17_spill] sm:$0xff] }
 0x352   : > { %3449 = vpow2.f32 %v2062_v40  ;;  %2136 = vadd.xlane.f32.xlu0 %v2079_v26  ;;  %v2083_v55 = vsel %vm5777_vm1, %v3446_v48, 0.0  ;;  %v2087_v48 = vld [vmem:[#allocation3 + $0x8] sm:$0xff] }
 0x354   : > { %v2015_v50 = vpop.permute.xlu1 %2014 }
 0x355   : > { %v2036_v3 = vsub.f32 %v5343_v61, %v2015_v50  ;;  %v2020_v4 = vpop.permute.xlu0 %2019 }
 0x356   : > { %v2037_v18 = vsub.f32 %v5349_v42, %v2020_v4 }
 0x357   : > { %v3448_v11 = vpop.eup %3447  ;;  %v2066_v49 = vmul.f32 1.442695, %v2036_v3 }
 0x358   : > { %v3450_v58 = vpop.eup %3449  ;;  %v2068_v44 = vmul.f32 1.442695, %v2037_v18  ;;  %v2081_v34 = vsel %vm5721_vm11, %v3448_v11, 0.0  ;;  %vm6299_vm11 = vmmov %vm6294_vm13  ;;  %v6312_v18 = vsub.f32 %v5465_v21, %v5472_v54  ;;  %v6315_v21 = vsub.f32 %v5498_v28, %v5507_v16 }
 0x359   : > { %3451 = vpow2.f32 %v2066_v49  ;;  %2144 = vadd.xlane.f32.xlu1 %v2083_v55  ;;  %v2082_v61 = vsel %vm5715_vm0, %v3450_v58, 0.0  ;;  %2140 = vadd.xlane.f32.xlu2 %v2081_v34  ;;  %vm1828_vm10 = vmand %vm1812_vm12, %vm6299_vm11  ;;  %v6313_v49 = vsub.f32 %v5469_v45, %v5478_v14  ;;  %v6316_v45 = vsub.f32 %v5525_v30, %v5533_v7 }
 0x35a   : > { %3453 = vpow2.f32 %v2068_v44  ;;  %2142 = vadd.xlane.f32.xlu0 %v2082_v61  ;;  %vm6300_vm7 = vmmov %vm6299_vm11  ;;  %v2213_v56 = vsel %vm1828_vm10, 1.0, %v6268_v51  ;;  %v1914_v11 = vmul.f32 1.442695, %v6312_v18  ;;  %v6314_v44 = vsub.f32 %v5496_v52, %v5504_v1  ;;  %v2086_v61 = vld [vmem:[#allocation3] sm:$0xff] }
 0x35b   : > { %vm1829_vm8 = vmand %vm1813_vm5, %vm6300_vm7  ;;  %3455 = vpow2.f32 %v1912_v63  ;;  %v1918_v58 = vmul.f32 1.442695, %v6313_v49  ;;  %v1920_v54 = vmul.f32 1.442695, %v6315_v21  ;;  %v1924_v14 = vmul.f32 1.442695, %v6316_v45 }
 0x35c   : > { %v2214_v42 = vsel %vm1829_vm8, 1.0, %v6268_v51  ;;  %vm6302_vm0 = vmmov %vm6301_vm14  ;;  %3457 = vpow2.f32 %v1910_v0  ;;  %v1916_v55 = vmul.f32 1.442695, %v6314_v44  ;;  %v6333_v0 = vld [vmem:[#allocation20_spill] sm:$0xff]  ;;  %v6336_v44 = vld [vmem:[#allocation15_spill] sm:$0xff] }
 0x35d   : > { %vm6303_vm9 = vmmov %vm6302_vm0  ;;  %3459 = vpow2.f32 %v1914_v11  ;;  %v6334_v18 = vsub.f32 %v6332_v39, %v6333_v0  ;;  %v2096_v21 = vld [vmem:[#allocation3 + $0x50] sm:$0xff]  ;;  %v2095_v45 = vld [vmem:[#allocation3 + $0x48] sm:$0xff] }
 0x35e   : > { %vm6304_vm15 = vmmov %vm6302_vm0  ;;  %3461 = vpow2.f32 %v1918_v58  ;;  %v6335_v58 = vld [vmem:[#allocation12_spill] sm:$0xff] }
 0x35f   : > { %v3452_v36 = vpop.eup %3451  ;;  %vm6305_vm2 = vmmov %vm6302_vm0  ;;  %3463 = vpow2.f32 %v1916_v55  ;;  %v1936_v11 = vmul.f32 1.442695, %v6334_v18  ;;  %v6337_v55 = vsub.f32 %v6335_v58, %v6336_v44 }
 0x360   : > { %v3454_v38 = vpop.eup %3453  ;;  %v2084_v41 = vsel %vm1828_vm10, %v3452_v36, 0.0  ;;  %vm6307_vm6 = vmmov %vm6302_vm0  ;;  %3465 = vpow2.f32 %v1920_v54 }
 0x361   : > { %v2085_v15 = vsel %vm1829_vm8, %v3454_v38, 0.0  ;;  %2245 = vadd.xlane.f32.xlu1 %v2214_v42  ;;  %2146 = vadd.xlane.f32.xlu2 %v2084_v41  ;;  %vm6308_vm13 = vmmov %vm6302_vm0  ;;  %v3456_v50 = vpop.eup %3455  ;;  %3467 = vpow2.f32 %v1924_v14 }
 0x362   : > { %2148 = vadd.xlane.f32.xlu0 %v2085_v15  ;;  %vm6309_vm1 = vmmov %vm6302_vm0  ;;  %v2103_v3 = vmul.f32 %v3456_v50, %v2087_v48  ;;  %v3458_v34 = vpop.eup %3457  ;;  %v6317_v15 = vld [vmem:[#allocation8_spill] sm:$0xff] }
 0x363   : > { %vm6311_vm4 = vmmov %vm6302_vm0  ;;  %v3460_v23 = vpop.eup %3459  ;;  %v2102_v42 = vmul.f32 %v3458_v34, %v2086_v61  ;;  %v1932_v34 = vmul.f32 1.442695, %v6337_v55 }
 0x364   : > { %v2104_v41 = vmul.f32 %v3460_v23, %v2088_v6  ;;  %v3462_v1 = vpop.eup %3461  ;;  %vm6319_vm12 = vmmov %vm6302_vm0  ;;  %v6339_v23 = vld [vmem:[#allocation16_spill] sm:$0xff]  ;;  %v6340_v6 = vld [vmem:[#allocation19_spill] sm:$0xff] }
 0x365   : > { %vm6320_vm3 = vmmov %vm6302_vm0 }
 0x366   : > { %vm6327_vm5 = vmmov %vm6302_vm0 }
 0x367   : > { %vm6331_vm11 = vmmov %vm6302_vm0 }
 0x368   : > { %vm6338_vm10 = vmmov %vm6302_vm0 }
 0x369   : > { %2241 = vadd.xlane.f32.xlu2 %v2212_v5  ;;  %v6318_v5 = vsub.f32 %v5523_v10, %v6317_v15  ;;  %v6322_v10 = vld [vmem:[#allocation14_spill] sm:$0xff]  ;;  %vm6342_vm7 = vmmov %vm6302_vm0 }
 0x36a   : > { %2243 = vadd.xlane.f32.xlu0 %v2213_v56  ;;  %vm6343_vm8 = vmmov %vm6302_vm0 }
 0x36b   : > { %v1922_v56 = vmul.f32 1.442695, %v6318_v5 }
 0x36d   : > { %3469 = vpow2.f32 %v1922_v56 }
 0x37f   : > { %v2228_v32 = vpop.xlane.xlu1 %2227 }
 0x380   : > { %v2253_v24 = vadd.f32 %v2228_v32, %v2189_v46  ;;  %v2226_v12 = vpop.xlane.xlu0 %2225  ;;  %v2089_v32 = vld [vmem:[#allocation3 + $0x18] sm:$0xff] }
 0x381   : > { %v2252_v53 = vadd.f32 %v2226_v12, %v2188_v8  ;;  %v3464_v8 = vpop.eup %3463 }
 0x382   : > { %2269 = vst.msk [vmem:[#allocation4 + $0x30] sm:$0xff] %vm6301_vm14, %v2253_v24  ;;  %v2090_v24 = vld [vmem:[#allocation3 + $0x20] sm:$0xff]  ;;  %v2105_v28 = vmul.f32 %v3464_v8, %v2089_v32  ;;  %v6344_v32 = vld [vmem:[#allocation18_spill] sm:$0xff]  ;;  %vm6347_vm14 = vmmov %vm6302_vm0 }
 0x383   : > { %2268 = vst.msk [vmem:[#allocation4 + $0x28] sm:$0xff] %vm6302_vm0, %v2252_v53  ;;  %v2106_v16 = vmul.f32 %v3462_v1, %v2090_v24  ;;  %v6345_v24 = vld [vmem:[#allocation21_spill] sm:$0xff] }
 0x386   : > { %v2230_v43 = vpop.xlane.xlu2 %2229 }
 0x387   : > { %v2234_v33 = vpop.xlane.xlu1 %2233  ;;  %v2254_v60 = vadd.f32 %v2230_v43, %v2190_v59  ;;  %v6321_v59 = vld [vmem:[#allocation11_spill] sm:$0xff] }
 0x388   : > { %v2256_v57 = vadd.f32 %v2234_v33, %v2192_v13  ;;  %v2232_v51 = vpop.xlane.xlu0 %2231  ;;  %v6323_v13 = vsub.f32 %v6321_v59, %v6322_v10  ;;  %v6324_v33 = vld [vmem:[#allocation7_spill] sm:$0xff] }
 0x389   : > { %2270 = vst.msk [vmem:[#allocation4 + $0x38] sm:$0xff] %vm6303_vm9, %v2254_v60  ;;  %v2255_v25 = vadd.f32 %v2232_v51, %v2191_v2  ;;  %v3466_v2 = vpop.eup %3465  ;;  %v6325_v60 = vld [vmem:[#allocation9_spill] sm:$0xff]  ;;  %vm6351_vm9 = vmmov %vm6302_vm0 }
 0x38a   : > { %2272 = vst.msk [vmem:[#allocation4 + $0x48] sm:$0xff] %vm6304_vm15, %v2256_v57  ;;  %v1930_v43 = vmul.f32 1.442695, %v6323_v13  ;;  %v6326_v57 = vsub.f32 %v6324_v33, %v6325_v60  ;;  %v2099_v13 = vld [vmem:[#allocation3 + $0x68] sm:$0xff]  ;;  %v2098_v60 = vld [vmem:[#allocation3 + $0x60] sm:$0xff]  ;;  %vm6352_vm15 = vmmov %vm6302_vm0 }
 0x38b   : > { %2271 = vst.msk [vmem:[#allocation4 + $0x40] sm:$0xff] %vm6305_vm2, %v2255_v25  ;;  %v3468_v25 = vpop.eup %3467  ;;  %vm6353_vm2 = vmmov %vm6302_vm0 }
 0x38c   : > { %v1926_v51 = vmul.f32 1.442695, %v6326_v57  ;;  %3471 = vpow2.f32 %v1930_v43 }
 0x38e   : > { %v2236_v27 = vpop.xlane.xlu2 %2235  ;;  %3473 = vpow2.f32 %v1926_v51 }
 0x38f   : > { %v2240_v40 = vpop.xlane.xlu1 %2239  ;;  %v2257_v31 = vadd.f32 %v2236_v27, %v2193_v47  ;;  %v6328_v47 = vld [vmem:[#allocation10_spill] sm:$0xff] }
 0x390   : > { %v2259_v29 = vadd.f32 %v2240_v40, %v2195_v62  ;;  %v2238_v9 = vpop.xlane.xlu0 %2237  ;;  %v6329_v62 = vld [vmem:[#allocation13_spill] sm:$0xff]  ;;  %v2091_v27 = vld [vmem:[#allocation3 + $0x28] sm:$0xff]  ;;  %v3470_v40 = vpop.eup %3469 }
 0x391   : > { %2273 = vst.msk [vmem:[#allocation4 + $0x50] sm:$0xff] %vm6307_vm6, %v2257_v31  ;;  %v2258_v26 = vadd.f32 %v2238_v9, %v2194_v35  ;;  %v6330_v22 = vsub.f32 %v6328_v47, %v6329_v62  ;;  %v2093_v35 = vld [vmem:[#allocation3 + $0x38] sm:$0xff]  ;;  %v2092_v31 = vld [vmem:[#allocation3 + $0x30] sm:$0xff]  ;;  %vm6354_vm6 = vmmov %vm6302_vm0 }
 0x392   : > { %2275 = vst.msk [vmem:[#allocation4 + $0x60] sm:$0xff] %vm6308_vm13, %v2259_v29  ;;  %v2107_v29 = vmul.f32 %v3466_v2, %v2091_v27  ;;  %v2109_v9 = vmul.f32 %v3468_v25, %v2093_v35  ;;  %v2108_v48 = vmul.f32 %v3470_v40, %v2092_v31  ;;  %v3472_v61 = vpop.eup %3471  ;;  %v2097_v2 = vld [vmem:[#allocation3 + $0x58] sm:$0xff]  ;;  %v2100_v31 = vld [vmem:[#allocation3 + $0x70] sm:$0xff]  ;;  %vm6355_vm13 = vmmov %vm6302_vm0 }
 0x393   : > { %2274 = vst.msk [vmem:[#allocation4 + $0x58] sm:$0xff] %vm6309_vm1, %v2258_v26  ;;  %v1928_v63 = vmul.f32 1.442695, %v6330_v22  ;;  %v2112_v14 = vmul.f32 %v3472_v61, %v2096_v21  ;;  %vm6356_vm1 = vmmov %vm6302_vm0 }
 0x394   : > { %v3474_v54 = vpop.eup %3473 }
 0x395   : > { %3475 = vpow2.f32 %v1928_v63 }
 0x396   : > { %3477 = vpow2.f32 %v1936_v11  ;;  %v2196_v11 = vld [vmem:[#allocation4 + $0x68] sm:$0xff] }
 0x397   : > { %3479 = vpow2.f32 %v1932_v34 }
 0x39c   : > { %v2121_v4 = vpop.xlane.xlu1 %2120 }
 0x39d   : > { %v2151_v37 = vadd.f32 %v2121_v4, %v2103_v3 }
 0x39f   : > { %2168 = vst.msk [vmem:[#allocation3 + $0x8] sm:$0xff] %vm6311_vm4, %v2151_v37  ;;  %vm6357_vm4 = vmmov %vm6302_vm0 }
 0x3ac   : > { %v2119_v36 = vpop.xlane.xlu2 %2118 }
 0x3ad   : > { %v2150_v38 = vadd.f32 %v2119_v36, %v2102_v42  ;;  %v2123_v52 = vpop.xlane.xlu0 %2122  ;;  %v6341_v42 = vsub.f32 %v6339_v23, %v6340_v6 }
 0x3ae   : > { %v2152_v46 = vadd.f32 %v2123_v52, %v2104_v41  ;;  %v3476_v41 = vpop.eup %3475 }
 0x3af   : > { %2167 = vst.msk [vmem:[#allocation3] sm:$0xff] %vm6319_vm12, %v2150_v38  ;;  %v1934_v36 = vmul.f32 1.442695, %v6341_v42  ;;  %v2094_v38 = vld [vmem:[#allocation3 + $0x40] sm:$0xff]  ;;  %v2111_v56 = vmul.f32 %v3476_v41, %v2095_v45  ;;  %vm6358_vm12 = vmmov %vm6302_vm0 }
 0x3b0   : > { %2169 = vst.msk [vmem:[#allocation3 + $0x10] sm:$0xff] %vm6320_vm3, %v2152_v46  ;;  %v2110_v52 = vmul.f32 %v3474_v54, %v2094_v38  ;;  %vm6359_vm3 = vmmov %vm6302_vm0 }
 0x3b1   : > { %3481 = vpow2.f32 %v1934_v36 }
 0x3b4   : > { %v2125_v30 = vpop.xlane.xlu2 %2124  ;;  %v2127_v7 = vpop.xlane.xlu1 %2126 }
 0x3b5   : > { %v2153_v12 = vadd.f32 %v2125_v30, %v2105_v28  ;;  %v2154_v53 = vadd.f32 %v2127_v7, %v2106_v16  ;;  %v6346_v28 = vsub.f32 %v6344_v32, %v6345_v24  ;;  %v3478_v7 = vpop.eup %3477 }
 0x3b6   : > { %v3480_v43 = vpop.eup %3479  ;;  %v2115_v57 = vmul.f32 %v3478_v7, %v2099_v13 }
 0x3b7   : > { %2170 = vst.msk [vmem:[#allocation3 + $0x18] sm:$0xff] %vm6327_vm5, %v2153_v12  ;;  %v1938_v16 = vmul.f32 1.442695, %v6346_v28  ;;  %v6348_v12 = vld [vmem:[#allocation22_spill] sm:$0xff]  ;;  %v3482_v33 = vpop.eup %3481  ;;  %v2113_v51 = vmul.f32 %v3480_v43, %v2097_v2 }
 0x3b8   : > { %2171 = vst.msk [vmem:[#allocation3 + $0x20] sm:$0xff] %vm6331_vm11, %v2154_v53  ;;  %v6349_v53 = vld [vmem:[#allocation23_spill] sm:$0xff]  ;;  %v2114_v22 = vmul.f32 %v3482_v33, %v2098_v60 }
 0x3b9   : > { %v6350_v59 = vsub.f32 %v6348_v12, %v6349_v53  ;;  %3483 = vpow2.f32 %v1938_v16 }
 0x3bb   : > { %v1940_v10 = vmul.f32 1.442695, %v6350_v59 }
 0x3bc   : > { %v2129_v26 = vpop.xlane.xlu2 %2128  ;;  %v2133_v50 = vpop.xlane.xlu1 %2132 }
 0x3bd   : > { %v2155_v3 = vadd.f32 %v2129_v26, %v2107_v29  ;;  %v2157_v4 = vadd.f32 %v2133_v50, %v2109_v9  ;;  %v2131_v37 = vpop.xlane.xlu0 %2130  ;;  %3485 = vpow2.f32 %v1940_v10  ;;  %v2101_v9 = vld [vmem:[#allocation3 + $0x78] sm:$0xff] }
 0x3be   : > { %v2156_v49 = vadd.f32 %v2131_v37, %v2108_v48  ;;  %v2198_v26 = vld [vmem:[#allocation4 + $0x78] sm:$0xff] }
 0x3bf   : > { %2172 = vst.msk [vmem:[#allocation3 + $0x28] sm:$0xff] %vm6338_vm10, %v2155_v3  ;;  %v3484_v40 = vpop.eup %3483 }
 0x3c0   : > { %2174 = vst.msk [vmem:[#allocation3 + $0x38] sm:$0xff] %vm6342_vm7, %v2157_v4  ;;  %v2116_v50 = vmul.f32 %v3484_v40, %v2100_v31 }
 0x3c1   : > { %2173 = vst.msk [vmem:[#allocation3 + $0x30] sm:$0xff] %vm6343_vm8, %v2156_v49  ;;  %v2197_v49 = vld [vmem:[#allocation4 + $0x70] sm:$0xff] }
 0x3c3   : > { %v3486_v29 = vpop.eup %3485 }
 0x3c4   : > { %v2139_v1 = vpop.xlane.xlu1 %2138  ;;  %v2135_v15 = vpop.xlane.xlu2 %2134  ;;  %v2117_v4 = vmul.f32 %v3486_v29, %v2101_v9 }
 0x3c5   : > { %v2160_v5 = vadd.f32 %v2139_v1, %v2112_v14  ;;  %v2158_v46 = vadd.f32 %v2135_v15, %v2110_v52  ;;  %v2137_v8 = vpop.xlane.xlu0 %2136 }
 0x3c6   : > { %v2159_v30 = vadd.f32 %v2137_v8, %v2111_v56 }
 0x3c7   : > { %2177 = vst.msk [vmem:[#allocation3 + $0x50] sm:$0xff] %vm6347_vm14, %v2160_v5 }
 0x3c8   : > { %2175 = vst.msk [vmem:[#allocation3 + $0x40] sm:$0xff] %vm6302_vm0, %v2158_v46 }
 0x3c9   : > { %2176 = vst.msk [vmem:[#allocation3 + $0x48] sm:$0xff] %vm6351_vm9, %v2159_v30 }
 0x3cc   : > { %v2145_v25 = vpop.xlane.xlu1 %2144  ;;  %v2141_v47 = vpop.xlane.xlu2 %2140 }
 0x3cd   : > { %v2163_v62 = vadd.f32 %v2145_v25, %v2115_v57  ;;  %v2161_v63 = vadd.f32 %v2141_v47, %v2113_v51  ;;  %v2143_v27 = vpop.xlane.xlu0 %2142 }
 0x3ce   : > { %v2162_v35 = vadd.f32 %v2143_v27, %v2114_v22 }
 0x3cf   : > { %2180 = vst.msk [vmem:[#allocation3 + $0x68] sm:$0xff] %vm6352_vm15, %v2163_v62 }
 0x3d0   : > { %2178 = vst.msk [vmem:[#allocation3 + $0x58] sm:$0xff] %vm6353_vm2, %v2161_v63 }
 0x3d1   : > { %2179 = vst.msk [vmem:[#allocation3 + $0x60] sm:$0xff] %vm6354_vm6, %v2162_v35 }
 0x3d4   : > { %v2246_v48 = vpop.xlane.xlu1 %2245  ;;  %v2147_v3 = vpop.xlane.xlu2 %2146 }
 0x3d5   : > { %v2262_v37 = vadd.f32 %v2246_v48, %v2198_v26  ;;  %v2164_v39 = vadd.f32 %v2147_v3, %v2116_v50  ;;  %v2149_v0 = vpop.xlane.xlu0 %2148 }
 0x3d6   : > { %v2165_v18 = vadd.f32 %v2149_v0, %v2117_v4 }
 0x3d7   : > { %2278 = vst.msk [vmem:[#allocation4 + $0x78] sm:$0xff] %vm6355_vm13, %v2262_v37 }
 0x3d8   : > { %2181 = vst.msk [vmem:[#allocation3 + $0x70] sm:$0xff] %vm6356_vm1, %v2164_v39 }
 0x3d9   : > { %2182 = vst.msk [vmem:[#allocation3 + $0x78] sm:$0xff] %vm6357_vm4, %v2165_v18 }
 0x3dc   : > { %v2242_v58 = vpop.xlane.xlu2 %2241 }
 0x3dd   : > { %v2260_v44 = vadd.f32 %v2242_v58, %v2196_v11  ;;  %v2244_v55 = vpop.xlane.xlu0 %2243 }
 0x3de   : > { %v2261_v34 = vadd.f32 %v2244_v55, %v2197_v49 }
 0x3df   : > { %2276 = vst.msk [vmem:[#allocation4 + $0x68] sm:$0xff] %vm6358_vm12, %v2260_v44 }
 0x3e0   : > { %2277 = vst.msk [vmem:[#allocation4 + $0x70] sm:$0xff] %vm6359_vm3, %v2261_v34 }
 0x3e1 PF: > { %p3170_p6 = scmp.ne.s32.totalorder %s3508_s18, 1 }
 0x3e3   : > { %2298 = sbr.rel (%p3170_p6) target bundleno = 1273 (0x4f9), region = 48 }
 0x3e8   : > { %v2299_v61 = vld [vmem:[#allocation2] sm:$0xff]  ;;  %v3524_v6 = vmov 0   ;;  %v3525_v42 = vmov 0.0   ;;  %v6360_v38 = vld [vmem:[#allocation6_spill] sm:$0xff]  ;;  %vm6363_vm7 = vcmp.lt.s32.totalorder %v5330_v17, 8  ;;  %vm2875_vm14 = vcmask 7168  }
 0x3e9   : > { %v2475_v23 = vld [vmem:[#allocation4] sm:$0xff]  ;;  %3487 = vset.pattern.permute.xlu0 %v3524_v6  ;;  %2831 = vadd.xlane.f32.xlu2 %v3525_v42  ;;  %vm2715_vm5 = vcmp.ne.s32.totalorder %v6360_v38, %v5330_v17  ;;  %v2797_v15 = vld [vmem:[%s6165_s4 + $0x10] sm:$0xff]  ;;  %v2796_v56 = vld [vmem:[%s6165_s4 + $0x8] sm:$0xff] }
 0x3ea   : > { %2317 = vperm.xlu0 %3487, %v2299_v61   ;;  %v2491_v36 = vmul.f32 1e-05, %v2475_v23  ;;  %2829 = vadd.xlane.f32.xlu1 %v3525_v42  ;;  %v2459_v21 = vld [vmem:[#allocation3] sm:$0xff]  ;;  %v2798_v24 = vld [vmem:[%s6165_s4 + $0x18] sm:$0xff]  ;;  %v2800_v28 = vld [vmem:[%s6165_s4 + $0x28] sm:$0xff] }
 0x3eb   : > { %v6361_v41 = vld [vmem:[#allocation5_spill] sm:$0xff]  ;;  %v2801_v13 = vld [vmem:[%s6165_s4 + $0x30] sm:$0xff]  ;;  %v2802_v43 = vld [vmem:[%s6165_s4 + $0x38] sm:$0xff] }
 0x3ec   : > { %v2507_v54 = vadd.f32 %v2491_v36, %v2459_v21  ;;  %vm6362_vm11 = vcmp.eq.s32.totalorder %v6361_v41, %v5208_v20  ;;  %v2803_v63 = vld [vmem:[%s6165_s4 + $0x40] sm:$0xff]  ;;  %v2804_v27 = vld [vmem:[%s6165_s4 + $0x48] sm:$0xff]  ;;  %v2805_v26 = vld [vmem:[%s6165_s4 + $0x50] sm:$0xff] }
 0x3ed   : > { %vm2731_vm10 = vmand %vm6362_vm11, %vm2715_vm5  ;;  %v2806_v50 = vld [vmem:[%s6165_s4 + $0x58] sm:$0xff]  ;;  %v2807_v39 = vld [vmem:[%s6165_s4 + $0x60] sm:$0xff] }
 0x3ee   : > { %vm5902_vm8 = vmand %vm2731_vm10, %vm6363_vm7  ;;  %v2808_v0 = vld [vmem:[%s6165_s4 + $0x68] sm:$0xff]  ;;  %v2799_v44 = vld [vmem:[%s6165_s4 + $0x20] sm:$0xff] }
 0x3ef   : > { %v2908_v14 = vsel %vm5902_vm8, 1.0, %v3525_v42  ;;  %v2809_v34 = vld [vmem:[%s6165_s4 + $0x70] sm:$0xff]  ;;  %v2810_v61 = vld [vmem:[%s6165_s4 + $0x78] sm:$0xff]  ;;  %v2892_v45 = vld [vmem:[%s6166_s5] sm:$0xff] }
 0x3f0   : > { %v2894_v41 = vld [vmem:[%s6166_s5 + $0x10] sm:$0xff] }
 0x3f1   : > { %2833 = vadd.xlane.f32.xlu2 %v3525_v42 }
 0x3f2   : > { %2525 = vperm.xlu0 %3487, %v2507_v54   ;;  %2837 = vadd.xlane.f32.xlu1 %v3525_v42  ;;  %v2893_v54 = vld [vmem:[%s6166_s5 + $0x8] sm:$0xff] }
 0x3f9   : > { %2839 = vadd.xlane.f32.xlu2 %v3525_v42 }
 0x3fa   : > { %2841 = vadd.xlane.f32.xlu1 %v3525_v42 }
 0x401   : > { %2843 = vadd.xlane.f32.xlu2 %v3525_v42 }
 0x402   : > { %2845 = vadd.xlane.f32.xlu1 %v3525_v42 }
 0x409   : > { %2847 = vadd.xlane.f32.xlu2 %v3525_v42 }
 0x40a   : > { %2849 = vadd.xlane.f32.xlu1 %v3525_v42 }
 0x411   : > { %2851 = vadd.xlane.f32.xlu2 %v3525_v42 }
 0x412   : > { %2853 = vadd.xlane.f32.xlu1 %v3525_v42 }
 0x419   : > { %2855 = vadd.xlane.f32.xlu2 %v3525_v42 }
 0x41a   : > { %2857 = vadd.xlane.f32.xlu1 %v3525_v42 }
 0x41c   : > { %2835 = vadd.xlane.f32.xlu0 %v3525_v42 }
 0x421   : > { %2924 = vadd.xlane.f32.xlu2 %v2908_v14 }
 0x422   : > { %2928 = vadd.xlane.f32.xlu1 %v3525_v42 }
 0x424   : > { %2926 = vadd.xlane.f32.xlu0 %v3525_v42 }
 0x429   : > { %2930 = vadd.xlane.f32.xlu2 %v3525_v42 }
 0x42a   : > { %2934 = vadd.xlane.f32.xlu1 %v3525_v42 }
 0x42c   : > { %2932 = vadd.xlane.f32.xlu0 %v3525_v42 }
 0x431   : > { %2936 = vadd.xlane.f32.xlu2 %v3525_v42 }
 0x432   : > { %2940 = vadd.xlane.f32.xlu1 %v3525_v42 }
 0x434   : > { %2938 = vadd.xlane.f32.xlu0 %v3525_v42 }
 0x439   : > { %2942 = vadd.xlane.f32.xlu2 %v3525_v42 }
 0x43a   : > { %2946 = vadd.xlane.f32.xlu1 %v3525_v42 }
 0x43c   : > { %2944 = vadd.xlane.f32.xlu0 %v3525_v42 }
 0x441   : > { %2948 = vadd.xlane.f32.xlu2 %v3525_v42 }
 0x444   : > { %2950 = vadd.xlane.f32.xlu0 %v3525_v42 }
 0x449   : > { %2954 = vadd.xlane.f32.xlu2 %v3525_v42 }
 0x45c   : > { %v2318_v20 = vpop.permute.xlu0 %2317  ;;  %v2832_v1 = vpop.xlane.xlu2 %2831 }
 0x45d   : > { %v2395_v17 = vsub.f32 %v5316_v19, %v2318_v20  ;;  %v2830_v5 = vpop.xlane.xlu1 %2829  ;;  %v2861_v46 = vadd.f32 %v2832_v1, %v2797_v15  ;;  %v2896_v15 = vld [vmem:[%s6166_s5 + $0x20] sm:$0xff] }
 0x45e   : > { %v2860_v8 = vadd.f32 %v2830_v5, %v2796_v56  ;;  %v2897_v56 = vld [vmem:[%s6166_s5 + $0x28] sm:$0xff] }
 0x45f   : > { %v2411_v52 = vmul.f32 1.442695, %v2395_v17  ;;  %2878 = vst.msk [vmem:[%s6165_s4 + $0x10] sm:$0xff] %vm2875_vm14, %v2861_v46  ;;  %v2895_v46 = vld [vmem:[%s6166_s5 + $0x18] sm:$0xff] }
 0x460   : > { %2877 = vst.msk [vmem:[%s6165_s4 + $0x8] sm:$0xff] %vm2875_vm14, %v2860_v8 }
 0x461   : > { %3488 = vpow2.f32 %v2411_v52 }
 0x464   : > { %v2526_v16 = vpop.permute.xlu0 %2525  ;;  %v2834_v7 = vpop.xlane.xlu2 %2833 }
 0x465   : > { %v2838_v12 = vpop.xlane.xlu1 %2837  ;;  %v2862_v53 = vadd.f32 %v2834_v7, %v2798_v24  ;;  %v2900_v7 = vld [vmem:[%s6166_s5 + $0x40] sm:$0xff] }
 0x466   : > { %v2864_v59 = vadd.f32 %v2838_v12, %v2800_v28  ;;  %v2898_v12 = vld [vmem:[%s6166_s5 + $0x30] sm:$0xff] }
 0x467   : > { %v3489_v19 = vpop.eup %3488  ;;  %2879 = vst.msk [vmem:[%s6165_s4 + $0x18] sm:$0xff] %vm2875_vm14, %v2862_v53 }
 0x468   : > { %v2443_v32 = vadd.f32 1e-05, %v3489_v19  ;;  %2881 = vst.msk [vmem:[%s6165_s4 + $0x28] sm:$0xff] %vm2875_vm14, %v2864_v59 }
 0x46a   : > { %v2603_v30 = vadd.f32 %v2526_v16, %v2443_v32  ;;  %3490 = vlog2.f32 %v2443_v32  ;;  %v2899_v16 = vld [vmem:[%s6166_s5 + $0x38] sm:$0xff] }
 0x46c   : > { %v2619_v10 = vadd.f32 1e-05, %v2603_v30  ;;  %v2840_v33 = vpop.xlane.xlu2 %2839 }
 0x46d   : > { %v2842_v60 = vpop.xlane.xlu1 %2841  ;;  %v2865_v57 = vadd.f32 %v2840_v33, %v2801_v13  ;;  %v2901_v33 = vld [vmem:[%s6166_s5 + $0x48] sm:$0xff] }
 0x46e   : > { %3492 = vlog2.f32 %v2619_v10  ;;  %v2866_v51 = vadd.f32 %v2842_v60, %v2802_v43 }
 0x46f   : > { %2882 = vst.msk [vmem:[%s6165_s4 + $0x30] sm:$0xff] %vm2875_vm14, %v2865_v57 }
 0x470   : > { %v3491_v2 = vpop.eup %3490  ;;  %2883 = vst.msk [vmem:[%s6165_s4 + $0x38] sm:$0xff] %vm2875_vm14, %v2866_v51 }
 0x471   : > { %v2668_v62 = vmul.f32 0.6931472, %v3491_v2  ;;  %v2903_v2 = vld [vmem:[%s6166_s5 + $0x58] sm:$0xff] }
 0x474   : > { %v3493_v25 = vpop.eup %3492  ;;  %v2844_v40 = vpop.xlane.xlu2 %2843 }
 0x475   : > { %v2636_v47 = vmul.f32 0.6931472, %v3493_v25  ;;  %v2846_v31 = vpop.xlane.xlu1 %2845  ;;  %v2867_v29 = vadd.f32 %v2844_v40, %v2803_v63  ;;  %v2902_v63 = vld [vmem:[%s6166_s5 + $0x50] sm:$0xff]  ;;  %v2907_v40 = vld [vmem:[%s6166_s5 + $0x78] sm:$0xff] }
 0x476   : > { %v2868_v9 = vadd.f32 %v2846_v31, %v2804_v27 }
 0x477   : > { %v2699_v22 = vsub.f32 %v2636_v47, %v2668_v62  ;;  %2884 = vst.msk [vmem:[%s6165_s4 + $0x40] sm:$0xff] %vm2875_vm14, %v2867_v29  ;;  %v2904_v47 = vld [vmem:[%s6166_s5 + $0x60] sm:$0xff] }
 0x478   : > { %2885 = vst.msk [vmem:[%s6165_s4 + $0x48] sm:$0xff] %vm2875_vm14, %v2868_v9  ;;  %v2905_v9 = vld [vmem:[%s6166_s5 + $0x68] sm:$0xff] }
 0x479   : > { %v2811_v35 = vsel %vm5902_vm8, %v2699_v22, 0.0 }
 0x47a   : > { %2827 = vadd.xlane.f32.xlu1 %v2811_v35 }
 0x47c   : > { %v2848_v48 = vpop.xlane.xlu2 %2847 }
 0x47d   : > { %v2850_v3 = vpop.xlane.xlu1 %2849  ;;  %v2869_v4 = vadd.f32 %v2848_v48, %v2805_v26  ;;  %v2795_v48 = vld [vmem:[%s6165_s4] sm:$0xff] }
 0x47e   : > { %v2870_v37 = vadd.f32 %v2850_v3, %v2806_v50 }
 0x47f   : > { %2886 = vst.msk [vmem:[%s6165_s4 + $0x50] sm:$0xff] %vm2875_vm14, %v2869_v4 }
 0x480   : > { %2887 = vst.msk [vmem:[%s6165_s4 + $0x58] sm:$0xff] %vm2875_vm14, %v2870_v37  ;;  %v2906_v37 = vld [vmem:[%s6166_s5 + $0x70] sm:$0xff] }
 0x482   : > { %2952 = vadd.xlane.f32.xlu1 %v3525_v42 }
 0x484   : > { %v2852_v18 = vpop.xlane.xlu2 %2851 }
 0x485   : > { %v2854_v11 = vpop.xlane.xlu1 %2853  ;;  %v2871_v49 = vadd.f32 %v2852_v18, %v2807_v39 }
 0x486   : > { %v2872_v58 = vadd.f32 %v2854_v11, %v2808_v0 }
 0x487   : > { %2888 = vst.msk [vmem:[%s6165_s4 + $0x60] sm:$0xff] %vm2875_vm14, %v2871_v49 }
 0x488   : > { %2889 = vst.msk [vmem:[%s6165_s4 + $0x68] sm:$0xff] %vm2875_vm14, %v2872_v58 }
 0x48c   : > { %v2856_v6 = vpop.xlane.xlu2 %2855 }
 0x48d   : > { %v2858_v42 = vpop.xlane.xlu1 %2857  ;;  %v2873_v36 = vadd.f32 %v2856_v6, %v2809_v34 }
 0x48e   : > { %v2874_v21 = vadd.f32 %v2858_v42, %v2810_v61 }
 0x48f   : > { %v2836_v55 = vpop.xlane.xlu0 %2835  ;;  %2890 = vst.msk [vmem:[%s6165_s4 + $0x70] sm:$0xff] %vm2875_vm14, %v2873_v36 }
 0x490   : > { %v2863_v23 = vadd.f32 %v2836_v55, %v2799_v44  ;;  %2891 = vst.msk [vmem:[%s6165_s4 + $0x78] sm:$0xff] %vm2875_vm14, %v2874_v21 }
 0x492   : > { %2880 = vst.msk [vmem:[%s6165_s4 + $0x20] sm:$0xff] %vm2875_vm14, %v2863_v23 }
 0x494   : > { %v2925_v17 = vpop.xlane.xlu2 %2924 }
 0x495   : > { %v2929_v20 = vpop.xlane.xlu1 %2928  ;;  %v2956_v1 = vadd.f32 %v2925_v17, %v2892_v45 }
 0x496   : > { %v2958_v52 = vadd.f32 %v2929_v20, %v2894_v41 }
 0x497   : > { %v2927_v38 = vpop.xlane.xlu0 %2926  ;;  %2972 = vst.msk [vmem:[%s6166_s5] sm:$0xff] %vm2875_vm14, %v2956_v1 }
 0x498   : > { %v2957_v14 = vadd.f32 %v2927_v38, %v2893_v54  ;;  %2974 = vst.msk [vmem:[%s6166_s5 + $0x10] sm:$0xff] %vm2875_vm14, %v2958_v52 }
 0x49a   : > { %2973 = vst.msk [vmem:[%s6166_s5 + $0x8] sm:$0xff] %vm2875_vm14, %v2957_v14 }
 0x49c   : > { %v2931_v32 = vpop.xlane.xlu2 %2930 }
 0x49d   : > { %v2935_v19 = vpop.xlane.xlu1 %2934  ;;  %v2959_v28 = vadd.f32 %v2931_v32, %v2895_v46 }
 0x49e   : > { %v2961_v24 = vadd.f32 %v2935_v19, %v2897_v56 }
 0x49f   : > { %v2933_v5 = vpop.xlane.xlu0 %2932  ;;  %2975 = vst.msk [vmem:[%s6166_s5 + $0x18] sm:$0xff] %vm2875_vm14, %v2959_v28 }
 0x4a0   : > { %v2960_v8 = vadd.f32 %v2933_v5, %v2896_v15  ;;  %2977 = vst.msk [vmem:[%s6166_s5 + $0x28] sm:$0xff] %vm2875_vm14, %v2961_v24 }
 0x4a2   : > { %2976 = vst.msk [vmem:[%s6166_s5 + $0x20] sm:$0xff] %vm2875_vm14, %v2960_v8 }
 0x4a4   : > { %v2937_v10 = vpop.xlane.xlu2 %2936 }
 0x4a5   : > { %v2941_v59 = vpop.xlane.xlu1 %2940  ;;  %v2962_v43 = vadd.f32 %v2937_v10, %v2898_v12 }
 0x4a6   : > { %v2964_v13 = vadd.f32 %v2941_v59, %v2900_v7 }
 0x4a7   : > { %v2939_v30 = vpop.xlane.xlu0 %2938  ;;  %2978 = vst.msk [vmem:[%s6166_s5 + $0x30] sm:$0xff] %vm2875_vm14, %v2962_v43 }
 0x4a8   : > { %v2963_v53 = vadd.f32 %v2939_v30, %v2899_v16  ;;  %2980 = vst.msk [vmem:[%s6166_s5 + $0x40] sm:$0xff] %vm2875_vm14, %v2964_v13 }
 0x4aa   : > { %2979 = vst.msk [vmem:[%s6166_s5 + $0x38] sm:$0xff] %vm2875_vm14, %v2963_v53 }
 0x4ac   : > { %v2943_v57 = vpop.xlane.xlu2 %2942 }
 0x4ad   : > { %v2947_v60 = vpop.xlane.xlu1 %2946  ;;  %v2965_v25 = vadd.f32 %v2943_v57, %v2901_v33 }
 0x4ae   : > { %v2967_v51 = vadd.f32 %v2947_v60, %v2903_v2 }
 0x4af   : > { %2981 = vst.msk [vmem:[%s6166_s5 + $0x48] sm:$0xff] %vm2875_vm14, %v2965_v25  ;;  %v2945_v27 = vpop.xlane.xlu0 %2944 }
 0x4b0   : > { %2983 = vst.msk [vmem:[%s6166_s5 + $0x58] sm:$0xff] %vm2875_vm14, %v2967_v51  ;;  %v2966_v35 = vadd.f32 %v2945_v27, %v2902_v63 }
 0x4b2   : > { %2982 = vst.msk [vmem:[%s6166_s5 + $0x50] sm:$0xff] %vm2875_vm14, %v2966_v35 }
 0x4b4   : > { %v2949_v62 = vpop.xlane.xlu2 %2948 }
 0x4b5   : > { %v2968_v22 = vadd.f32 %v2949_v62, %v2904_v47 }
 0x4b7   : > { %2984 = vst.msk [vmem:[%s6166_s5 + $0x60] sm:$0xff] %vm2875_vm14, %v2968_v22  ;;  %v2951_v26 = vpop.xlane.xlu0 %2950 }
 0x4b8   : > { %v2969_v50 = vadd.f32 %v2951_v26, %v2905_v9 }
 0x4ba   : > { %2985 = vst.msk [vmem:[%s6166_s5 + $0x68] sm:$0xff] %vm2875_vm14, %v2969_v50 }
 0x4bc   : > { %v2955_v31 = vpop.xlane.xlu2 %2954 }
 0x4bd   : > { %v2971_v29 = vadd.f32 %v2955_v31, %v2907_v40 }
 0x4bf   : > { %2987 = vst.msk [vmem:[%s6166_s5 + $0x78] sm:$0xff] %vm2875_vm14, %v2971_v29 }
 0x4ed   : > { %v2828_v3 = vpop.xlane.xlu1 %2827 }
 0x4ee   : > { %v2859_v4 = vadd.f32 %v2828_v3, %v2795_v48 }
 0x4f0   : > { %2876 = vst.msk [vmem:[%s6165_s4] sm:$0xff] %vm2875_vm14, %v2859_v4 }
 0x4f5   : > { %v2953_v39 = vpop.xlane.xlu1 %2952 }
 0x4f6   : > { %v2970_v0 = vadd.f32 %v2953_v39, %v2906_v37 }
 0x4f8   : > { %2986 = vst.msk [vmem:[%s6166_s5 + $0x70] sm:$0xff] %vm2875_vm14, %v2970_v0 }
 0x4f9 PF: > { %s16_s20 = sadd.s32 1, %s3516_s20   ;;  %s6366_s18 = smov %s3512_s19 }
 0x4fa   : > { %p13_p7 = scmp.ge.s32.totalorder %s16_s20, 4   ;;  %s6367_s19 = smov %s6369_s21 }
 0x4fc   :  { %15 = sbr.rel (!%p13_p7) target bundleno = 2 (0x2), region = 99 }

</bundles_post_ra>
